<compile_context>
chip_gen: v5e
topology: v5e:2x2
jax: 0.10.0
libtpu: 0.0.40
codegen_flags: <defaults>
</compile_context>

<pallas_src>
import functools
import math

import jax
import jax.numpy as jnp
from jax.experimental import pallas as pl
from jax.experimental.pallas import tpu as pltpu


def _round_up(x, m):
    return ((x + m - 1) // m) * m


@functools.lru_cache(maxsize=1)
def _tpu_defaults():
    """(row tile, scoped VMEM limit) per TPU generation; conservative fallback runs everywhere."""
    try:
        info = pltpu.get_tpu_info()
        vmem_cap = getattr(info, "vmem_capacity_bytes", None) or 0
    except Exception:
        vmem_cap = 0
    if vmem_cap >= 100 * 1024 * 1024:          # v5e / v6e: 128 MiB physical VMEM
        return 512, 96 * 1024 * 1024
    return 256, 32 * 1024 * 1024               # v7x (64 MiB physical) or unknown


# ----------------------------------------------------------------------------
# Generic fused (LN ->) matmul (-> bias/act/GLU -> residual -> LN) kernel
# ----------------------------------------------------------------------------
def _make_linear_kernel(*, act, has_ln, has_res, has_pln, res_scale, gk):
    def kernel(*refs):
        x_ref, w_ref, b_ref = refs[0], refs[1], refs[2]
        p = 3
        lg_ref = lb_ref = res_ref = pg_ref = pb_ref = None
        if has_ln:
            lg_ref, lb_ref = refs[p], refs[p + 1]
            p += 2
        if has_res:
            res_ref = refs[p]
            p += 1
        if has_pln:
            pg_ref, pb_ref = refs[p], refs[p + 1]
            p += 2
        o_ref = refs[p]
        acc_ref = refs[p + 1]
        xln_ref = refs[p + 2] if has_ln else None

        @pl.when(pl.program_id(2) == 0)
        def _():
            acc_ref[...] = jnp.zeros_like(acc_ref)

        if has_ln:
            # LayerNorm computed once per row tile (j == 0) and cached; reused for all N tiles.
            @pl.when(jnp.logical_and(pl.program_id(1) == 0, pl.program_id(2) == 0))
            def _():
                xf = x_ref[...].astype(jnp.float32)
                mu = jnp.mean(xf, axis=-1, keepdims=True)
                var = jnp.mean(jnp.square(xf - mu), axis=-1, keepdims=True)
                xf = (xf - mu) * jax.lax.rsqrt(var + 1e-5) * lg_ref[...] + lb_ref[...]
                xln_ref[...] = xf.astype(jnp.bfloat16)

            xv = xln_ref[...]
        else:
            xv = x_ref[...].astype(jnp.bfloat16)
        acc_ref[...] += jnp.dot(xv, w_ref[...], preferred_element_type=jnp.float32)

        @pl.when(pl.program_id(2) == gk - 1)
        def _():
            y = acc_ref[...] + b_ref[...]
            if act == "relu":
                y = jnp.maximum(y, 0.0)
            elif act == "swish":
                y = y * jax.nn.sigmoid(y)
            elif act == "glu":
                half = y.shape[-1] // 2
                y = y[:, :half] * jax.nn.sigmoid(y[:, half:])
            if has_res:
                y = res_ref[...].astype(jnp.float32) + res_scale * y
            if has_pln:
                mu = jnp.mean(y, axis=-1, keepdims=True)
                var = jnp.mean(jnp.square(y - mu), axis=-1, keepdims=True)
                y = (y - mu) * jax.lax.rsqrt(var + 1e-5) * pg_ref[...] + pb_ref[...]
            o_ref[...] = y.astype(o_ref.dtype)

    return kernel


def fused_linear(x, w, b, *, act="none", ln=None, post_ln=None,
                 residual=None, res_scale=1.0, out_dtype=jnp.float32):
    """y = act(LN?(x) @ w + b); optionally y = residual + res_scale*y; optionally y = LN(y).

    x: (..., K), w: (K, N), b: (N,).  bf16 MXU operands (cast in-kernel), f32 accumulation.
    Output lane dim is padded to a multiple of 128 (lane-dense stores) unless GLU / post-LN need
    the true feature width, then sliced back.
    """
    lead = x.shape[:-1]
    K = x.shape[-1]
    N = w.shape[-1]
    x2 = x.reshape(-1, K)
    M = x2.shape[0]

    glu = act == "glu"
    n_out = N // 2 if glu else N
    full_n = glu or (post_ln is not None)

    TM, vmem_limit = _tpu_defaults()
    TN, TK = 512, 512

    # ---- N (lane) tiling ----
    if full_n:
        Np = tn = N                          # GLU split / post-LN stats need the true width
    else:
        Np = _round_up(N, 128)               # lane-dense outputs
        if Np > TN:
            tn, Np = TN, _round_up(N, TN)
        else:
            tn = Np
    gn = Np // tn

    # ---- M (sublane) tiling ----
    Mp = _round_up(M, 8)
    if Mp > TM:
        tm, Mp = TM, _round_up(M, TM)
    else:
        tm = Mp
        # v7x has two TensorCores: split M when the parallel grid would collapse to one tile.
        if gn == 1 and Mp >= 16 and Mp % 16 == 0:
            tm = Mp // 2
    gm = Mp // tm

    # ---- K tiling (fused LN needs the full feature row) ----
    if ln is not None or K <= TK:
        Kp = tk = K
    else:
        tk, Kp = TK, _round_up(K, TK)
    gk = Kp // tk

    n_out_p = n_out if glu else Np
    tno = n_out_p // gn

    # ---- operand preparation (no wrapper-side activation casts) ----
    xin = x2
    if Mp != M or Kp != K:
        xin = jnp.pad(xin, ((0, Mp - M), (0, Kp - K)))
    w_p = w.astype(jnp.bfloat16)
    if Kp != K or Np != N:
        w_p = jnp.pad(w_p, ((0, Kp - K), (0, Np - N)))
    b_p = b.reshape(1, N).astype(jnp.float32)
    if Np != N:
        b_p = jnp.pad(b_p, ((0, 0), (0, Np - N)))

    w_map = lambda i, j, k: (k, j)
    if gk > 1:
        # Weight-streaming regime: triple-buffer the weight tiles to hide exposed weight DMA.
        try:
            w_spec = pl.BlockSpec((tk, tn), w_map, pipeline_mode=pl.Buffered(3))
        except Exception:
            w_spec = pl.BlockSpec((tk, tn), w_map)
    else:
        w_spec = pl.BlockSpec((tk, tn), w_map)

    inputs = [xin, w_p, b_p]
    in_specs = [
        pl.BlockSpec((tm, tk), lambda i, j, k: (i, k)),
        w_spec,
        pl.BlockSpec((1, tn), lambda i, j, k: (0, j)),
    ]
    if ln is not None:
        g, bb = ln
        inputs += [g.reshape(1, K).astype(jnp.float32),
                   bb.reshape(1, K).astype(jnp.float32)]
        in_specs += [pl.BlockSpec((1, K), lambda i, j, k: (0, 0))] * 2
    if residual is not None:
        r2 = residual.reshape(-1, n_out)
        if Mp != M or n_out_p != n_out:
            r2 = jnp.pad(r2, ((0, Mp - M), (0, n_out_p - n_out)))
        inputs.append(r2)
        in_specs.append(pl.BlockSpec((tm, tno), lambda i, j, k: (i, j)))
    if post_ln is not None:
        pg, pb = post_ln
        inputs += [pg.reshape(1, n_out).astype(jnp.float32),
                   pb.reshape(1, n_out).astype(jnp.float32)]
        in_specs += [pl.BlockSpec((1, n_out_p), lambda i, j, k: (0, 0))] * 2

    scratch_shapes = [pltpu.VMEM((tm, tn), jnp.float32)]
    if ln is not None:
        scratch_shapes.append(pltpu.VMEM((tm, tk), jnp.bfloat16))

    # The cached-LN scratch needs the j axis to visit j==0 first per row tile -> mark it arbitrary.
    dims = ("parallel", "arbitrary", "arbitrary") if ln is not None \
        else ("parallel", "parallel", "arbitrary")

    kernel = _make_linear_kernel(act=act, has_ln=ln is not None,
                                 has_res=residual is not None,
                                 has_pln=post_ln is not None,
                                 res_scale=float(res_scale), gk=gk)
    out = pl.pallas_call(
        kernel,
        out_shape=jax.ShapeDtypeStruct((Mp, n_out_p), out_dtype),
        grid=(gm, gn, gk),
        in_specs=in_specs,
        out_specs=pl.BlockSpec((tm, tno), lambda i, j, k: (i, j)),
        scratch_shapes=scratch_shapes,
        compiler_params=pltpu.CompilerParams(
            dimension_semantics=dims,
            vmem_limit_bytes=vmem_limit),
    )(*inputs)
    out = out[:M, :n_out]
    return out.reshape(*lead, n_out)


# ----------------------------------------------------------------------------
# Attention kernels: grid over (batch, head); heads are addressable, scores stay bf16
# ----------------------------------------------------------------------------
def _pos_score_kernel(q_ref, vb_ref, pe_ref, o_ref):
    # padded_pos[i, c] = (q_i + v_bias_h) . pe_aug_h[c]   with pe_aug_h[0] == 0
    qv = q_ref[0, 0, 0].astype(jnp.float32) + vb_ref[0].astype(jnp.float32)   # (T, d)
    s = jax.lax.dot_general(qv.astype(jnp.bfloat16), pe_ref[0],
                            (((1,), (1,)), ((), ())),
                            preferred_element_type=jnp.float32)               # (T, T+1)
    o_ref[0, 0] = s.astype(o_ref.dtype)


def pallas_pos_scores(qkvh, v_bias, pe_aug):
    _, B, H, T, d = qkvh.shape
    _, vmem_limit = _tpu_defaults()
    return pl.pallas_call(
        _pos_score_kernel,
        out_shape=jax.ShapeDtypeStruct((B, H, T, T + 1), jnp.bfloat16),
        grid=(B, H),
        in_specs=[pl.BlockSpec((1, 1, 1, T, d), lambda b, h: (0, b, h, 0, 0)),
                  pl.BlockSpec((1, 1, d), lambda b, h: (h, 0, 0)),
                  pl.BlockSpec((1, T + 1, d), lambda b, h: (h, 0, 0))],
        out_specs=pl.BlockSpec((1, 1, T, T + 1), lambda b, h: (b, h, 0, 0)),
        compiler_params=pltpu.CompilerParams(
            dimension_semantics=("parallel", "parallel"),
            vmem_limit_bytes=vmem_limit),
    )(qkvh, v_bias, pe_aug)


def _attn_kernel(qkv_ref, ub_ref, pos_ref, o_ref, *, scale):
    # TODO(synk): no key-padding mask (matches openspeech ConformerBlock, which ignores the mask).
    # TODO(synk): T / pos lane dims are not 128-padded; realistic T benefits from padding + a
    #             flash-style KV-tiled variant for very long lines.
    q = qkv_ref[0, 0, 0].astype(jnp.float32) + ub_ref[0].astype(jnp.float32)  # (T, d)
    k = qkv_ref[1, 0, 0]                                                      # (T, d) bf16
    v = qkv_ref[2, 0, 0]                                                      # (T, d) bf16
    s = jax.lax.dot_general(q.astype(jnp.bfloat16), k, (((1,), (1,)), ((), ())),
                            preferred_element_type=jnp.float32)               # (T, T)
    s = (s + pos_ref[0, 0].astype(jnp.float32)) * scale
    m = jnp.max(s, axis=-1, keepdims=True)
    p = jnp.exp(s - m)
    p = p * pl.reciprocal(jnp.sum(p, axis=-1, keepdims=True), approx=True)
    o_ref[0, 0] = jnp.dot(p.astype(jnp.bfloat16), v,
                          preferred_element_type=jnp.float32).astype(o_ref.dtype)


def pallas_attention(qkvh, u_bias, pos_shifted, scale):
    _, B, H, T, d = qkvh.shape
    _, vmem_limit = _tpu_defaults()
    return pl.pallas_call(
        functools.partial(_attn_kernel, scale=float(scale)),
        out_shape=jax.ShapeDtypeStruct((B, H, T, d), jnp.bfloat16),
        grid=(B, H),
        in_specs=[pl.BlockSpec((3, 1, 1, T, d), lambda b, h: (0, b, h, 0, 0)),
                  pl.BlockSpec((1, 1, d), lambda b, h: (h, 0, 0)),
                  pl.BlockSpec((1, 1, T, T), lambda b, h: (b, h, 0, 0))],
        out_specs=pl.BlockSpec((1, 1, T, d), lambda b, h: (b, h, 0, 0)),
        compiler_params=pltpu.CompilerParams(
            dimension_semantics=("parallel", "parallel"),
            vmem_limit_bytes=vmem_limit),
    )(qkvh, u_bias, pos_shifted)


# ----------------------------------------------------------------------------
# Depthwise conv + BatchNorm(eval) + Swish kernel (bf16 input, ref-sliced taps)
# ----------------------------------------------------------------------------
def _dwconv_kernel(x_ref, w_ref, s_ref, t_ref, o_ref, *, k, T):
    acc = x_ref[0, pl.ds(0, T), :].astype(jnp.float32) * w_ref[0:1, :]
    for i in range(1, k):                    # static unrolled tap loop, per-tap ref slices
        acc = acc + x_ref[0, pl.ds(i, T), :].astype(jnp.float32) * w_ref[i:i + 1, :]
    y = acc * s_ref[...] + t_ref[...]        # fused BatchNorm (eval-mode affine)
    o_ref[0] = (y * jax.nn.sigmoid(y)).astype(o_ref.dtype)   # fused Swish


def pallas_depthwise_bn_swish(x, w, kernel_size, bn_g, bn_b, bn_mean, bn_var, eps=1e-5):
    """Depthwise 1D conv ('same', stride 1, no bias) + BN(eval) + Swish.  x: (B,T,D), w: (k,D)."""
    # TODO(synk): halo still comes from a (cheap, bf16) jnp.pad; an in-kernel masked-tap halo would
    #             remove that one extra pass.  Assumes odd kernel_size (PyTorch padding=(k-1)//2).
    B, T, D = x.shape
    pad = (kernel_size - 1) // 2
    xp = jnp.pad(x.astype(jnp.bfloat16), ((0, 0), (pad, pad), (0, 0)))
    Tp = T + 2 * pad
    inv = jax.lax.rsqrt(bn_var + eps)
    scale = (bn_g * inv).reshape(1, D).astype(jnp.float32)
    shift = (bn_b - bn_mean * bn_g * inv).reshape(1, D).astype(jnp.float32)
    _, vmem_limit = _tpu_defaults()
    return pl.pallas_call(
        functools.partial(_dwconv_kernel, k=kernel_size, T=T),
        out_shape=jax.ShapeDtypeStruct((B, T, D), jnp.bfloat16),
        grid=(B,),
        in_specs=[pl.BlockSpec((1, Tp, D), lambda b: (b, 0, 0)),
                  pl.BlockSpec((kernel_size, D), lambda b: (0, 0)),
                  pl.BlockSpec((1, D), lambda b: (0, 0)),
                  pl.BlockSpec((1, D), lambda b: (0, 0))],
        out_specs=pl.BlockSpec((1, T, D), lambda b: (b, 0, 0)),
        compiler_params=pltpu.CompilerParams(dimension_semantics=("parallel",),
                                             vmem_limit_bytes=vmem_limit),
    )(xp, w.astype(jnp.float32), scale, shift)


# ----------------------------------------------------------------------------
# Model pieces (layout glue in JAX, heavy compute in the Pallas kernels)
# ----------------------------------------------------------------------------
def conv2d_k3s2_relu_cl(x_cl, w, b):
    """Conv2d(k=3, s=2, no padding) + ReLU via im2col + fused_linear, channel-last layout."""
    # TODO(synk): im2col still materializes the 9x patch copy in JAX (bf16 now); a fully in-kernel
    #             stride-2 window walk would remove that HBM round trip.
    N, A, Bdim, Cin = x_cl.shape
    Cout = w.shape[0]
    Ao = (A - 3) // 2 + 1
    Bo = (Bdim - 3) // 2 + 1
    xb = x_cl.astype(jnp.bfloat16)
    cols = [xb[:, di:di + 2 * Ao:2, dj:dj + 2 * Bo:2, :]
            for di in range(3) for dj in range(3)]
    patches = jnp.stack(cols, axis=3).reshape(N * Ao * Bo, 9 * Cin)
    wm = jnp.transpose(w, (2, 3, 1, 0)).reshape(9 * Cin, Cout)
    out = fused_linear(patches, wm, b, act="relu", out_dtype=jnp.bfloat16)
    return out.reshape(N, Ao, Bo, Cout)


def sinusoidal_pe(length, d_model):
    pos = jnp.arange(length, dtype=jnp.float32)[:, None]
    div = jnp.exp(jnp.arange(0, d_model, 2, dtype=jnp.float32)
                  * (-math.log(10000.0) / d_model))
    pe = jnp.zeros((length, d_model), jnp.float32)
    pe = pe.at[:, 0::2].set(jnp.sin(pos * div))
    pe = pe.at[:, 1::2].set(jnp.cos(pos * div))
    return pe


def feed_forward_block(x, p, ff_factor, post_ln=None):
    # x + ff_factor * (Linear2(Swish(Linear1(LN(x)))));  optional fused block-final LayerNorm.
    h = fused_linear(x, p["w1"], p["b1"], act="swish",
                     ln=(p["ln_g"], p["ln_b"]), out_dtype=jnp.bfloat16)
    return fused_linear(h, p["w2"], p["b2"], residual=x, res_scale=ff_factor,
                        post_ln=post_ln, out_dtype=jnp.bfloat16)


def mhsa_block(x, p, num_heads):
    # Relative multi-head self-attention (openspeech style) with residual.
    B, T, D = x.shape
    d = D // num_heads
    pos = sinusoidal_pe(T, D)

    # LN + single [q | k | v] projection (no duplicated q), bf16 activations.
    qkv = fused_linear(x, p["w_qkv"], p["b_qkv"],
                       ln=(p["ln_g"], p["ln_b"]), out_dtype=jnp.bfloat16)      # (B, T, 3D)
    qkvh = qkv.reshape(B, T, 3, num_heads, d).transpose(2, 0, 3, 1, 4)          # (3, B, H, T, d)

    pe = fused_linear(pos, p["wp"], jnp.zeros((D,), jnp.float32),
                      out_dtype=jnp.bfloat16)                                   # (T, D)
    pe_h = pe.reshape(T, num_heads, d).transpose(1, 0, 2)                       # (H, T, d)
    # Zero PE row folded in -> the kernel emits the already-padded score matrix directly.
    pe_aug = jnp.concatenate([jnp.zeros((num_heads, 1, d), jnp.bfloat16), pe_h], axis=1)

    pos_padded = pallas_pos_scores(qkvh, p["v_bias"], pe_aug)                   # (B, H, T, T+1) bf16
    # Transformer-XL relative shift: free reshape + one bf16 slice (no f32 HBM round trip).
    pos_shifted = pos_padded.reshape(B, num_heads, T + 1, T)[:, :, 1:, :]       # (B, H, T, T)

    ctx = pallas_attention(qkvh, p["u_bias"], pos_shifted, 1.0 / math.sqrt(D))  # (B, H, T, d) bf16
    ctx = ctx.transpose(0, 2, 1, 3).reshape(B, T, D)
    return fused_linear(ctx, p["wo"], p["bo"], residual=x, out_dtype=jnp.bfloat16)


def conv_module_block(x, p, kernel_size):
    # x + (pw2(Swish(BN(DWConv(GLU(pw1(LN(x))))))))
    y = fused_linear(x, p["pw1_w"], p["pw1_b"], act="glu",
                     ln=(p["ln_g"], p["ln_b"]), out_dtype=jnp.bfloat16)         # (B, T, D)
    y = pallas_depthwise_bn_swish(y, p["dw_w"], kernel_size,
                                  p["bn_g"], p["bn_b"], p["bn_mean"], p["bn_var"])
    return fused_linear(y, p["pw2_w"], p["pw2_b"], residual=x, out_dtype=jnp.bfloat16)


def conformer_block(x, lp, cfg):
    ff_factor = 0.5 if cfg["half_step_residual"] else 1.0
    x = feed_forward_block(x, lp["ff1"], ff_factor)
    x = mhsa_block(x, lp["attn"], cfg["num_attention_heads"])
    x = conv_module_block(x, lp["conv"], cfg["conv_kernel_size"])
    x = feed_forward_block(x, lp["ff2"], ff_factor,
                           post_ln=(lp["lnf_g"], lp["lnf_b"]))                  # final LN fused
    return x


def recognition_forward(params, line, lens, cfg):
    """line: (N, 1, H, W) NCHW f32.  Returns (probits (N, ~W//4, num_classes), out_lens (N,))."""
    N, _, Hh, W = line.shape
    x = jnp.transpose(line[:, 0, :, :], (0, 2, 1))             # squeeze(1).transpose(1,2) -> (N,W,H)
    if lens is None:
        lens = jnp.full((N,), W, jnp.int32)

    # Conv2dSubsampling (factor 4): two Conv2d(k=3, s=2) + ReLU, channel-last end to end.
    y = x[..., None]                                           # (N, T, F, 1)
    y = conv2d_k3s2_relu_cl(y, params["sub_w1"], params["sub_b1"])
    y = conv2d_k3s2_relu_cl(y, params["sub_w2"], params["sub_b2"])
    _, T2, F2, C = y.shape
    y = jnp.transpose(y, (0, 1, 3, 2)).reshape(N, T2, C * F2)  # channel-major features (c*F + f)
    out_lens = ((lens - 1) // 2 - 1) // 2                      # exact subsampled lengths

    # Input projection (dropout = identity in eval); activation stream kept in bf16.
    y = fused_linear(y, params["proj_w"], params["proj_b"], out_dtype=jnp.bfloat16)

    for lp in params["layers"]:
        y = conformer_block(y, lp, cfg)

    # Decoder Linear(encoder_dim, num_classes); lane dim padded to 128 internally, sliced back.
    probits = fused_linear(y, params["dec_w"], params["dec_b"])
    return probits, out_lens


# ----------------------------------------------------------------------------
# Deterministic parameter initialisation (synthetic weights, no checkpoint)
# ----------------------------------------------------------------------------
def make_params(cfg):
    assert cfg["subsampling_factor"] == 4, "only subsampling factor 4 implemented"
    assert cfg["conv_expansion_factor"] == 2, "GLU requires conv expansion factor 2"
    key_iter = iter(jax.random.split(jax.random.PRNGKey(0), 4096))

    def nk():
        return next(key_iter)

    D = cfg["encoder_dim"]
    Hh = cfg["height"]
    Cs = cfg["subsampling_conv_channels"]
    ff = cfg["feed_forward_expansion_factor"]
    k = cfg["conv_kernel_size"]
    nh = cfg["num_attention_heads"]
    dh = D // nh

    def linear(fi, fo, bias=True):
        bound = 1.0 / math.sqrt(fi)
        w = jax.random.uniform(nk(), (fi, fo), jnp.float32, -bound, bound)
        b = (jax.random.uniform(nk(), (fo,), jnp.float32, -bound, bound)
             if bias else jnp.zeros((fo,), jnp.float32))
        return w, b

    def conv2d(ci, co):
        bound = 1.0 / math.sqrt(ci * 9)
        w = jax.random.uniform(nk(), (co, ci, 3, 3), jnp.float32, -bound, bound)
        b = jax.random.uniform(nk(), (co,), jnp.float32, -bound, bound)
        return w, b

    bf = lambda a: a.astype(jnp.bfloat16)   # inference-time weight storage in bf16 (MXU operand)

    p = {}
    p["sub_w1"], p["sub_b1"] = conv2d(1, Cs)
    p["sub_w2"], p["sub_b2"] = conv2d(Cs, Cs)
    freq = ((Hh - 1) // 2 - 1) // 2
    pw, pb = linear(Cs * freq, D)
    p["proj_w"], p["proj_b"] = bf(pw), pb

    layers = []
    for _ in range(cfg["num_encoder_layers"]):
        lp = {}
        for name in ("ff1", "ff2"):
            w1, b1 = linear(D, D * ff)
            w2, b2 = linear(D * ff, D)
            lp[name] = dict(ln_g=jnp.ones((D,), jnp.float32), ln_b=jnp.zeros((D,), jnp.float32),
                            w1=bf(w1), b1=b1, w2=bf(w2), b2=b2)
        wq, bq = linear(D, D)
        wk, bk = linear(D, D)
        wv, bv = linear(D, D)
        wp, _ = linear(D, D, bias=False)
        wo, bo = linear(D, D)
        xlim = math.sqrt(6.0 / (nh + dh))
        u = jax.random.uniform(nk(), (nh, dh), jnp.float32, -xlim, xlim)
        vb = jax.random.uniform(nk(), (nh, dh), jnp.float32, -xlim, xlim)
        # Single [q | k | v] projection (no duplicated wq); u/v biases applied per-head in-kernel.
        w_qkv = bf(jnp.concatenate([wq, wk, wv], axis=1))
        b_qkv = jnp.concatenate([bq, bk, bv])
        lp["attn"] = dict(ln_g=jnp.ones((D,), jnp.float32), ln_b=jnp.zeros((D,), jnp.float32),
                          w_qkv=w_qkv, b_qkv=b_qkv, wp=bf(wp), wo=bf(wo), bo=bo,
                          u_bias=u.reshape(nh, 1, dh), v_bias=vb.reshape(nh, 1, dh))
        pw1_w, pw1_b = linear(D, D * cfg["conv_expansion_factor"])
        dw_bound = 1.0 / math.sqrt(k)
        dw_w = jax.random.uniform(nk(), (k, D), jnp.float32, -dw_bound, dw_bound)
        pw2_w, pw2_b = linear(D, D)
        lp["conv"] = dict(ln_g=jnp.ones((D,), jnp.float32), ln_b=jnp.zeros((D,), jnp.float32),
                          pw1_w=bf(pw1_w), pw1_b=pw1_b, dw_w=dw_w,
                          bn_g=jnp.ones((D,), jnp.float32), bn_b=jnp.zeros((D,), jnp.float32),
                          bn_mean=jnp.zeros((D,), jnp.float32), bn_var=jnp.ones((D,), jnp.float32),
                          pw2_w=bf(pw2_w), pw2_b=pw2_b)
        lp["lnf_g"] = jnp.ones((D,), jnp.float32)
        lp["lnf_b"] = jnp.zeros((D,), jnp.float32)
        layers.append(lp)
    p["layers"] = layers
    dw, db = linear(D, cfg["num_classes"])
    p["dec_w"], p["dec_b"] = bf(dw), db
    return p


# ----------------------------------------------------------------------------
if __name__ == "__main__":
    cfg = dict(
        num_classes=10,
        height=16,
        encoder_dim=32,
        num_encoder_layers=2,
        num_attention_heads=4,
        feed_forward_expansion_factor=2,
        conv_expansion_factor=2,
        conv_kernel_size=9,
        half_step_residual=True,
        subsampling_conv_channels=8,
        subsampling_factor=4,
    )
    params = make_params(cfg)

    key = jax.random.PRNGKey(0)
    W = 64
    line = jax.random.normal(jax.random.fold_in(key, 123),
                             (2, 1, cfg["height"], W), jnp.float32)   # NCHW
    lens = jnp.array([64, 48], jnp.int32)

    fwd = jax.jit(lambda p, x, l: recognition_forward(p, x, l, cfg))
    probits, out_lens = fwd(params, line, lens)
    jax.block_until_ready(probits)
    jax.block_until_ready(out_lens)

    assert probits.shape == (2, 15, cfg["num_classes"]), probits.shape
    assert probits.dtype == jnp.float32
    assert out_lens.shape == (2,)
    assert bool(jnp.all(jnp.isfinite(probits)))
    print("KERNEL_OK")
</pallas_src>

<mosaic_0001>
module attributes {stable_mosaic.version = 11 : i64} {
  func.func @kernel(%arg0: i32, %arg1: i32, %arg2: i32, %arg3: memref<256x9xbf16, #tpu.memory_space<vmem>>, %arg4: memref<9x128xbf16, #tpu.memory_space<vmem>>, %arg5: memref<1x128xf32, #tpu.memory_space<vmem>>, %arg6: memref<256x128xbf16, #tpu.memory_space<vmem>>, %arg7: memref<256x128xf32, #tpu.memory_space<vmem>>) attributes {dimension_semantics = [#tpu.dimension_semantics<parallel>, #tpu.dimension_semantics<parallel>, #tpu.dimension_semantics<arbitrary>], iteration_bounds = array<i64: 2, 1, 1>, scalar_prefetch = 0 : i64, scratch_operands = 1 : i64, tpu.core_type = #tpu.core_type<tc>, window_params = [{transform_indices = @transform_0, window_bounds = array<i64: 256, 9>}, {transform_indices = @transform_1, window_bounds = array<i64: 9, 128>}, {transform_indices = @transform_2, window_bounds = array<i64: 1, 128>}, {transform_indices = @transform_3, window_bounds = array<i64: 256, 128>}]} {
    %c0_i32 = arith.constant 0 : i32
    %0 = arith.cmpi eq, %arg2, %c0_i32 : i32
    %1 = arith.extui %0 : i1 to i32
    %c0_i32_0 = arith.constant 0 : i32
    %2 = arith.cmpi ne, %1, %c0_i32_0 : i32
    scf.if %2 {
      %cst_10 = arith.constant 0.000000e+00 : f32
      %12 = vector.broadcast %cst_10 : f32 to vector<256x128xf32>
      %c0_11 = arith.constant 0 : index
      %c0_12 = arith.constant 0 : index
      %13 = vector.load %arg7[%c0_11, %c0_12] : memref<256x128xf32, #tpu.memory_space<vmem>>, vector<256x128xf32>
      tpu.vector_store %arg7[%c0_11, %c0_12], %12 {strides = array<i32>} : memref<256x128xf32, #tpu.memory_space<vmem>>, vector<256x128xf32>,
    } else {
    }
    %c0 = arith.constant 0 : index
    %c0_1 = arith.constant 0 : index
    %3 = vector.load %arg3[%c0, %c0_1] : memref<256x9xbf16, #tpu.memory_space<vmem>>, vector<256x9xbf16>
    %c0_2 = arith.constant 0 : index
    %c0_3 = arith.constant 0 : index
    %4 = vector.load %arg7[%c0_2, %c0_3] : memref<256x128xf32, #tpu.memory_space<vmem>>, vector<256x128xf32>
    %c0_4 = arith.constant 0 : index
    %c0_5 = arith.constant 0 : index
    %5 = vector.load %arg4[%c0_4, %c0_5] : memref<9x128xbf16, #tpu.memory_space<vmem>>, vector<9x128xbf16>
    %cst = arith.constant dense<0.000000e+00> : vector<256x128xf32>
    %6 = tpu.matmul %3, %5, %cst {dimension_numbers = #tpu.dot_dimension_numbers<[1], [0], [0], [1], [0, 0, 1, 1], [], []>} : vector<256x9xbf16>, vector<9x128xbf16>, vector<256x128xf32> -> vector<256x128xf32>
    %7 = arith.addf %4, %6 : vector<256x128xf32>
    %c0_6 = arith.constant 0 : index
    %c0_7 = arith.constant 0 : index
    %8 = vector.load %arg7[%c0_6, %c0_7] : memref<256x128xf32, #tpu.memory_space<vmem>>, vector<256x128xf32>
    tpu.vector_store %arg7[%c0_6, %c0_7], %7 {strides = array<i32>} : memref<256x128xf32, #tpu.memory_space<vmem>>, vector<256x128xf32>,
    %c0_i32_8 = arith.constant 0 : i32
    %9 = arith.cmpi eq, %arg2, %c0_i32_8 : i32
    %10 = arith.extui %9 : i1 to i32
    %c0_i32_9 = arith.constant 0 : i32
    %11 = arith.cmpi ne, %10, %c0_i32_9 : i32
    scf.if %11 {
      %c0_10 = arith.constant 0 : index
      %c0_11 = arith.constant 0 : index
      %12 = vector.load %arg7[%c0_10, %c0_11] : memref<256x128xf32, #tpu.memory_space<vmem>>, vector<256x128xf32>
      %c0_12 = arith.constant 0 : index
      %c0_13 = arith.constant 0 : index
      %13 = vector.load %arg5[%c0_12, %c0_13] : memref<1x128xf32, #tpu.memory_space<vmem>>, vector<1x128xf32>
      %14 = vector.broadcast %13 : vector<1x128xf32> to vector<256x128xf32>
      %15 = arith.addf %12, %14 : vector<256x128xf32>
      %cst_14 = arith.constant 0.000000e+00 : f32
      %16 = vector.broadcast %cst_14 : f32 to vector<256x128xf32>
      %17 = arith.maximumf %15, %16 : vector<256x128xf32>
      %18 = arith.truncf %17 : vector<256x128xf32> to vector<256x128xbf16>
      %c0_15 = arith.constant 0 : index
      %c0_16 = arith.constant 0 : index
      %19 = vector.load %arg6[%c0_15, %c0_16] : memref<256x128xbf16, #tpu.memory_space<vmem>>, vector<256x128xbf16>
      tpu.vector_store %arg6[%c0_15, %c0_16], %18 {strides = array<i32>} : memref<256x128xbf16, #tpu.memory_space<vmem>>, vector<256x128xbf16>,
    } else {
    }
    return
  }
  func.func @transform_0(%arg0: i32, %arg1: i32, %arg2: i32) -> (i32, i32) {
    %c0_i32 = arith.constant 0 : i32
    return %arg0, %arg2 : i32, i32
  }
  func.func @transform_1(%arg0: i32, %arg1: i32, %arg2: i32) -> (i32, i32) {
    %c0_i32 = arith.constant 0 : i32
    return %arg2, %arg1 : i32, i32
  }
  func.func @transform_2(%arg0: i32, %arg1: i32, %arg2: i32) -> (i32, i32) {
    %c0_i32 = arith.constant 0 : i32
    %c0_i32_0 = arith.constant 0 : i32
    return %c0_i32, %arg1 : i32, i32
  }
  func.func @transform_3(%arg0: i32, %arg1: i32, %arg2: i32) -> (i32, i32) {
    %c0_i32 = arith.constant 0 : i32
    return %arg0, %arg1 : i32, i32
  }
}

module attributes {stable_mosaic.version = 11 : i64} {
  func.func @kernel(%arg0: i32, %arg1: i32, %arg2: i32, %arg3: memref<48x72xbf16, #tpu.memory_space<vmem>>, %arg4: memref<72x128xbf16, #tpu.memory_space<vmem>>, %arg5: memref<1x128xf32, #tpu.memory_space<vmem>>, %arg6: memref<48x128xbf16, #tpu.memory_space<vmem>>, %arg7: memref<48x128xf32, #tpu.memory_space<vmem>>) attributes {dimension_semantics = [#tpu.dimension_semantics<parallel>, #tpu.dimension_semantics<parallel>, #tpu.dimension_semantics<arbitrary>], iteration_bounds = array<i64: 2, 1, 1>, scalar_prefetch = 0 : i64, scratch_operands = 1 : i64, tpu.core_type = #tpu.core_type<tc>, window_params = [{transform_indices = @transform_0, window_bounds = array<i64: 48, 72>}, {transform_indices = @transform_1, window_bounds = array<i64: 72, 128>}, {transform_indices = @transform_2, window_bounds = array<i64: 1, 128>}, {transform_indices = @transform_3, window_bounds = array<i64: 48, 128>}]} {
    %c0_i32 = arith.constant 0 : i32
    %0 = arith.cmpi eq, %arg2, %c0_i32 : i32
    %1 = arith.extui %0 : i1 to i32
    %c0_i32_0 = arith.constant 0 : i32
    %2 = arith.cmpi ne, %1, %c0_i32_0 : i32
    scf.if %2 {
      %cst_10 = arith.constant 0.000000e+00 : f32
      %12 = vector.broadcast %cst_10 : f32 to vector<48x128xf32>
      %c0_11 = arith.constant 0 : index
      %c0_12 = arith.constant 0 : index
      %13 = vector.load %arg7[%c0_11, %c0_12] : memref<48x128xf32, #tpu.memory_space<vmem>>, vector<48x128xf32>
      tpu.vector_store %arg7[%c0_11, %c0_12], %12 {strides = array<i32>} : memref<48x128xf32, #tpu.memory_space<vmem>>, vector<48x128xf32>,
    } else {
    }
    %c0 = arith.constant 0 : index
    %c0_1 = arith.constant 0 : index
    %3 = vector.load %arg3[%c0, %c0_1] : memref<48x72xbf16, #tpu.memory_space<vmem>>, vector<48x72xbf16>
    %c0_2 = arith.constant 0 : index
    %c0_3 = arith.constant 0 : index
    %4 = vector.load %arg7[%c0_2, %c0_3] : memref<48x128xf32, #tpu.memory_space<vmem>>, vector<48x128xf32>
    %c0_4 = arith.constant 0 : index
    %c0_5 = arith.constant 0 : index
    %5 = vector.load %arg4[%c0_4, %c0_5] : memref<72x128xbf16, #tpu.memory_space<vmem>>, vector<72x128xbf16>
    %cst = arith.constant dense<0.000000e+00> : vector<48x128xf32>
    %6 = tpu.matmul %3, %5, %cst {dimension_numbers = #tpu.dot_dimension_numbers<[1], [0], [0], [1], [0, 0, 1, 1], [], []>} : vector<48x72xbf16>, vector<72x128xbf16>, vector<48x128xf32> -> vector<48x128xf32>
    %7 = arith.addf %4, %6 : vector<48x128xf32>
    %c0_6 = arith.constant 0 : index
    %c0_7 = arith.constant 0 : index
    %8 = vector.load %arg7[%c0_6, %c0_7] : memref<48x128xf32, #tpu.memory_space<vmem>>, vector<48x128xf32>
    tpu.vector_store %arg7[%c0_6, %c0_7], %7 {strides = array<i32>} : memref<48x128xf32, #tpu.memory_space<vmem>>, vector<48x128xf32>,
    %c0_i32_8 = arith.constant 0 : i32
    %9 = arith.cmpi eq, %arg2, %c0_i32_8 : i32
    %10 = arith.extui %9 : i1 to i32
    %c0_i32_9 = arith.constant 0 : i32
    %11 = arith.cmpi ne, %10, %c0_i32_9 : i32
    scf.if %11 {
      %c0_10 = arith.constant 0 : index
      %c0_11 = arith.constant 0 : index
      %12 = vector.load %arg7[%c0_10, %c0_11] : memref<48x128xf32, #tpu.memory_space<vmem>>, vector<48x128xf32>
      %c0_12 = arith.constant 0 : index
      %c0_13 = arith.constant 0 : index
      %13 = vector.load %arg5[%c0_12, %c0_13] : memref<1x128xf32, #tpu.memory_space<vmem>>, vector<1x128xf32>
      %14 = vector.broadcast %13 : vector<1x128xf32> to vector<48x128xf32>
      %15 = arith.addf %12, %14 : vector<48x128xf32>
      %cst_14 = arith.constant 0.000000e+00 : f32
      %16 = vector.broadcast %cst_14 : f32 to vector<48x128xf32>
      %17 = arith.maximumf %15, %16 : vector<48x128xf32>
      %18 = arith.truncf %17 : vector<48x128xf32> to vector<48x128xbf16>
      %c0_15 = arith.constant 0 : index
      %c0_16 = arith.constant 0 : index
      %19 = vector.load %arg6[%c0_15, %c0_16] : memref<48x128xbf16, #tpu.memory_space<vmem>>, vector<48x128xbf16>
      tpu.vector_store %arg6[%c0_15, %c0_16], %18 {strides = array<i32>} : memref<48x128xbf16, #tpu.memory_space<vmem>>, vector<48x128xbf16>,
    } else {
    }
    return
  }
  func.func @transform_0(%arg0: i32, %arg1: i32, %arg2: i32) -> (i32, i32) {
    %c0_i32 = arith.constant 0 : i32
    return %arg0, %arg2 : i32, i32
  }
  func.func @transform_1(%arg0: i32, %arg1: i32, %arg2: i32) -> (i32, i32) {
    %c0_i32 = arith.constant 0 : i32
    return %arg2, %arg1 : i32, i32
  }
  func.func @transform_2(%arg0: i32, %arg1: i32, %arg2: i32) -> (i32, i32) {
    %c0_i32 = arith.constant 0 : i32
    %c0_i32_0 = arith.constant 0 : i32
    return %c0_i32, %arg1 : i32, i32
  }
  func.func @transform_3(%arg0: i32, %arg1: i32, %arg2: i32) -> (i32, i32) {
    %c0_i32 = arith.constant 0 : i32
    return %arg0, %arg1 : i32, i32
  }
}

module attributes {stable_mosaic.version = 11 : i64} {
  func.func @kernel(%arg0: i32, %arg1: i32, %arg2: i32, %arg3: memref<16x24xbf16, #tpu.memory_space<vmem>>, %arg4: memref<24x128xbf16, #tpu.memory_space<vmem>>, %arg5: memref<1x128xf32, #tpu.memory_space<vmem>>, %arg6: memref<16x128xbf16, #tpu.memory_space<vmem>>, %arg7: memref<16x128xf32, #tpu.memory_space<vmem>>) attributes {dimension_semantics = [#tpu.dimension_semantics<parallel>, #tpu.dimension_semantics<parallel>, #tpu.dimension_semantics<arbitrary>], iteration_bounds = array<i64: 2, 1, 1>, scalar_prefetch = 0 : i64, scratch_operands = 1 : i64, tpu.core_type = #tpu.core_type<tc>, window_params = [{transform_indices = @transform_0, window_bounds = array<i64: 16, 24>}, {transform_indices = @transform_1, window_bounds = array<i64: 24, 128>}, {transform_indices = @transform_2, window_bounds = array<i64: 1, 128>}, {transform_indices = @transform_3, window_bounds = array<i64: 16, 128>}]} {
    %c0_i32 = arith.constant 0 : i32
    %0 = arith.cmpi eq, %arg2, %c0_i32 : i32
    %1 = arith.extui %0 : i1 to i32
    %c0_i32_0 = arith.constant 0 : i32
    %2 = arith.cmpi ne, %1, %c0_i32_0 : i32
    scf.if %2 {
      %cst_10 = arith.constant 0.000000e+00 : f32
      %12 = vector.broadcast %cst_10 : f32 to vector<16x128xf32>
      %c0_11 = arith.constant 0 : index
      %c0_12 = arith.constant 0 : index
      %13 = vector.load %arg7[%c0_11, %c0_12] : memref<16x128xf32, #tpu.memory_space<vmem>>, vector<16x128xf32>
      tpu.vector_store %arg7[%c0_11, %c0_12], %12 {strides = array<i32>} : memref<16x128xf32, #tpu.memory_space<vmem>>, vector<16x128xf32>,
    } else {
    }
    %c0 = arith.constant 0 : index
    %c0_1 = arith.constant 0 : index
    %3 = vector.load %arg3[%c0, %c0_1] : memref<16x24xbf16, #tpu.memory_space<vmem>>, vector<16x24xbf16>
    %c0_2 = arith.constant 0 : index
    %c0_3 = arith.constant 0 : index
    %4 = vector.load %arg7[%c0_2, %c0_3] : memref<16x128xf32, #tpu.memory_space<vmem>>, vector<16x128xf32>
    %c0_4 = arith.constant 0 : index
    %c0_5 = arith.constant 0 : index
    %5 = vector.load %arg4[%c0_4, %c0_5] : memref<24x128xbf16, #tpu.memory_space<vmem>>, vector<24x128xbf16>
    %cst = arith.constant dense<0.000000e+00> : vector<16x128xf32>
    %6 = tpu.matmul %3, %5, %cst {dimension_numbers = #tpu.dot_dimension_numbers<[1], [0], [0], [1], [0, 0, 1, 1], [], []>} : vector<16x24xbf16>, vector<24x128xbf16>, vector<16x128xf32> -> vector<16x128xf32>
    %7 = arith.addf %4, %6 : vector<16x128xf32>
    %c0_6 = arith.constant 0 : index
    %c0_7 = arith.constant 0 : index
    %8 = vector.load %arg7[%c0_6, %c0_7] : memref<16x128xf32, #tpu.memory_space<vmem>>, vector<16x128xf32>
    tpu.vector_store %arg7[%c0_6, %c0_7], %7 {strides = array<i32>} : memref<16x128xf32, #tpu.memory_space<vmem>>, vector<16x128xf32>,
    %c0_i32_8 = arith.constant 0 : i32
    %9 = arith.cmpi eq, %arg2, %c0_i32_8 : i32
    %10 = arith.extui %9 : i1 to i32
    %c0_i32_9 = arith.constant 0 : i32
    %11 = arith.cmpi ne, %10, %c0_i32_9 : i32
    scf.if %11 {
      %c0_10 = arith.constant 0 : index
      %c0_11 = arith.constant 0 : index
      %12 = vector.load %arg7[%c0_10, %c0_11] : memref<16x128xf32, #tpu.memory_space<vmem>>, vector<16x128xf32>
      %c0_12 = arith.constant 0 : index
      %c0_13 = arith.constant 0 : index
      %13 = vector.load %arg5[%c0_12, %c0_13] : memref<1x128xf32, #tpu.memory_space<vmem>>, vector<1x128xf32>
      %14 = vector.broadcast %13 : vector<1x128xf32> to vector<16x128xf32>
      %15 = arith.addf %12, %14 : vector<16x128xf32>
      %16 = arith.truncf %15 : vector<16x128xf32> to vector<16x128xbf16>
      %c0_14 = arith.constant 0 : index
      %c0_15 = arith.constant 0 : index
      %17 = vector.load %arg6[%c0_14, %c0_15] : memref<16x128xbf16, #tpu.memory_space<vmem>>, vector<16x128xbf16>
      tpu.vector_store %arg6[%c0_14, %c0_15], %16 {strides = array<i32>} : memref<16x128xbf16, #tpu.memory_space<vmem>>, vector<16x128xbf16>,
    } else {
    }
    return
  }
  func.func @transform_0(%arg0: i32, %arg1: i32, %arg2: i32) -> (i32, i32) {
    %c0_i32 = arith.constant 0 : i32
    return %arg0, %arg2 : i32, i32
  }
  func.func @transform_1(%arg0: i32, %arg1: i32, %arg2: i32) -> (i32, i32) {
    %c0_i32 = arith.constant 0 : i32
    return %arg2, %arg1 : i32, i32
  }
  func.func @transform_2(%arg0: i32, %arg1: i32, %arg2: i32) -> (i32, i32) {
    %c0_i32 = arith.constant 0 : i32
    %c0_i32_0 = arith.constant 0 : i32
    return %c0_i32, %arg1 : i32, i32
  }
  func.func @transform_3(%arg0: i32, %arg1: i32, %arg2: i32) -> (i32, i32) {
    %c0_i32 = arith.constant 0 : i32
    return %arg0, %arg1 : i32, i32
  }
}

module attributes {stable_mosaic.version = 11 : i64} {
  func.func @kernel(%arg0: i32, %arg1: i32, %arg2: i32, %arg3: memref<16x32xbf16, #tpu.memory_space<vmem>>, %arg4: memref<32x128xbf16, #tpu.memory_space<vmem>>, %arg5: memref<1x128xf32, #tpu.memory_space<vmem>>, %arg6: memref<1x32xf32, #tpu.memory_space<vmem>>, %arg7: memref<1x32xf32, #tpu.memory_space<vmem>>, %arg8: memref<16x128xbf16, #tpu.memory_space<vmem>>, %arg9: memref<16x128xf32, #tpu.memory_space<vmem>>, %arg10: memref<16x32xbf16, #tpu.memory_space<vmem>>) attributes {dimension_semantics = [#tpu.dimension_semantics<parallel>, #tpu.dimension_semantics<arbitrary>, #tpu.dimension_semantics<arbitrary>], iteration_bounds = array<i64: 2, 1, 1>, scalar_prefetch = 0 : i64, scratch_operands = 2 : i64, tpu.core_type = #tpu.core_type<tc>, window_params = [{transform_indices = @transform_0, window_bounds = array<i64: 16, 32>}, {transform_indices = @transform_1, window_bounds = array<i64: 32, 128>}, {transform_indices = @transform_2, window_bounds = array<i64: 1, 128>}, {pipeline_mode = #tpu.pipeline_mode<synchronous>, transform_indices = @transform_3, window_bounds = array<i64: 1, 32>}, {pipeline_mode = #tpu.pipeline_mode<synchronous>, transform_indices = @transform_4, window_bounds = array<i64: 1, 32>}, {transform_indices = @transform_5, window_bounds = array<i64: 16, 128>}]} {
    %c0_i32 = arith.constant 0 : i32
    %0 = arith.cmpi eq, %arg2, %c0_i32 : i32
    %1 = arith.extui %0 : i1 to i32
    %c0_i32_0 = arith.constant 0 : i32
    %2 = arith.cmpi ne, %1, %c0_i32_0 : i32
    scf.if %2 {
      %cst_13 = arith.constant 0.000000e+00 : f32
      %17 = vector.broadcast %cst_13 : f32 to vector<16x128xf32>
      %c0_14 = arith.constant 0 : index
      %c0_15 = arith.constant 0 : index
      %18 = vector.load %arg9[%c0_14, %c0_15] : memref<16x128xf32, #tpu.memory_space<vmem>>, vector<16x128xf32>
      tpu.vector_store %arg9[%c0_14, %c0_15], %17 {strides = array<i32>} : memref<16x128xf32, #tpu.memory_space<vmem>>, vector<16x128xf32>,
    } else {
    }
    %c0_i32_1 = arith.constant 0 : i32
    %3 = arith.cmpi eq, %arg1, %c0_i32_1 : i32
    %c0_i32_2 = arith.constant 0 : i32
    %4 = arith.cmpi eq, %arg2, %c0_i32_2 : i32
    %5 = arith.andi %3, %4 : i1
    %6 = arith.extui %5 : i1 to i32
    %c0_i32_3 = arith.constant 0 : i32
    %7 = arith.cmpi ne, %6, %c0_i32_3 : i32
    scf.if %7 {
      %c0_13 = arith.constant 0 : index
      %c0_14 = arith.constant 0 : index
      %17 = vector.load %arg3[%c0_13, %c0_14] : memref<16x32xbf16, #tpu.memory_space<vmem>>, vector<16x32xbf16>
      %18 = arith.extf %17 : vector<16x32xbf16> to vector<16x32xf32>
      %cst_15 = arith.constant dense<0.000000e+00> : vector<16xf32>
      %19 = vector.multi_reduction <add>, %18, %cst_15 [1] : vector<16x32xf32> to vector<16xf32>
      %20 = vector.shape_cast %19 : vector<16xf32> to vector<16x1xf32>
      %cst_16 = arith.constant 3.200000e+01 : f32
      %21 = vector.broadcast %cst_16 : f32 to vector<16x1xf32>
      %22 = arith.divf %20, %21 : vector<16x1xf32>
      %23 = vector.broadcast %22 : vector<16x1xf32> to vector<16x32xf32>
      %24 = arith.subf %18, %23 : vector<16x32xf32>
      %25 = arith.mulf %24, %24 : vector<16x32xf32>
      %cst_17 = arith.constant dense<0.000000e+00> : vector<16xf32>
      %26 = vector.multi_reduction <add>, %25, %cst_17 [1] : vector<16x32xf32> to vector<16xf32>
      %27 = vector.shape_cast %26 : vector<16xf32> to vector<16x1xf32>
      %cst_18 = arith.constant 3.200000e+01 : f32
      %28 = vector.broadcast %cst_18 : f32 to vector<16x1xf32>
      %29 = arith.divf %27, %28 : vector<16x1xf32>
      %30 = vector.broadcast %22 : vector<16x1xf32> to vector<16x32xf32>
      %31 = arith.subf %18, %30 : vector<16x32xf32>
      %cst_19 = arith.constant 9.99999974E-6 : f32
      %32 = vector.broadcast %cst_19 : f32 to vector<16x1xf32>
      %33 = arith.addf %29, %32 : vector<16x1xf32>
      %34 = math.rsqrt %33 : vector<16x1xf32>
      %35 = vector.broadcast %34 : vector<16x1xf32> to vector<16x32xf32>
      %36 = arith.mulf %31, %35 : vector<16x32xf32>
      %c0_20 = arith.constant 0 : index
      %c0_21 = arith.constant 0 : index
      %37 = vector.load %arg6[%c0_20, %c0_21] : memref<1x32xf32, #tpu.memory_space<vmem>>, vector<1x32xf32>
      %38 = vector.broadcast %37 : vector<1x32xf32> to vector<16x32xf32>
      %39 = arith.mulf %36, %38 : vector<16x32xf32>
      %c0_22 = arith.constant 0 : index
      %c0_23 = arith.constant 0 : index
      %40 = vector.load %arg7[%c0_22, %c0_23] : memref<1x32xf32, #tpu.memory_space<vmem>>, vector<1x32xf32>
      %41 = vector.broadcast %40 : vector<1x32xf32> to vector<16x32xf32>
      %42 = arith.addf %39, %41 : vector<16x32xf32>
      %43 = arith.truncf %42 : vector<16x32xf32> to vector<16x32xbf16>
      %c0_24 = arith.constant 0 : index
      %c0_25 = arith.constant 0 : index
      %44 = vector.load %arg10[%c0_24, %c0_25] : memref<16x32xbf16, #tpu.memory_space<vmem>>, vector<16x32xbf16>
      tpu.vector_store %arg10[%c0_24, %c0_25], %43 {strides = array<i32>} : memref<16x32xbf16, #tpu.memory_space<vmem>>, vector<16x32xbf16>,
    } else {
    }
    %c0 = arith.constant 0 : index
    %c0_4 = arith.constant 0 : index
    %8 = vector.load %arg10[%c0, %c0_4] : memref<16x32xbf16, #tpu.memory_space<vmem>>, vector<16x32xbf16>
    %c0_5 = arith.constant 0 : index
    %c0_6 = arith.constant 0 : index
    %9 = vector.load %arg9[%c0_5, %c0_6] : memref<16x128xf32, #tpu.memory_space<vmem>>, vector<16x128xf32>
    %c0_7 = arith.constant 0 : index
    %c0_8 = arith.constant 0 : index
    %10 = vector.load %arg4[%c0_7, %c0_8] : memref<32x128xbf16, #tpu.memory_space<vmem>>, vector<32x128xbf16>
    %cst = arith.constant dense<0.000000e+00> : vector<16x128xf32>
    %11 = tpu.matmul %8, %10, %cst {dimension_numbers = #tpu.dot_dimension_numbers<[1], [0], [0], [1], [0, 0, 1, 1], [], []>} : vector<16x32xbf16>, vector<32x128xbf16>, vector<16x128xf32> -> vector<16x128xf32>
    %12 = arith.addf %9, %11 : vector<16x128xf32>
    %c0_9 = arith.constant 0 : index
    %c0_10 = arith.constant 0 : index
    %13 = vector.load %arg9[%c0_9, %c0_10] : memref<16x128xf32, #tpu.memory_space<vmem>>, vector<16x128xf32>
    tpu.vector_store %arg9[%c0_9, %c0_10], %12 {strides = array<i32>} : memref<16x128xf32, #tpu.memory_space<vmem>>, vector<16x128xf32>,
    %c0_i32_11 = arith.constant 0 : i32
    %14 = arith.cmpi eq, %arg2, %c0_i32_11 : i32
    %15 = arith.extui %14 : i1 to i32
    %c0_i32_12 = arith.constant 0 : i32
    %16 = arith.cmpi ne, %15, %c0_i32_12 : i32
    scf.if %16 {
      %c0_13 = arith.constant 0 : index
      %c0_14 = arith.constant 0 : index
      %17 = vector.load %arg9[%c0_13, %c0_14] : memref<16x128xf32, #tpu.memory_space<vmem>>, vector<16x128xf32>
      %c0_15 = arith.constant 0 : index
      %c0_16 = arith.constant 0 : index
      %18 = vector.load %arg5[%c0_15, %c0_16] : memref<1x128xf32, #tpu.memory_space<vmem>>, vector<1x128xf32>
      %19 = vector.broadcast %18 : vector<1x128xf32> to vector<16x128xf32>
      %20 = arith.addf %17, %19 : vector<16x128xf32>
      %21 = arith.negf %20 : vector<16x128xf32>
      %22 = math.exp %21 : vector<16x128xf32>
      %cst_17 = arith.constant 1.000000e+00 : f32
      %23 = vector.broadcast %cst_17 : f32 to vector<16x128xf32>
      %24 = arith.addf %23, %22 : vector<16x128xf32>
      %25 = arith.divf %23, %24 : vector<16x128xf32>
      %26 = arith.mulf %20, %25 : vector<16x128xf32>
      %27 = arith.truncf %26 : vector<16x128xf32> to vector<16x128xbf16>
      %c0_18 = arith.constant 0 : index
      %c0_19 = arith.constant 0 : index
      %28 = vector.load %arg8[%c0_18, %c0_19] : memref<16x128xbf16, #tpu.memory_space<vmem>>, vector<16x128xbf16>
      tpu.vector_store %arg8[%c0_18, %c0_19], %27 {strides = array<i32>} : memref<16x128xbf16, #tpu.memory_space<vmem>>, vector<16x128xbf16>,
    } else {
    }
    return
  }
  func.func @transform_0(%arg0: i32, %arg1: i32, %arg2: i32) -> (i32, i32) {
    %c0_i32 = arith.constant 0 : i32
    return %arg0, %arg2 : i32, i32
  }
  func.func @transform_1(%arg0: i32, %arg1: i32, %arg2: i32) -> (i32, i32) {
    %c0_i32 = arith.constant 0 : i32
    return %arg2, %arg1 : i32, i32
  }
  func.func @transform_2(%arg0: i32, %arg1: i32, %arg2: i32) -> (i32, i32) {
    %c0_i32 = arith.constant 0 : i32
    %c0_i32_0 = arith.constant 0 : i32
    return %c0_i32, %arg1 : i32, i32
  }
  func.func @transform_3(%arg0: i32, %arg1: i32, %arg2: i32) -> (i32, i32) {
    %c0_i32 = arith.constant 0 : i32
    %c0_i32_0 = arith.constant 0 : i32
    %c0_i32_1 = arith.constant 0 : i32
    return %c0_i32, %c0_i32_0 : i32, i32
  }
  func.func @transform_4(%arg0: i32, %arg1: i32, %arg2: i32) -> (i32, i32) {
    %c0_i32 = arith.constant 0 : i32
    %c0_i32_0 = arith.constant 0 : i32
    %c0_i32_1 = arith.constant 0 : i32
    return %c0_i32, %c0_i32_0 : i32, i32
  }
  func.func @transform_5(%arg0: i32, %arg1: i32, %arg2: i32) -> (i32, i32) {
    %c0_i32 = arith.constant 0 : i32
    return %arg0, %arg1 : i32, i32
  }
}

module attributes {stable_mosaic.version = 11 : i64} {
  func.func @kernel(%arg0: i32, %arg1: i32, %arg2: i32, %arg3: memref<16x64xbf16, #tpu.memory_space<vmem>>, %arg4: memref<64x128xbf16, #tpu.memory_space<vmem>>, %arg5: memref<1x128xf32, #tpu.memory_space<vmem>>, %arg6: memref<16x128xbf16, #tpu.memory_space<vmem>>, %arg7: memref<16x128xbf16, #tpu.memory_space<vmem>>, %arg8: memref<16x128xf32, #tpu.memory_space<vmem>>) attributes {dimension_semantics = [#tpu.dimension_semantics<parallel>, #tpu.dimension_semantics<parallel>, #tpu.dimension_semantics<arbitrary>], iteration_bounds = array<i64: 2, 1, 1>, scalar_prefetch = 0 : i64, scratch_operands = 1 : i64, tpu.core_type = #tpu.core_type<tc>, window_params = [{transform_indices = @transform_0, window_bounds = array<i64: 16, 64>}, {transform_indices = @transform_1, window_bounds = array<i64: 64, 128>}, {transform_indices = @transform_2, window_bounds = array<i64: 1, 128>}, {transform_indices = @transform_3, window_bounds = array<i64: 16, 128>}, {transform_indices = @transform_4, window_bounds = array<i64: 16, 128>}]} {
    %c0_i32 = arith.constant 0 : i32
    %0 = arith.cmpi eq, %arg2, %c0_i32 : i32
    %1 = arith.extui %0 : i1 to i32
    %c0_i32_0 = arith.constant 0 : i32
    %2 = arith.cmpi ne, %1, %c0_i32_0 : i32
    scf.if %2 {
      %cst_10 = arith.constant 0.000000e+00 : f32
      %12 = vector.broadcast %cst_10 : f32 to vector<16x128xf32>
      %c0_11 = arith.constant 0 : index
      %c0_12 = arith.constant 0 : index
      %13 = vector.load %arg8[%c0_11, %c0_12] : memref<16x128xf32, #tpu.memory_space<vmem>>, vector<16x128xf32>
      tpu.vector_store %arg8[%c0_11, %c0_12], %12 {strides = array<i32>} : memref<16x128xf32, #tpu.memory_space<vmem>>, vector<16x128xf32>,
    } else {
    }
    %c0 = arith.constant 0 : index
    %c0_1 = arith.constant 0 : index
    %3 = vector.load %arg3[%c0, %c0_1] : memref<16x64xbf16, #tpu.memory_space<vmem>>, vector<16x64xbf16>
    %c0_2 = arith.constant 0 : index
    %c0_3 = arith.constant 0 : index
    %4 = vector.load %arg8[%c0_2, %c0_3] : memref<16x128xf32, #tpu.memory_space<vmem>>, vector<16x128xf32>
    %c0_4 = arith.constant 0 : index
    %c0_5 = arith.constant 0 : index
    %5 = vector.load %arg4[%c0_4, %c0_5] : memref<64x128xbf16, #tpu.memory_space<vmem>>, vector<64x128xbf16>
    %cst = arith.constant dense<0.000000e+00> : vector<16x128xf32>
    %6 = tpu.matmul %3, %5, %cst {dimension_numbers = #tpu.dot_dimension_numbers<[1], [0], [0], [1], [0, 0, 1, 1], [], []>} : vector<16x64xbf16>, vector<64x128xbf16>, vector<16x128xf32> -> vector<16x128xf32>
    %7 = arith.addf %4, %6 : vector<16x128xf32>
    %c0_6 = arith.constant 0 : index
    %c0_7 = arith.constant 0 : index
    %8 = vector.load %arg8[%c0_6, %c0_7] : memref<16x128xf32, #tpu.memory_space<vmem>>, vector<16x128xf32>
    tpu.vector_store %arg8[%c0_6, %c0_7], %7 {strides = array<i32>} : memref<16x128xf32, #tpu.memory_space<vmem>>, vector<16x128xf32>,
    %c0_i32_8 = arith.constant 0 : i32
    %9 = arith.cmpi eq, %arg2, %c0_i32_8 : i32
    %10 = arith.extui %9 : i1 to i32
    %c0_i32_9 = arith.constant 0 : i32
    %11 = arith.cmpi ne, %10, %c0_i32_9 : i32
    scf.if %11 {
      %c0_10 = arith.constant 0 : index
      %c0_11 = arith.constant 0 : index
      %12 = vector.load %arg8[%c0_10, %c0_11] : memref<16x128xf32, #tpu.memory_space<vmem>>, vector<16x128xf32>
      %c0_12 = arith.constant 0 : index
      %c0_13 = arith.constant 0 : index
      %13 = vector.load %arg5[%c0_12, %c0_13] : memref<1x128xf32, #tpu.memory_space<vmem>>, vector<1x128xf32>
      %14 = vector.broadcast %13 : vector<1x128xf32> to vector<16x128xf32>
      %15 = arith.addf %12, %14 : vector<16x128xf32>
      %c0_14 = arith.constant 0 : index
      %c0_15 = arith.constant 0 : index
      %16 = vector.load %arg6[%c0_14, %c0_15] : memref<16x128xbf16, #tpu.memory_space<vmem>>, vector<16x128xbf16>
      %17 = arith.extf %16 : vector<16x128xbf16> to vector<16x128xf32>
      %cst_16 = arith.constant 5.000000e-01 : f32
      %18 = vector.broadcast %cst_16 : f32 to vector<16x128xf32>
      %19 = arith.mulf %18, %15 : vector<16x128xf32>
      %20 = arith.addf %17, %19 : vector<16x128xf32>
      %21 = arith.truncf %20 : vector<16x128xf32> to vector<16x128xbf16>
      %c0_17 = arith.constant 0 : index
      %c0_18 = arith.constant 0 : index
      %22 = vector.load %arg7[%c0_17, %c0_18] : memref<16x128xbf16, #tpu.memory_space<vmem>>, vector<16x128xbf16>
      tpu.vector_store %arg7[%c0_17, %c0_18], %21 {strides = array<i32>} : memref<16x128xbf16, #tpu.memory_space<vmem>>, vector<16x128xbf16>,
    } else {
    }
    return
  }
  func.func @transform_0(%arg0: i32, %arg1: i32, %arg2: i32) -> (i32, i32) {
    %c0_i32 = arith.constant 0 : i32
    return %arg0, %arg2 : i32, i32
  }
  func.func @transform_1(%arg0: i32, %arg1: i32, %arg2: i32) -> (i32, i32) {
    %c0_i32 = arith.constant 0 : i32
    return %arg2, %arg1 : i32, i32
  }
  func.func @transform_2(%arg0: i32, %arg1: i32, %arg2: i32) -> (i32, i32) {
    %c0_i32 = arith.constant 0 : i32
    %c0_i32_0 = arith.constant 0 : i32
    return %c0_i32, %arg1 : i32, i32
  }
  func.func @transform_3(%arg0: i32, %arg1: i32, %arg2: i32) -> (i32, i32) {
    %c0_i32 = arith.constant 0 : i32
    return %arg0, %arg1 : i32, i32
  }
  func.func @transform_4(%arg0: i32, %arg1: i32, %arg2: i32) -> (i32, i32) {
    %c0_i32 = arith.constant 0 : i32
    return %arg0, %arg1 : i32, i32
  }
}

module attributes {stable_mosaic.version = 11 : i64} {
  func.func @kernel(%arg0: i32, %arg1: i32, %arg2: i32, %arg3: memref<16x32xbf16, #tpu.memory_space<vmem>>, %arg4: memref<32x128xbf16, #tpu.memory_space<vmem>>, %arg5: memref<1x128xf32, #tpu.memory_space<vmem>>, %arg6: memref<1x32xf32, #tpu.memory_space<vmem>>, %arg7: memref<1x32xf32, #tpu.memory_space<vmem>>, %arg8: memref<16x128xbf16, #tpu.memory_space<vmem>>, %arg9: memref<16x128xf32, #tpu.memory_space<vmem>>, %arg10: memref<16x32xbf16, #tpu.memory_space<vmem>>) attributes {dimension_semantics = [#tpu.dimension_semantics<parallel>, #tpu.dimension_semantics<arbitrary>, #tpu.dimension_semantics<arbitrary>], iteration_bounds = array<i64: 2, 1, 1>, scalar_prefetch = 0 : i64, scratch_operands = 2 : i64, tpu.core_type = #tpu.core_type<tc>, window_params = [{transform_indices = @transform_0, window_bounds = array<i64: 16, 32>}, {transform_indices = @transform_1, window_bounds = array<i64: 32, 128>}, {transform_indices = @transform_2, window_bounds = array<i64: 1, 128>}, {pipeline_mode = #tpu.pipeline_mode<synchronous>, transform_indices = @transform_3, window_bounds = array<i64: 1, 32>}, {pipeline_mode = #tpu.pipeline_mode<synchronous>, transform_indices = @transform_4, window_bounds = array<i64: 1, 32>}, {transform_indices = @transform_5, window_bounds = array<i64: 16, 128>}]} {
    %c0_i32 = arith.constant 0 : i32
    %0 = arith.cmpi eq, %arg2, %c0_i32 : i32
    %1 = arith.extui %0 : i1 to i32
    %c0_i32_0 = arith.constant 0 : i32
    %2 = arith.cmpi ne, %1, %c0_i32_0 : i32
    scf.if %2 {
      %cst_13 = arith.constant 0.000000e+00 : f32
      %17 = vector.broadcast %cst_13 : f32 to vector<16x128xf32>
      %c0_14 = arith.constant 0 : index
      %c0_15 = arith.constant 0 : index
      %18 = vector.load %arg9[%c0_14, %c0_15] : memref<16x128xf32, #tpu.memory_space<vmem>>, vector<16x128xf32>
      tpu.vector_store %arg9[%c0_14, %c0_15], %17 {strides = array<i32>} : memref<16x128xf32, #tpu.memory_space<vmem>>, vector<16x128xf32>,
    } else {
    }
    %c0_i32_1 = arith.constant 0 : i32
    %3 = arith.cmpi eq, %arg1, %c0_i32_1 : i32
    %c0_i32_2 = arith.constant 0 : i32
    %4 = arith.cmpi eq, %arg2, %c0_i32_2 : i32
    %5 = arith.andi %3, %4 : i1
    %6 = arith.extui %5 : i1 to i32
    %c0_i32_3 = arith.constant 0 : i32
    %7 = arith.cmpi ne, %6, %c0_i32_3 : i32
    scf.if %7 {
      %c0_13 = arith.constant 0 : index
      %c0_14 = arith.constant 0 : index
      %17 = vector.load %arg3[%c0_13, %c0_14] : memref<16x32xbf16, #tpu.memory_space<vmem>>, vector<16x32xbf16>
      %18 = arith.extf %17 : vector<16x32xbf16> to vector<16x32xf32>
      %cst_15 = arith.constant dense<0.000000e+00> : vector<16xf32>
      %19 = vector.multi_reduction <add>, %18, %cst_15 [1] : vector<16x32xf32> to vector<16xf32>
      %20 = vector.shape_cast %19 : vector<16xf32> to vector<16x1xf32>
      %cst_16 = arith.constant 3.200000e+01 : f32
      %21 = vector.broadcast %cst_16 : f32 to vector<16x1xf32>
      %22 = arith.divf %20, %21 : vector<16x1xf32>
      %23 = vector.broadcast %22 : vector<16x1xf32> to vector<16x32xf32>
      %24 = arith.subf %18, %23 : vector<16x32xf32>
      %25 = arith.mulf %24, %24 : vector<16x32xf32>
      %cst_17 = arith.constant dense<0.000000e+00> : vector<16xf32>
      %26 = vector.multi_reduction <add>, %25, %cst_17 [1] : vector<16x32xf32> to vector<16xf32>
      %27 = vector.shape_cast %26 : vector<16xf32> to vector<16x1xf32>
      %cst_18 = arith.constant 3.200000e+01 : f32
      %28 = vector.broadcast %cst_18 : f32 to vector<16x1xf32>
      %29 = arith.divf %27, %28 : vector<16x1xf32>
      %30 = vector.broadcast %22 : vector<16x1xf32> to vector<16x32xf32>
      %31 = arith.subf %18, %30 : vector<16x32xf32>
      %cst_19 = arith.constant 9.99999974E-6 : f32
      %32 = vector.broadcast %cst_19 : f32 to vector<16x1xf32>
      %33 = arith.addf %29, %32 : vector<16x1xf32>
      %34 = math.rsqrt %33 : vector<16x1xf32>
      %35 = vector.broadcast %34 : vector<16x1xf32> to vector<16x32xf32>
      %36 = arith.mulf %31, %35 : vector<16x32xf32>
      %c0_20 = arith.constant 0 : index
      %c0_21 = arith.constant 0 : index
      %37 = vector.load %arg6[%c0_20, %c0_21] : memref<1x32xf32, #tpu.memory_space<vmem>>, vector<1x32xf32>
      %38 = vector.broadcast %37 : vector<1x32xf32> to vector<16x32xf32>
      %39 = arith.mulf %36, %38 : vector<16x32xf32>
      %c0_22 = arith.constant 0 : index
      %c0_23 = arith.constant 0 : index
      %40 = vector.load %arg7[%c0_22, %c0_23] : memref<1x32xf32, #tpu.memory_space<vmem>>, vector<1x32xf32>
      %41 = vector.broadcast %40 : vector<1x32xf32> to vector<16x32xf32>
      %42 = arith.addf %39, %41 : vector<16x32xf32>
      %43 = arith.truncf %42 : vector<16x32xf32> to vector<16x32xbf16>
      %c0_24 = arith.constant 0 : index
      %c0_25 = arith.constant 0 : index
      %44 = vector.load %arg10[%c0_24, %c0_25] : memref<16x32xbf16, #tpu.memory_space<vmem>>, vector<16x32xbf16>
      tpu.vector_store %arg10[%c0_24, %c0_25], %43 {strides = array<i32>} : memref<16x32xbf16, #tpu.memory_space<vmem>>, vector<16x32xbf16>,
    } else {
    }
    %c0 = arith.constant 0 : index
    %c0_4 = arith.constant 0 : index
    %8 = vector.load %arg10[%c0, %c0_4] : memref<16x32xbf16, #tpu.memory_space<vmem>>, vector<16x32xbf16>
    %c0_5 = arith.constant 0 : index
    %c0_6 = arith.constant 0 : index
    %9 = vector.load %arg9[%c0_5, %c0_6] : memref<16x128xf32, #tpu.memory_space<vmem>>, vector<16x128xf32>
    %c0_7 = arith.constant 0 : index
    %c0_8 = arith.constant 0 : index
    %10 = vector.load %arg4[%c0_7, %c0_8] : memref<32x128xbf16, #tpu.memory_space<vmem>>, vector<32x128xbf16>
    %cst = arith.constant dense<0.000000e+00> : vector<16x128xf32>
    %11 = tpu.matmul %8, %10, %cst {dimension_numbers = #tpu.dot_dimension_numbers<[1], [0], [0], [1], [0, 0, 1, 1], [], []>} : vector<16x32xbf16>, vector<32x128xbf16>, vector<16x128xf32> -> vector<16x128xf32>
    %12 = arith.addf %9, %11 : vector<16x128xf32>
    %c0_9 = arith.constant 0 : index
    %c0_10 = arith.constant 0 : index
    %13 = vector.load %arg9[%c0_9, %c0_10] : memref<16x128xf32, #tpu.memory_space<vmem>>, vector<16x128xf32>
    tpu.vector_store %arg9[%c0_9, %c0_10], %12 {strides = array<i32>} : memref<16x128xf32, #tpu.memory_space<vmem>>, vector<16x128xf32>,
    %c0_i32_11 = arith.constant 0 : i32
    %14 = arith.cmpi eq, %arg2, %c0_i32_11 : i32
    %15 = arith.extui %14 : i1 to i32
    %c0_i32_12 = arith.constant 0 : i32
    %16 = arith.cmpi ne, %15, %c0_i32_12 : i32
    scf.if %16 {
      %c0_13 = arith.constant 0 : index
      %c0_14 = arith.constant 0 : index
      %17 = vector.load %arg9[%c0_13, %c0_14] : memref<16x128xf32, #tpu.memory_space<vmem>>, vector<16x128xf32>
      %c0_15 = arith.constant 0 : index
      %c0_16 = arith.constant 0 : index
      %18 = vector.load %arg5[%c0_15, %c0_16] : memref<1x128xf32, #tpu.memory_space<vmem>>, vector<1x128xf32>
      %19 = vector.broadcast %18 : vector<1x128xf32> to vector<16x128xf32>
      %20 = arith.addf %17, %19 : vector<16x128xf32>
      %21 = arith.truncf %20 : vector<16x128xf32> to vector<16x128xbf16>
      %c0_17 = arith.constant 0 : index
      %c0_18 = arith.constant 0 : index
      %22 = vector.load %arg8[%c0_17, %c0_18] : memref<16x128xbf16, #tpu.memory_space<vmem>>, vector<16x128xbf16>
      tpu.vector_store %arg8[%c0_17, %c0_18], %21 {strides = array<i32>} : memref<16x128xbf16, #tpu.memory_space<vmem>>, vector<16x128xbf16>,
    } else {
    }
    return
  }
  func.func @transform_0(%arg0: i32, %arg1: i32, %arg2: i32) -> (i32, i32) {
    %c0_i32 = arith.constant 0 : i32
    return %arg0, %arg2 : i32, i32
  }
  func.func @transform_1(%arg0: i32, %arg1: i32, %arg2: i32) -> (i32, i32) {
    %c0_i32 = arith.constant 0 : i32
    return %arg2, %arg1 : i32, i32
  }
  func.func @transform_2(%arg0: i32, %arg1: i32, %arg2: i32) -> (i32, i32) {
    %c0_i32 = arith.constant 0 : i32
    %c0_i32_0 = arith.constant 0 : i32
    return %c0_i32, %arg1 : i32, i32
  }
  func.func @transform_3(%arg0: i32, %arg1: i32, %arg2: i32) -> (i32, i32) {
    %c0_i32 = arith.constant 0 : i32
    %c0_i32_0 = arith.constant 0 : i32
    %c0_i32_1 = arith.constant 0 : i32
    return %c0_i32, %c0_i32_0 : i32, i32
  }
  func.func @transform_4(%arg0: i32, %arg1: i32, %arg2: i32) -> (i32, i32) {
    %c0_i32 = arith.constant 0 : i32
    %c0_i32_0 = arith.constant 0 : i32
    %c0_i32_1 = arith.constant 0 : i32
    return %c0_i32, %c0_i32_0 : i32, i32
  }
  func.func @transform_5(%arg0: i32, %arg1: i32, %arg2: i32) -> (i32, i32) {
    %c0_i32 = arith.constant 0 : i32
    return %arg0, %arg1 : i32, i32
  }
}

module attributes {stable_mosaic.version = 11 : i64} {
  func.func @kernel(%arg0: i32, %arg1: i32, %arg2: i32, %arg3: memref<8x32xf32, #tpu.memory_space<vmem>>, %arg4: memref<32x128xbf16, #tpu.memory_space<vmem>>, %arg5: memref<1x128xf32, #tpu.memory_space<vmem>>, %arg6: memref<8x128xbf16, #tpu.memory_space<vmem>>, %arg7: memref<8x128xf32, #tpu.memory_space<vmem>>) attributes {dimension_semantics = [#tpu.dimension_semantics<parallel>, #tpu.dimension_semantics<parallel>, #tpu.dimension_semantics<arbitrary>], iteration_bounds = array<i64: 2, 1, 1>, scalar_prefetch = 0 : i64, scratch_operands = 1 : i64, tpu.core_type = #tpu.core_type<tc>, window_params = [{transform_indices = @transform_0, window_bounds = array<i64: 8, 32>}, {transform_indices = @transform_1, window_bounds = array<i64: 32, 128>}, {transform_indices = @transform_2, window_bounds = array<i64: 1, 128>}, {transform_indices = @transform_3, window_bounds = array<i64: 8, 128>}]} {
    %c0_i32 = arith.constant 0 : i32
    %0 = arith.cmpi eq, %arg2, %c0_i32 : i32
    %1 = arith.extui %0 : i1 to i32
    %c0_i32_0 = arith.constant 0 : i32
    %2 = arith.cmpi ne, %1, %c0_i32_0 : i32
    scf.if %2 {
      %cst_10 = arith.constant 0.000000e+00 : f32
      %13 = vector.broadcast %cst_10 : f32 to vector<8x128xf32>
      %c0_11 = arith.constant 0 : index
      %c0_12 = arith.constant 0 : index
      %14 = vector.load %arg7[%c0_11, %c0_12] : memref<8x128xf32, #tpu.memory_space<vmem>>, vector<8x128xf32>
      tpu.vector_store %arg7[%c0_11, %c0_12], %13 {strides = array<i32>} : memref<8x128xf32, #tpu.memory_space<vmem>>, vector<8x128xf32>,
    } else {
    }
    %c0 = arith.constant 0 : index
    %c0_1 = arith.constant 0 : index
    %3 = vector.load %arg3[%c0, %c0_1] : memref<8x32xf32, #tpu.memory_space<vmem>>, vector<8x32xf32>
    %4 = arith.truncf %3 : vector<8x32xf32> to vector<8x32xbf16>
    %c0_2 = arith.constant 0 : index
    %c0_3 = arith.constant 0 : index
    %5 = vector.load %arg7[%c0_2, %c0_3] : memref<8x128xf32, #tpu.memory_space<vmem>>, vector<8x128xf32>
    %c0_4 = arith.constant 0 : index
    %c0_5 = arith.constant 0 : index
    %6 = vector.load %arg4[%c0_4, %c0_5] : memref<32x128xbf16, #tpu.memory_space<vmem>>, vector<32x128xbf16>
    %cst = arith.constant dense<0.000000e+00> : vector<8x128xf32>
    %7 = tpu.matmul %4, %6, %cst {dimension_numbers = #tpu.dot_dimension_numbers<[1], [0], [0], [1], [0, 0, 1, 1], [], []>} : vector<8x32xbf16>, vector<32x128xbf16>, vector<8x128xf32> -> vector<8x128xf32>
    %8 = arith.addf %5, %7 : vector<8x128xf32>
    %c0_6 = arith.constant 0 : index
    %c0_7 = arith.constant 0 : index
    %9 = vector.load %arg7[%c0_6, %c0_7] : memref<8x128xf32, #tpu.memory_space<vmem>>, vector<8x128xf32>
    tpu.vector_store %arg7[%c0_6, %c0_7], %8 {strides = array<i32>} : memref<8x128xf32, #tpu.memory_space<vmem>>, vector<8x128xf32>,
    %c0_i32_8 = arith.constant 0 : i32
    %10 = arith.cmpi eq, %arg2, %c0_i32_8 : i32
    %11 = arith.extui %10 : i1 to i32
    %c0_i32_9 = arith.constant 0 : i32
    %12 = arith.cmpi ne, %11, %c0_i32_9 : i32
    scf.if %12 {
      %c0_10 = arith.constant 0 : index
      %c0_11 = arith.constant 0 : index
      %13 = vector.load %arg7[%c0_10, %c0_11] : memref<8x128xf32, #tpu.memory_space<vmem>>, vector<8x128xf32>
      %c0_12 = arith.constant 0 : index
      %c0_13 = arith.constant 0 : index
      %14 = vector.load %arg5[%c0_12, %c0_13] : memref<1x128xf32, #tpu.memory_space<vmem>>, vector<1x128xf32>
      %15 = vector.broadcast %14 : vector<1x128xf32> to vector<8x128xf32>
      %16 = arith.addf %13, %15 : vector<8x128xf32>
      %17 = arith.truncf %16 : vector<8x128xf32> to vector<8x128xbf16>
      %c0_14 = arith.constant 0 : index
      %c0_15 = arith.constant 0 : index
      %18 = vector.load %arg6[%c0_14, %c0_15] : memref<8x128xbf16, #tpu.memory_space<vmem>>, vector<8x128xbf16>
      tpu.vector_store %arg6[%c0_14, %c0_15], %17 {strides = array<i32>} : memref<8x128xbf16, #tpu.memory_space<vmem>>, vector<8x128xbf16>,
    } else {
    }
    return
  }
  func.func @transform_0(%arg0: i32, %arg1: i32, %arg2: i32) -> (i32, i32) {
    %c0_i32 = arith.constant 0 : i32
    return %arg0, %arg2 : i32, i32
  }
  func.func @transform_1(%arg0: i32, %arg1: i32, %arg2: i32) -> (i32, i32) {
    %c0_i32 = arith.constant 0 : i32
    return %arg2, %arg1 : i32, i32
  }
  func.func @transform_2(%arg0: i32, %arg1: i32, %arg2: i32) -> (i32, i32) {
    %c0_i32 = arith.constant 0 : i32
    %c0_i32_0 = arith.constant 0 : i32
    return %c0_i32, %arg1 : i32, i32
  }
  func.func @transform_3(%arg0: i32, %arg1: i32, %arg2: i32) -> (i32, i32) {
    %c0_i32 = arith.constant 0 : i32
    return %arg0, %arg1 : i32, i32
  }
}

module attributes {stable_mosaic.version = 11 : i64} {
  func.func @_pos_score_kernel(%arg0: i32, %arg1: i32, %arg2: memref<1x1x1x15x8xbf16, #tpu.memory_space<vmem>>, %arg3: memref<1x1x8xf32, #tpu.memory_space<vmem>>, %arg4: memref<1x16x8xbf16, #tpu.memory_space<vmem>>, %arg5: memref<1x1x15x16xbf16, #tpu.memory_space<vmem>>) attributes {dimension_semantics = [#tpu.dimension_semantics<parallel>, #tpu.dimension_semantics<parallel>], iteration_bounds = array<i64: 2, 4>, scalar_prefetch = 0 : i64, scratch_operands = 0 : i64, tpu.core_type = #tpu.core_type<tc>, window_params = [{transform_indices = @transform_0, window_bounds = array<i64: 1, 1, 1, 15, 8>}, {transform_indices = @transform_1, window_bounds = array<i64: 1, 1, 8>}, {transform_indices = @transform_2, window_bounds = array<i64: 1, 16, 8>}, {transform_indices = @transform_3, window_bounds = array<i64: 1, 1, 15, 16>}]} {
    %c0 = arith.constant 0 : index
    %c0_0 = arith.constant 0 : index
    %c0_1 = arith.constant 0 : index
    %c0_2 = arith.constant 0 : index
    %c0_3 = arith.constant 0 : index
    %0 = vector.load %arg2[%c0, %c0_0, %c0_1, %c0_2, %c0_3] : memref<1x1x1x15x8xbf16, #tpu.memory_space<vmem>>, vector<1x1x1x15x8xbf16>
    %1 = vector.shape_cast %0 : vector<1x1x1x15x8xbf16> to vector<15x8xbf16>
    %2 = arith.extf %1 : vector<15x8xbf16> to vector<15x8xf32>
    %c0_4 = arith.constant 0 : index
    %c0_5 = arith.constant 0 : index
    %c0_6 = arith.constant 0 : index
    %3 = vector.load %arg3[%c0_4, %c0_5, %c0_6] : memref<1x1x8xf32, #tpu.memory_space<vmem>>, vector<1x1x8xf32>
    %4 = vector.shape_cast %3 : vector<1x1x8xf32> to vector<1x8xf32>
    %5 = vector.broadcast %4 : vector<1x8xf32> to vector<15x8xf32>
    %6 = arith.addf %2, %5 : vector<15x8xf32>
    %7 = arith.truncf %6 : vector<15x8xf32> to vector<15x8xbf16>
    %c0_7 = arith.constant 0 : index
    %c0_8 = arith.constant 0 : index
    %c0_9 = arith.constant 0 : index
    %8 = vector.load %arg4[%c0_7, %c0_8, %c0_9] : memref<1x16x8xbf16, #tpu.memory_space<vmem>>, vector<1x16x8xbf16>
    %9 = vector.shape_cast %8 : vector<1x16x8xbf16> to vector<16x8xbf16>
    %cst = arith.constant dense<0.000000e+00> : vector<15x16xf32>
    %10 = tpu.matmul %7, %9, %cst {dimension_numbers = #tpu.dot_dimension_numbers<[1], [1], [0], [0], [0, 0, 1, 0], [], []>} : vector<15x8xbf16>, vector<16x8xbf16>, vector<15x16xf32> -> vector<15x16xf32>
    %11 = arith.truncf %10 : vector<15x16xf32> to vector<15x16xbf16>
    %c0_10 = arith.constant 0 : index
    %c0_11 = arith.constant 0 : index
    %c0_12 = arith.constant 0 : index
    %c0_13 = arith.constant 0 : index
    %12 = vector.load %arg5[%c0_10, %c0_11, %c0_12, %c0_13] : memref<1x1x15x16xbf16, #tpu.memory_space<vmem>>, vector<1x1x15x16xbf16>
    %13 = vector.shape_cast %12 : vector<1x1x15x16xbf16> to vector<15x16xbf16>
    %14 = vector.shape_cast %11 : vector<15x16xbf16> to vector<1x1x15x16xbf16>
    tpu.vector_store %arg5[%c0_10, %c0_11, %c0_12, %c0_13], %14 {strides = array<i32>} : memref<1x1x15x16xbf16, #tpu.memory_space<vmem>>, vector<1x1x15x16xbf16>,
    return
  }
  func.func @transform_0(%arg0: i32, %arg1: i32) -> (i32, i32, i32, i32, i32) {
    %c0_i32 = arith.constant 0 : i32
    %c0_i32_0 = arith.constant 0 : i32
    %c0_i32_1 = arith.constant 0 : i32
    %c0_i32_2 = arith.constant 0 : i32
    return %c0_i32, %arg0, %arg1, %c0_i32_0, %c0_i32_1 : i32, i32, i32, i32, i32
  }
  func.func @transform_1(%arg0: i32, %arg1: i32) -> (i32, i32, i32) {
    %c0_i32 = arith.constant 0 : i32
    %c0_i32_0 = arith.constant 0 : i32
    %c0_i32_1 = arith.constant 0 : i32
    return %arg1, %c0_i32, %c0_i32_0 : i32, i32, i32
  }
  func.func @transform_2(%arg0: i32, %arg1: i32) -> (i32, i32, i32) {
    %c0_i32 = arith.constant 0 : i32
    %c0_i32_0 = arith.constant 0 : i32
    %c0_i32_1 = arith.constant 0 : i32
    return %arg1, %c0_i32, %c0_i32_0 : i32, i32, i32
  }
  func.func @transform_3(%arg0: i32, %arg1: i32) -> (i32, i32, i32, i32) {
    %c0_i32 = arith.constant 0 : i32
    %c0_i32_0 = arith.constant 0 : i32
    %c0_i32_1 = arith.constant 0 : i32
    return %arg0, %arg1, %c0_i32, %c0_i32_0 : i32, i32, i32, i32
  }
}

module attributes {stable_mosaic.version = 11 : i64} {
  func.func @_attn_kernel(%arg0: i32, %arg1: i32, %arg2: memref<3x1x1x15x8xbf16, #tpu.memory_space<vmem>>, %arg3: memref<1x1x8xf32, #tpu.memory_space<vmem>>, %arg4: memref<1x1x15x15xbf16, #tpu.memory_space<vmem>>, %arg5: memref<1x1x15x8xbf16, #tpu.memory_space<vmem>>) attributes {dimension_semantics = [#tpu.dimension_semantics<parallel>, #tpu.dimension_semantics<parallel>], iteration_bounds = array<i64: 2, 4>, scalar_prefetch = 0 : i64, scratch_operands = 0 : i64, tpu.core_type = #tpu.core_type<tc>, window_params = [{transform_indices = @transform_0, window_bounds = array<i64: 3, 1, 1, 15, 8>}, {transform_indices = @transform_1, window_bounds = array<i64: 1, 1, 8>}, {transform_indices = @transform_2, window_bounds = array<i64: 1, 1, 15, 15>}, {transform_indices = @transform_3, window_bounds = array<i64: 1, 1, 15, 8>}]} {
    %c0 = arith.constant 0 : index
    %c0_0 = arith.constant 0 : index
    %c0_1 = arith.constant 0 : index
    %c0_2 = arith.constant 0 : index
    %c0_3 = arith.constant 0 : index
    %0 = vector.load %arg2[%c0, %c0_0, %c0_1, %c0_2, %c0_3] : memref<3x1x1x15x8xbf16, #tpu.memory_space<vmem>>, vector<1x1x1x15x8xbf16>
    %1 = vector.shape_cast %0 : vector<1x1x1x15x8xbf16> to vector<15x8xbf16>
    %2 = arith.extf %1 : vector<15x8xbf16> to vector<15x8xf32>
    %c0_4 = arith.constant 0 : index
    %c0_5 = arith.constant 0 : index
    %c0_6 = arith.constant 0 : index
    %3 = vector.load %arg3[%c0_4, %c0_5, %c0_6] : memref<1x1x8xf32, #tpu.memory_space<vmem>>, vector<1x1x8xf32>
    %4 = vector.shape_cast %3 : vector<1x1x8xf32> to vector<1x8xf32>
    %5 = vector.broadcast %4 : vector<1x8xf32> to vector<15x8xf32>
    %6 = arith.addf %2, %5 : vector<15x8xf32>
    %c1 = arith.constant 1 : index
    %c0_7 = arith.constant 0 : index
    %c0_8 = arith.constant 0 : index
    %c0_9 = arith.constant 0 : index
    %c0_10 = arith.constant 0 : index
    %7 = vector.load %arg2[%c1, %c0_7, %c0_8, %c0_9, %c0_10] : memref<3x1x1x15x8xbf16, #tpu.memory_space<vmem>>, vector<1x1x1x15x8xbf16>
    %8 = vector.shape_cast %7 : vector<1x1x1x15x8xbf16> to vector<15x8xbf16>
    %c2 = arith.constant 2 : index
    %c0_11 = arith.constant 0 : index
    %c0_12 = arith.constant 0 : index
    %c0_13 = arith.constant 0 : index
    %c0_14 = arith.constant 0 : index
    %9 = vector.load %arg2[%c2, %c0_11, %c0_12, %c0_13, %c0_14] : memref<3x1x1x15x8xbf16, #tpu.memory_space<vmem>>, vector<1x1x1x15x8xbf16>
    %10 = vector.shape_cast %9 : vector<1x1x1x15x8xbf16> to vector<15x8xbf16>
    %11 = arith.truncf %6 : vector<15x8xf32> to vector<15x8xbf16>
    %cst = arith.constant dense<0.000000e+00> : vector<15x15xf32>
    %12 = tpu.matmul %11, %8, %cst {dimension_numbers = #tpu.dot_dimension_numbers<[1], [1], [0], [0], [0, 0, 1, 0], [], []>} : vector<15x8xbf16>, vector<15x8xbf16>, vector<15x15xf32> -> vector<15x15xf32>
    %c0_15 = arith.constant 0 : index
    %c0_16 = arith.constant 0 : index
    %c0_17 = arith.constant 0 : index
    %c0_18 = arith.constant 0 : index
    %13 = vector.load %arg4[%c0_15, %c0_16, %c0_17, %c0_18] : memref<1x1x15x15xbf16, #tpu.memory_space<vmem>>, vector<1x1x15x15xbf16>
    %14 = vector.shape_cast %13 : vector<1x1x15x15xbf16> to vector<15x15xbf16>
    %15 = arith.extf %14 : vector<15x15xbf16> to vector<15x15xf32>
    %16 = arith.addf %12, %15 : vector<15x15xf32>
    %cst_19 = arith.constant 0.176776692 : f32
    %17 = vector.broadcast %cst_19 : f32 to vector<15x15xf32>
    %18 = arith.mulf %16, %17 : vector<15x15xf32>
    %cst_20 = arith.constant dense<0xFF800000> : vector<15xf32>
    %19 = vector.multi_reduction <maximumf>, %18, %cst_20 [1] : vector<15x15xf32> to vector<15xf32>
    %20 = vector.shape_cast %19 : vector<15xf32> to vector<15x1xf32>
    %21 = vector.broadcast %20 : vector<15x1xf32> to vector<15x15xf32>
    %22 = arith.subf %18, %21 : vector<15x15xf32>
    %23 = math.exp %22 : vector<15x15xf32>
    %cst_21 = arith.constant dense<0.000000e+00> : vector<15xf32>
    %24 = vector.multi_reduction <add>, %23, %cst_21 [1] : vector<15x15xf32> to vector<15xf32>
    %25 = vector.shape_cast %24 : vector<15xf32> to vector<15x1xf32>
    %26 = tpu.reciprocal %25 {approx = true} : vector<15x1xf32> -> vector<15x1xf32>
    %27 = vector.broadcast %26 : vector<15x1xf32> to vector<15x15xf32>
    %28 = arith.mulf %23, %27 : vector<15x15xf32>
    %29 = arith.truncf %28 : vector<15x15xf32> to vector<15x15xbf16>
    %cst_22 = arith.constant dense<0.000000e+00> : vector<15x8xf32>
    %30 = tpu.matmul %29, %10, %cst_22 {dimension_numbers = #tpu.dot_dimension_numbers<[1], [0], [0], [1], [0, 0, 1, 1], [], []>} : vector<15x15xbf16>, vector<15x8xbf16>, vector<15x8xf32> -> vector<15x8xf32>
    %31 = arith.truncf %30 : vector<15x8xf32> to vector<15x8xbf16>
    %c0_23 = arith.constant 0 : index
    %c0_24 = arith.constant 0 : index
    %c0_25 = arith.constant 0 : index
    %c0_26 = arith.constant 0 : index
    %32 = vector.load %arg5[%c0_23, %c0_24, %c0_25, %c0_26] : memref<1x1x15x8xbf16, #tpu.memory_space<vmem>>, vector<1x1x15x8xbf16>
    %33 = vector.shape_cast %32 : vector<1x1x15x8xbf16> to vector<15x8xbf16>
    %34 = vector.shape_cast %31 : vector<15x8xbf16> to vector<1x1x15x8xbf16>
    tpu.vector_store %arg5[%c0_23, %c0_24, %c0_25, %c0_26], %34 {strides = array<i32>} : memref<1x1x15x8xbf16, #tpu.memory_space<vmem>>, vector<1x1x15x8xbf16>,
    return
  }
  func.func @transform_0(%arg0: i32, %arg1: i32) -> (i32, i32, i32, i32, i32) {
    %c0_i32 = arith.constant 0 : i32
    %c0_i32_0 = arith.constant 0 : i32
    %c0_i32_1 = arith.constant 0 : i32
    %c0_i32_2 = arith.constant 0 : i32
    return %c0_i32, %arg0, %arg1, %c0_i32_0, %c0_i32_1 : i32, i32, i32, i32, i32
  }
  func.func @transform_1(%arg0: i32, %arg1: i32) -> (i32, i32, i32) {
    %c0_i32 = arith.constant 0 : i32
    %c0_i32_0 = arith.constant 0 : i32
    %c0_i32_1 = arith.constant 0 : i32
    return %arg1, %c0_i32, %c0_i32_0 : i32, i32, i32
  }
  func.func @transform_2(%arg0: i32, %arg1: i32) -> (i32, i32, i32, i32) {
    %c0_i32 = arith.constant 0 : i32
    %c0_i32_0 = arith.constant 0 : i32
    %c0_i32_1 = arith.constant 0 : i32
    return %arg0, %arg1, %c0_i32, %c0_i32_0 : i32, i32, i32, i32
  }
  func.func @transform_3(%arg0: i32, %arg1: i32) -> (i32, i32, i32, i32) {
    %c0_i32 = arith.constant 0 : i32
    %c0_i32_0 = arith.constant 0 : i32
    %c0_i32_1 = arith.constant 0 : i32
    return %arg0, %arg1, %c0_i32, %c0_i32_0 : i32, i32, i32, i32
  }
}

module attributes {stable_mosaic.version = 11 : i64} {
  func.func @kernel(%arg0: i32, %arg1: i32, %arg2: i32, %arg3: memref<16x32xbf16, #tpu.memory_space<vmem>>, %arg4: memref<32x128xbf16, #tpu.memory_space<vmem>>, %arg5: memref<1x128xf32, #tpu.memory_space<vmem>>, %arg6: memref<16x128xbf16, #tpu.memory_space<vmem>>, %arg7: memref<16x128xbf16, #tpu.memory_space<vmem>>, %arg8: memref<16x128xf32, #tpu.memory_space<vmem>>) attributes {dimension_semantics = [#tpu.dimension_semantics<parallel>, #tpu.dimension_semantics<parallel>, #tpu.dimension_semantics<arbitrary>], iteration_bounds = array<i64: 2, 1, 1>, scalar_prefetch = 0 : i64, scratch_operands = 1 : i64, tpu.core_type = #tpu.core_type<tc>, window_params = [{transform_indices = @transform_0, window_bounds = array<i64: 16, 32>}, {transform_indices = @transform_1, window_bounds = array<i64: 32, 128>}, {transform_indices = @transform_2, window_bounds = array<i64: 1, 128>}, {transform_indices = @transform_3, window_bounds = array<i64: 16, 128>}, {transform_indices = @transform_4, window_bounds = array<i64: 16, 128>}]} {
    %c0_i32 = arith.constant 0 : i32
    %0 = arith.cmpi eq, %arg2, %c0_i32 : i32
    %1 = arith.extui %0 : i1 to i32
    %c0_i32_0 = arith.constant 0 : i32
    %2 = arith.cmpi ne, %1, %c0_i32_0 : i32
    scf.if %2 {
      %cst_10 = arith.constant 0.000000e+00 : f32
      %12 = vector.broadcast %cst_10 : f32 to vector<16x128xf32>
      %c0_11 = arith.constant 0 : index
      %c0_12 = arith.constant 0 : index
      %13 = vector.load %arg8[%c0_11, %c0_12] : memref<16x128xf32, #tpu.memory_space<vmem>>, vector<16x128xf32>
      tpu.vector_store %arg8[%c0_11, %c0_12], %12 {strides = array<i32>} : memref<16x128xf32, #tpu.memory_space<vmem>>, vector<16x128xf32>,
    } else {
    }
    %c0 = arith.constant 0 : index
    %c0_1 = arith.constant 0 : index
    %3 = vector.load %arg3[%c0, %c0_1] : memref<16x32xbf16, #tpu.memory_space<vmem>>, vector<16x32xbf16>
    %c0_2 = arith.constant 0 : index
    %c0_3 = arith.constant 0 : index
    %4 = vector.load %arg8[%c0_2, %c0_3] : memref<16x128xf32, #tpu.memory_space<vmem>>, vector<16x128xf32>
    %c0_4 = arith.constant 0 : index
    %c0_5 = arith.constant 0 : index
    %5 = vector.load %arg4[%c0_4, %c0_5] : memref<32x128xbf16, #tpu.memory_space<vmem>>, vector<32x128xbf16>
    %cst = arith.constant dense<0.000000e+00> : vector<16x128xf32>
    %6 = tpu.matmul %3, %5, %cst {dimension_numbers = #tpu.dot_dimension_numbers<[1], [0], [0], [1], [0, 0, 1, 1], [], []>} : vector<16x32xbf16>, vector<32x128xbf16>, vector<16x128xf32> -> vector<16x128xf32>
    %7 = arith.addf %4, %6 : vector<16x128xf32>
    %c0_6 = arith.constant 0 : index
    %c0_7 = arith.constant 0 : index
    %8 = vector.load %arg8[%c0_6, %c0_7] : memref<16x128xf32, #tpu.memory_space<vmem>>, vector<16x128xf32>
    tpu.vector_store %arg8[%c0_6, %c0_7], %7 {strides = array<i32>} : memref<16x128xf32, #tpu.memory_space<vmem>>, vector<16x128xf32>,
    %c0_i32_8 = arith.constant 0 : i32
    %9 = arith.cmpi eq, %arg2, %c0_i32_8 : i32
    %10 = arith.extui %9 : i1 to i32
    %c0_i32_9 = arith.constant 0 : i32
    %11 = arith.cmpi ne, %10, %c0_i32_9 : i32
    scf.if %11 {
      %c0_10 = arith.constant 0 : index
      %c0_11 = arith.constant 0 : index
      %12 = vector.load %arg8[%c0_10, %c0_11] : memref<16x128xf32, #tpu.memory_space<vmem>>, vector<16x128xf32>
      %c0_12 = arith.constant 0 : index
      %c0_13 = arith.constant 0 : index
      %13 = vector.load %arg5[%c0_12, %c0_13] : memref<1x128xf32, #tpu.memory_space<vmem>>, vector<1x128xf32>
      %14 = vector.broadcast %13 : vector<1x128xf32> to vector<16x128xf32>
      %15 = arith.addf %12, %14 : vector<16x128xf32>
      %c0_14 = arith.constant 0 : index
      %c0_15 = arith.constant 0 : index
      %16 = vector.load %arg6[%c0_14, %c0_15] : memref<16x128xbf16, #tpu.memory_space<vmem>>, vector<16x128xbf16>
      %17 = arith.extf %16 : vector<16x128xbf16> to vector<16x128xf32>
      %cst_16 = arith.constant 1.000000e+00 : f32
      %18 = vector.broadcast %cst_16 : f32 to vector<16x128xf32>
      %19 = arith.mulf %18, %15 : vector<16x128xf32>
      %20 = arith.addf %17, %19 : vector<16x128xf32>
      %21 = arith.truncf %20 : vector<16x128xf32> to vector<16x128xbf16>
      %c0_17 = arith.constant 0 : index
      %c0_18 = arith.constant 0 : index
      %22 = vector.load %arg7[%c0_17, %c0_18] : memref<16x128xbf16, #tpu.memory_space<vmem>>, vector<16x128xbf16>
      tpu.vector_store %arg7[%c0_17, %c0_18], %21 {strides = array<i32>} : memref<16x128xbf16, #tpu.memory_space<vmem>>, vector<16x128xbf16>,
    } else {
    }
    return
  }
  func.func @transform_0(%arg0: i32, %arg1: i32, %arg2: i32) -> (i32, i32) {
    %c0_i32 = arith.constant 0 : i32
    return %arg0, %arg2 : i32, i32
  }
  func.func @transform_1(%arg0: i32, %arg1: i32, %arg2: i32) -> (i32, i32) {
    %c0_i32 = arith.constant 0 : i32
    return %arg2, %arg1 : i32, i32
  }
  func.func @transform_2(%arg0: i32, %arg1: i32, %arg2: i32) -> (i32, i32) {
    %c0_i32 = arith.constant 0 : i32
    %c0_i32_0 = arith.constant 0 : i32
    return %c0_i32, %arg1 : i32, i32
  }
  func.func @transform_3(%arg0: i32, %arg1: i32, %arg2: i32) -> (i32, i32) {
    %c0_i32 = arith.constant 0 : i32
    return %arg0, %arg1 : i32, i32
  }
  func.func @transform_4(%arg0: i32, %arg1: i32, %arg2: i32) -> (i32, i32) {
    %c0_i32 = arith.constant 0 : i32
    return %arg0, %arg1 : i32, i32
  }
}

module attributes {stable_mosaic.version = 11 : i64} {
  func.func @kernel(%arg0: i32, %arg1: i32, %arg2: i32, %arg3: memref<16x32xbf16, #tpu.memory_space<vmem>>, %arg4: memref<32x64xbf16, #tpu.memory_space<vmem>>, %arg5: memref<1x64xf32, #tpu.memory_space<vmem>>, %arg6: memref<1x32xf32, #tpu.memory_space<vmem>>, %arg7: memref<1x32xf32, #tpu.memory_space<vmem>>, %arg8: memref<16x32xbf16, #tpu.memory_space<vmem>>, %arg9: memref<16x64xf32, #tpu.memory_space<vmem>>, %arg10: memref<16x32xbf16, #tpu.memory_space<vmem>>) attributes {dimension_semantics = [#tpu.dimension_semantics<parallel>, #tpu.dimension_semantics<arbitrary>, #tpu.dimension_semantics<arbitrary>], iteration_bounds = array<i64: 2, 1, 1>, scalar_prefetch = 0 : i64, scratch_operands = 2 : i64, tpu.core_type = #tpu.core_type<tc>, window_params = [{transform_indices = @transform_0, window_bounds = array<i64: 16, 32>}, {transform_indices = @transform_1, window_bounds = array<i64: 32, 64>}, {transform_indices = @transform_2, window_bounds = array<i64: 1, 64>}, {pipeline_mode = #tpu.pipeline_mode<synchronous>, transform_indices = @transform_3, window_bounds = array<i64: 1, 32>}, {pipeline_mode = #tpu.pipeline_mode<synchronous>, transform_indices = @transform_4, window_bounds = array<i64: 1, 32>}, {transform_indices = @transform_5, window_bounds = array<i64: 16, 32>}]} {
    %c0_i32 = arith.constant 0 : i32
    %0 = arith.cmpi eq, %arg2, %c0_i32 : i32
    %1 = arith.extui %0 : i1 to i32
    %c0_i32_0 = arith.constant 0 : i32
    %2 = arith.cmpi ne, %1, %c0_i32_0 : i32
    scf.if %2 {
      %cst_13 = arith.constant 0.000000e+00 : f32
      %17 = vector.broadcast %cst_13 : f32 to vector<16x64xf32>
      %c0_14 = arith.constant 0 : index
      %c0_15 = arith.constant 0 : index
      %18 = vector.load %arg9[%c0_14, %c0_15] : memref<16x64xf32, #tpu.memory_space<vmem>>, vector<16x64xf32>
      tpu.vector_store %arg9[%c0_14, %c0_15], %17 {strides = array<i32>} : memref<16x64xf32, #tpu.memory_space<vmem>>, vector<16x64xf32>,
    } else {
    }
    %c0_i32_1 = arith.constant 0 : i32
    %3 = arith.cmpi eq, %arg1, %c0_i32_1 : i32
    %c0_i32_2 = arith.constant 0 : i32
    %4 = arith.cmpi eq, %arg2, %c0_i32_2 : i32
    %5 = arith.andi %3, %4 : i1
    %6 = arith.extui %5 : i1 to i32
    %c0_i32_3 = arith.constant 0 : i32
    %7 = arith.cmpi ne, %6, %c0_i32_3 : i32
    scf.if %7 {
      %c0_13 = arith.constant 0 : index
      %c0_14 = arith.constant 0 : index
      %17 = vector.load %arg3[%c0_13, %c0_14] : memref<16x32xbf16, #tpu.memory_space<vmem>>, vector<16x32xbf16>
      %18 = arith.extf %17 : vector<16x32xbf16> to vector<16x32xf32>
      %cst_15 = arith.constant dense<0.000000e+00> : vector<16xf32>
      %19 = vector.multi_reduction <add>, %18, %cst_15 [1] : vector<16x32xf32> to vector<16xf32>
      %20 = vector.shape_cast %19 : vector<16xf32> to vector<16x1xf32>
      %cst_16 = arith.constant 3.200000e+01 : f32
      %21 = vector.broadcast %cst_16 : f32 to vector<16x1xf32>
      %22 = arith.divf %20, %21 : vector<16x1xf32>
      %23 = vector.broadcast %22 : vector<16x1xf32> to vector<16x32xf32>
      %24 = arith.subf %18, %23 : vector<16x32xf32>
      %25 = arith.mulf %24, %24 : vector<16x32xf32>
      %cst_17 = arith.constant dense<0.000000e+00> : vector<16xf32>
      %26 = vector.multi_reduction <add>, %25, %cst_17 [1] : vector<16x32xf32> to vector<16xf32>
      %27 = vector.shape_cast %26 : vector<16xf32> to vector<16x1xf32>
      %cst_18 = arith.constant 3.200000e+01 : f32
      %28 = vector.broadcast %cst_18 : f32 to vector<16x1xf32>
      %29 = arith.divf %27, %28 : vector<16x1xf32>
      %30 = vector.broadcast %22 : vector<16x1xf32> to vector<16x32xf32>
      %31 = arith.subf %18, %30 : vector<16x32xf32>
      %cst_19 = arith.constant 9.99999974E-6 : f32
      %32 = vector.broadcast %cst_19 : f32 to vector<16x1xf32>
      %33 = arith.addf %29, %32 : vector<16x1xf32>
      %34 = math.rsqrt %33 : vector<16x1xf32>
      %35 = vector.broadcast %34 : vector<16x1xf32> to vector<16x32xf32>
      %36 = arith.mulf %31, %35 : vector<16x32xf32>
      %c0_20 = arith.constant 0 : index
      %c0_21 = arith.constant 0 : index
      %37 = vector.load %arg6[%c0_20, %c0_21] : memref<1x32xf32, #tpu.memory_space<vmem>>, vector<1x32xf32>
      %38 = vector.broadcast %37 : vector<1x32xf32> to vector<16x32xf32>
      %39 = arith.mulf %36, %38 : vector<16x32xf32>
      %c0_22 = arith.constant 0 : index
      %c0_23 = arith.constant 0 : index
      %40 = vector.load %arg7[%c0_22, %c0_23] : memref<1x32xf32, #tpu.memory_space<vmem>>, vector<1x32xf32>
      %41 = vector.broadcast %40 : vector<1x32xf32> to vector<16x32xf32>
      %42 = arith.addf %39, %41 : vector<16x32xf32>
      %43 = arith.truncf %42 : vector<16x32xf32> to vector<16x32xbf16>
      %c0_24 = arith.constant 0 : index
      %c0_25 = arith.constant 0 : index
      %44 = vector.load %arg10[%c0_24, %c0_25] : memref<16x32xbf16, #tpu.memory_space<vmem>>, vector<16x32xbf16>
      tpu.vector_store %arg10[%c0_24, %c0_25], %43 {strides = array<i32>} : memref<16x32xbf16, #tpu.memory_space<vmem>>, vector<16x32xbf16>,
    } else {
    }
    %c0 = arith.constant 0 : index
    %c0_4 = arith.constant 0 : index
    %8 = vector.load %arg10[%c0, %c0_4] : memref<16x32xbf16, #tpu.memory_space<vmem>>, vector<16x32xbf16>
    %c0_5 = arith.constant 0 : index
    %c0_6 = arith.constant 0 : index
    %9 = vector.load %arg9[%c0_5, %c0_6] : memref<16x64xf32, #tpu.memory_space<vmem>>, vector<16x64xf32>
    %c0_7 = arith.constant 0 : index
    %c0_8 = arith.constant 0 : index
    %10 = vector.load %arg4[%c0_7, %c0_8] : memref<32x64xbf16, #tpu.memory_space<vmem>>, vector<32x64xbf16>
    %cst = arith.constant dense<0.000000e+00> : vector<16x64xf32>
    %11 = tpu.matmul %8, %10, %cst {dimension_numbers = #tpu.dot_dimension_numbers<[1], [0], [0], [1], [0, 0, 1, 1], [], []>} : vector<16x32xbf16>, vector<32x64xbf16>, vector<16x64xf32> -> vector<16x64xf32>
    %12 = arith.addf %9, %11 : vector<16x64xf32>
    %c0_9 = arith.constant 0 : index
    %c0_10 = arith.constant 0 : index
    %13 = vector.load %arg9[%c0_9, %c0_10] : memref<16x64xf32, #tpu.memory_space<vmem>>, vector<16x64xf32>
    tpu.vector_store %arg9[%c0_9, %c0_10], %12 {strides = array<i32>} : memref<16x64xf32, #tpu.memory_space<vmem>>, vector<16x64xf32>,
    %c0_i32_11 = arith.constant 0 : i32
    %14 = arith.cmpi eq, %arg2, %c0_i32_11 : i32
    %15 = arith.extui %14 : i1 to i32
    %c0_i32_12 = arith.constant 0 : i32
    %16 = arith.cmpi ne, %15, %c0_i32_12 : i32
    scf.if %16 {
      %c0_13 = arith.constant 0 : index
      %c0_14 = arith.constant 0 : index
      %17 = vector.load %arg9[%c0_13, %c0_14] : memref<16x64xf32, #tpu.memory_space<vmem>>, vector<16x64xf32>
      %c0_15 = arith.constant 0 : index
      %c0_16 = arith.constant 0 : index
      %18 = vector.load %arg5[%c0_15, %c0_16] : memref<1x64xf32, #tpu.memory_space<vmem>>, vector<1x64xf32>
      %19 = vector.broadcast %18 : vector<1x64xf32> to vector<16x64xf32>
      %20 = arith.addf %17, %19 : vector<16x64xf32>
      %21 = vector.extract_strided_slice %20 {offsets = [0, 0], sizes = [16, 32], strides = [1, 1]} : vector<16x64xf32> to vector<16x32xf32>
      %22 = vector.extract_strided_slice %20 {offsets = [0, 32], sizes = [16, 32], strides = [1, 1]} : vector<16x64xf32> to vector<16x32xf32>
      %23 = arith.negf %22 : vector<16x32xf32>
      %24 = math.exp %23 : vector<16x32xf32>
      %cst_17 = arith.constant 1.000000e+00 : f32
      %25 = vector.broadcast %cst_17 : f32 to vector<16x32xf32>
      %26 = arith.addf %25, %24 : vector<16x32xf32>
      %27 = arith.divf %25, %26 : vector<16x32xf32>
      %28 = arith.mulf %21, %27 : vector<16x32xf32>
      %29 = arith.truncf %28 : vector<16x32xf32> to vector<16x32xbf16>
      %c0_18 = arith.constant 0 : index
      %c0_19 = arith.constant 0 : index
      %30 = vector.load %arg8[%c0_18, %c0_19] : memref<16x32xbf16, #tpu.memory_space<vmem>>, vector<16x32xbf16>
      tpu.vector_store %arg8[%c0_18, %c0_19], %29 {strides = array<i32>} : memref<16x32xbf16, #tpu.memory_space<vmem>>, vector<16x32xbf16>,
    } else {
    }
    return
  }
  func.func @transform_0(%arg0: i32, %arg1: i32, %arg2: i32) -> (i32, i32) {
    %c0_i32 = arith.constant 0 : i32
    return %arg0, %arg2 : i32, i32
  }
  func.func @transform_1(%arg0: i32, %arg1: i32, %arg2: i32) -> (i32, i32) {
    %c0_i32 = arith.constant 0 : i32
    return %arg2, %arg1 : i32, i32
  }
  func.func @transform_2(%arg0: i32, %arg1: i32, %arg2: i32) -> (i32, i32) {
    %c0_i32 = arith.constant 0 : i32
    %c0_i32_0 = arith.constant 0 : i32
    return %c0_i32, %arg1 : i32, i32
  }
  func.func @transform_3(%arg0: i32, %arg1: i32, %arg2: i32) -> (i32, i32) {
    %c0_i32 = arith.constant 0 : i32
    %c0_i32_0 = arith.constant 0 : i32
    %c0_i32_1 = arith.constant 0 : i32
    return %c0_i32, %c0_i32_0 : i32, i32
  }
  func.func @transform_4(%arg0: i32, %arg1: i32, %arg2: i32) -> (i32, i32) {
    %c0_i32 = arith.constant 0 : i32
    %c0_i32_0 = arith.constant 0 : i32
    %c0_i32_1 = arith.constant 0 : i32
    return %c0_i32, %c0_i32_0 : i32, i32
  }
  func.func @transform_5(%arg0: i32, %arg1: i32, %arg2: i32) -> (i32, i32) {
    %c0_i32 = arith.constant 0 : i32
    return %arg0, %arg1 : i32, i32
  }
}

module attributes {stable_mosaic.version = 11 : i64} {
  func.func @_dwconv_kernel(%arg0: i32, %arg1: memref<1x23x32xbf16, #tpu.memory_space<vmem>>, %arg2: memref<9x32xf32, #tpu.memory_space<vmem>>, %arg3: memref<1x32xf32, #tpu.memory_space<vmem>>, %arg4: memref<1x32xf32, #tpu.memory_space<vmem>>, %arg5: memref<1x15x32xbf16, #tpu.memory_space<vmem>>) attributes {dimension_semantics = [#tpu.dimension_semantics<parallel>], iteration_bounds = array<i64: 2>, scalar_prefetch = 0 : i64, scratch_operands = 0 : i64, tpu.core_type = #tpu.core_type<tc>, window_params = [{transform_indices = @transform_0, window_bounds = array<i64: 1, 23, 32>}, {pipeline_mode = #tpu.pipeline_mode<synchronous>, transform_indices = @transform_1, window_bounds = array<i64: 9, 32>}, {pipeline_mode = #tpu.pipeline_mode<synchronous>, transform_indices = @transform_2, window_bounds = array<i64: 1, 32>}, {pipeline_mode = #tpu.pipeline_mode<synchronous>, transform_indices = @transform_3, window_bounds = array<i64: 1, 32>}, {transform_indices = @transform_4, window_bounds = array<i64: 1, 15, 32>}]} {
    %c0 = arith.constant 0 : index
    %c0_0 = arith.constant 0 : index
    %c0_1 = arith.constant 0 : index
    %0 = vector.load %arg1[%c0, %c0_0, %c0_1] : memref<1x23x32xbf16, #tpu.memory_space<vmem>>, vector<1x15x32xbf16>
    %1 = vector.shape_cast %0 : vector<1x15x32xbf16> to vector<15x32xbf16>
    %2 = arith.extf %1 : vector<15x32xbf16> to vector<15x32xf32>
    %c0_2 = arith.constant 0 : index
    %c0_3 = arith.constant 0 : index
    %3 = vector.load %arg2[%c0_2, %c0_3] : memref<9x32xf32, #tpu.memory_space<vmem>>, vector<1x32xf32>
    %4 = vector.broadcast %3 : vector<1x32xf32> to vector<15x32xf32>
    %5 = arith.mulf %2, %4 : vector<15x32xf32>
    %c0_4 = arith.constant 0 : index
    %c1 = arith.constant 1 : index
    %c0_5 = arith.constant 0 : index
    %6 = vector.load %arg1[%c0_4, %c1, %c0_5] : memref<1x23x32xbf16, #tpu.memory_space<vmem>>, vector<1x15x32xbf16>
    %7 = vector.shape_cast %6 : vector<1x15x32xbf16> to vector<15x32xbf16>
    %8 = arith.extf %7 : vector<15x32xbf16> to vector<15x32xf32>
    %c1_6 = arith.constant 1 : index
    %c0_7 = arith.constant 0 : index
    %9 = vector.load %arg2[%c1_6, %c0_7] : memref<9x32xf32, #tpu.memory_space<vmem>>, vector<1x32xf32>
    %10 = vector.broadcast %9 : vector<1x32xf32> to vector<15x32xf32>
    %11 = arith.mulf %8, %10 : vector<15x32xf32>
    %12 = arith.addf %5, %11 : vector<15x32xf32>
    %c0_8 = arith.constant 0 : index
    %c2 = arith.constant 2 : index
    %c0_9 = arith.constant 0 : index
    %13 = vector.load %arg1[%c0_8, %c2, %c0_9] : memref<1x23x32xbf16, #tpu.memory_space<vmem>>, vector<1x15x32xbf16>
    %14 = vector.shape_cast %13 : vector<1x15x32xbf16> to vector<15x32xbf16>
    %15 = arith.extf %14 : vector<15x32xbf16> to vector<15x32xf32>
    %c2_10 = arith.constant 2 : index
    %c0_11 = arith.constant 0 : index
    %16 = vector.load %arg2[%c2_10, %c0_11] : memref<9x32xf32, #tpu.memory_space<vmem>>, vector<1x32xf32>
    %17 = vector.broadcast %16 : vector<1x32xf32> to vector<15x32xf32>
    %18 = arith.mulf %15, %17 : vector<15x32xf32>
    %19 = arith.addf %12, %18 : vector<15x32xf32>
    %c0_12 = arith.constant 0 : index
    %c3 = arith.constant 3 : index
    %c0_13 = arith.constant 0 : index
    %20 = vector.load %arg1[%c0_12, %c3, %c0_13] : memref<1x23x32xbf16, #tpu.memory_space<vmem>>, vector<1x15x32xbf16>
    %21 = vector.shape_cast %20 : vector<1x15x32xbf16> to vector<15x32xbf16>
    %22 = arith.extf %21 : vector<15x32xbf16> to vector<15x32xf32>
    %c3_14 = arith.constant 3 : index
    %c0_15 = arith.constant 0 : index
    %23 = vector.load %arg2[%c3_14, %c0_15] : memref<9x32xf32, #tpu.memory_space<vmem>>, vector<1x32xf32>
    %24 = vector.broadcast %23 : vector<1x32xf32> to vector<15x32xf32>
    %25 = arith.mulf %22, %24 : vector<15x32xf32>
    %26 = arith.addf %19, %25 : vector<15x32xf32>
    %c0_16 = arith.constant 0 : index
    %c4 = arith.constant 4 : index
    %c0_17 = arith.constant 0 : index
    %27 = vector.load %arg1[%c0_16, %c4, %c0_17] : memref<1x23x32xbf16, #tpu.memory_space<vmem>>, vector<1x15x32xbf16>
    %28 = vector.shape_cast %27 : vector<1x15x32xbf16> to vector<15x32xbf16>
    %29 = arith.extf %28 : vector<15x32xbf16> to vector<15x32xf32>
    %c4_18 = arith.constant 4 : index
    %c0_19 = arith.constant 0 : index
    %30 = vector.load %arg2[%c4_18, %c0_19] : memref<9x32xf32, #tpu.memory_space<vmem>>, vector<1x32xf32>
    %31 = vector.broadcast %30 : vector<1x32xf32> to vector<15x32xf32>
    %32 = arith.mulf %29, %31 : vector<15x32xf32>
    %33 = arith.addf %26, %32 : vector<15x32xf32>
    %c0_20 = arith.constant 0 : index
    %c5 = arith.constant 5 : index
    %c0_21 = arith.constant 0 : index
    %34 = vector.load %arg1[%c0_20, %c5, %c0_21] : memref<1x23x32xbf16, #tpu.memory_space<vmem>>, vector<1x15x32xbf16>
    %35 = vector.shape_cast %34 : vector<1x15x32xbf16> to vector<15x32xbf16>
    %36 = arith.extf %35 : vector<15x32xbf16> to vector<15x32xf32>
    %c5_22 = arith.constant 5 : index
    %c0_23 = arith.constant 0 : index
    %37 = vector.load %arg2[%c5_22, %c0_23] : memref<9x32xf32, #tpu.memory_space<vmem>>, vector<1x32xf32>
    %38 = vector.broadcast %37 : vector<1x32xf32> to vector<15x32xf32>
    %39 = arith.mulf %36, %38 : vector<15x32xf32>
    %40 = arith.addf %33, %39 : vector<15x32xf32>
    %c0_24 = arith.constant 0 : index
    %c6 = arith.constant 6 : index
    %c0_25 = arith.constant 0 : index
    %41 = vector.load %arg1[%c0_24, %c6, %c0_25] : memref<1x23x32xbf16, #tpu.memory_space<vmem>>, vector<1x15x32xbf16>
    %42 = vector.shape_cast %41 : vector<1x15x32xbf16> to vector<15x32xbf16>
    %43 = arith.extf %42 : vector<15x32xbf16> to vector<15x32xf32>
    %c6_26 = arith.constant 6 : index
    %c0_27 = arith.constant 0 : index
    %44 = vector.load %arg2[%c6_26, %c0_27] : memref<9x32xf32, #tpu.memory_space<vmem>>, vector<1x32xf32>
    %45 = vector.broadcast %44 : vector<1x32xf32> to vector<15x32xf32>
    %46 = arith.mulf %43, %45 : vector<15x32xf32>
    %47 = arith.addf %40, %46 : vector<15x32xf32>
    %c0_28 = arith.constant 0 : index
    %c7 = arith.constant 7 : index
    %c0_29 = arith.constant 0 : index
    %48 = vector.load %arg1[%c0_28, %c7, %c0_29] : memref<1x23x32xbf16, #tpu.memory_space<vmem>>, vector<1x15x32xbf16>
    %49 = vector.shape_cast %48 : vector<1x15x32xbf16> to vector<15x32xbf16>
    %50 = arith.extf %49 : vector<15x32xbf16> to vector<15x32xf32>
    %c7_30 = arith.constant 7 : index
    %c0_31 = arith.constant 0 : index
    %51 = vector.load %arg2[%c7_30, %c0_31] : memref<9x32xf32, #tpu.memory_space<vmem>>, vector<1x32xf32>
    %52 = vector.broadcast %51 : vector<1x32xf32> to vector<15x32xf32>
    %53 = arith.mulf %50, %52 : vector<15x32xf32>
    %54 = arith.addf %47, %53 : vector<15x32xf32>
    %c0_32 = arith.constant 0 : index
    %c8 = arith.constant 8 : index
    %c0_33 = arith.constant 0 : index
    %55 = vector.load %arg1[%c0_32, %c8, %c0_33] : memref<1x23x32xbf16, #tpu.memory_space<vmem>>, vector<1x15x32xbf16>
    %56 = vector.shape_cast %55 : vector<1x15x32xbf16> to vector<15x32xbf16>
    %57 = arith.extf %56 : vector<15x32xbf16> to vector<15x32xf32>
    %c8_34 = arith.constant 8 : index
    %c0_35 = arith.constant 0 : index
    %58 = vector.load %arg2[%c8_34, %c0_35] : memref<9x32xf32, #tpu.memory_space<vmem>>, vector<1x32xf32>
    %59 = vector.broadcast %58 : vector<1x32xf32> to vector<15x32xf32>
    %60 = arith.mulf %57, %59 : vector<15x32xf32>
    %61 = arith.addf %54, %60 : vector<15x32xf32>
    %c0_36 = arith.constant 0 : index
    %c0_37 = arith.constant 0 : index
    %62 = vector.load %arg3[%c0_36, %c0_37] : memref<1x32xf32, #tpu.memory_space<vmem>>, vector<1x32xf32>
    %63 = vector.broadcast %62 : vector<1x32xf32> to vector<15x32xf32>
    %64 = arith.mulf %61, %63 : vector<15x32xf32>
    %c0_38 = arith.constant 0 : index
    %c0_39 = arith.constant 0 : index
    %65 = vector.load %arg4[%c0_38, %c0_39] : memref<1x32xf32, #tpu.memory_space<vmem>>, vector<1x32xf32>
    %66 = vector.broadcast %65 : vector<1x32xf32> to vector<15x32xf32>
    %67 = arith.addf %64, %66 : vector<15x32xf32>
    %68 = arith.negf %67 : vector<15x32xf32>
    %69 = math.exp %68 : vector<15x32xf32>
    %cst = arith.constant 1.000000e+00 : f32
    %70 = vector.broadcast %cst : f32 to vector<15x32xf32>
    %71 = arith.addf %70, %69 : vector<15x32xf32>
    %72 = arith.divf %70, %71 : vector<15x32xf32>
    %73 = arith.mulf %67, %72 : vector<15x32xf32>
    %74 = arith.truncf %73 : vector<15x32xf32> to vector<15x32xbf16>
    %c0_40 = arith.constant 0 : index
    %c0_41 = arith.constant 0 : index
    %c0_42 = arith.constant 0 : index
    %75 = vector.load %arg5[%c0_40, %c0_41, %c0_42] : memref<1x15x32xbf16, #tpu.memory_space<vmem>>, vector<1x15x32xbf16>
    %76 = vector.shape_cast %75 : vector<1x15x32xbf16> to vector<15x32xbf16>
    %77 = vector.shape_cast %74 : vector<15x32xbf16> to vector<1x15x32xbf16>
    tpu.vector_store %arg5[%c0_40, %c0_41, %c0_42], %77 {strides = array<i32>} : memref<1x15x32xbf16, #tpu.memory_space<vmem>>, vector<1x15x32xbf16>,
    return
  }
  func.func @transform_0(%arg0: i32) -> (i32, i32, i32) {
    %c0_i32 = arith.constant 0 : i32
    %c0_i32_0 = arith.constant 0 : i32
    %c0_i32_1 = arith.constant 0 : i32
    return %arg0, %c0_i32, %c0_i32_0 : i32, i32, i32
  }
  func.func @transform_1(%arg0: i32) -> (i32, i32) {
    %c0_i32 = arith.constant 0 : i32
    %c0_i32_0 = arith.constant 0 : i32
    %c0_i32_1 = arith.constant 0 : i32
    return %c0_i32, %c0_i32_0 : i32, i32
  }
  func.func @transform_2(%arg0: i32) -> (i32, i32) {
    %c0_i32 = arith.constant 0 : i32
    %c0_i32_0 = arith.constant 0 : i32
    %c0_i32_1 = arith.constant 0 : i32
    return %c0_i32, %c0_i32_0 : i32, i32
  }
  func.func @transform_3(%arg0: i32) -> (i32, i32) {
    %c0_i32 = arith.constant 0 : i32
    %c0_i32_0 = arith.constant 0 : i32
    %c0_i32_1 = arith.constant 0 : i32
    return %c0_i32, %c0_i32_0 : i32, i32
  }
  func.func @transform_4(%arg0: i32) -> (i32, i32, i32) {
    %c0_i32 = arith.constant 0 : i32
    %c0_i32_0 = arith.constant 0 : i32
    %c0_i32_1 = arith.constant 0 : i32
    return %arg0, %c0_i32, %c0_i32_0 : i32, i32, i32
  }
}

module attributes {stable_mosaic.version = 11 : i64} {
  func.func @kernel(%arg0: i32, %arg1: i32, %arg2: i32, %arg3: memref<16x64xbf16, #tpu.memory_space<vmem>>, %arg4: memref<64x32xbf16, #tpu.memory_space<vmem>>, %arg5: memref<1x32xf32, #tpu.memory_space<vmem>>, %arg6: memref<16x32xbf16, #tpu.memory_space<vmem>>, %arg7: memref<1x32xf32, #tpu.memory_space<vmem>>, %arg8: memref<1x32xf32, #tpu.memory_space<vmem>>, %arg9: memref<16x32xbf16, #tpu.memory_space<vmem>>, %arg10: memref<16x32xf32, #tpu.memory_space<vmem>>) attributes {dimension_semantics = [#tpu.dimension_semantics<parallel>, #tpu.dimension_semantics<parallel>, #tpu.dimension_semantics<arbitrary>], iteration_bounds = array<i64: 2, 1, 1>, scalar_prefetch = 0 : i64, scratch_operands = 1 : i64, tpu.core_type = #tpu.core_type<tc>, window_params = [{transform_indices = @transform_0, window_bounds = array<i64: 16, 64>}, {transform_indices = @transform_1, window_bounds = array<i64: 64, 32>}, {transform_indices = @transform_2, window_bounds = array<i64: 1, 32>}, {transform_indices = @transform_3, window_bounds = array<i64: 16, 32>}, {pipeline_mode = #tpu.pipeline_mode<synchronous>, transform_indices = @transform_4, window_bounds = array<i64: 1, 32>}, {pipeline_mode = #tpu.pipeline_mode<synchronous>, transform_indices = @transform_5, window_bounds = array<i64: 1, 32>}, {transform_indices = @transform_6, window_bounds = array<i64: 16, 32>}]} {
    %c0_i32 = arith.constant 0 : i32
    %0 = arith.cmpi eq, %arg2, %c0_i32 : i32
    %1 = arith.extui %0 : i1 to i32
    %c0_i32_0 = arith.constant 0 : i32
    %2 = arith.cmpi ne, %1, %c0_i32_0 : i32
    scf.if %2 {
      %cst_10 = arith.constant 0.000000e+00 : f32
      %12 = vector.broadcast %cst_10 : f32 to vector<16x32xf32>
      %c0_11 = arith.constant 0 : index
      %c0_12 = arith.constant 0 : index
      %13 = vector.load %arg10[%c0_11, %c0_12] : memref<16x32xf32, #tpu.memory_space<vmem>>, vector<16x32xf32>
      tpu.vector_store %arg10[%c0_11, %c0_12], %12 {strides = array<i32>} : memref<16x32xf32, #tpu.memory_space<vmem>>, vector<16x32xf32>,
    } else {
    }
    %c0 = arith.constant 0 : index
    %c0_1 = arith.constant 0 : index
    %3 = vector.load %arg3[%c0, %c0_1] : memref<16x64xbf16, #tpu.memory_space<vmem>>, vector<16x64xbf16>
    %c0_2 = arith.constant 0 : index
    %c0_3 = arith.constant 0 : index
    %4 = vector.load %arg10[%c0_2, %c0_3] : memref<16x32xf32, #tpu.memory_space<vmem>>, vector<16x32xf32>
    %c0_4 = arith.constant 0 : index
    %c0_5 = arith.constant 0 : index
    %5 = vector.load %arg4[%c0_4, %c0_5] : memref<64x32xbf16, #tpu.memory_space<vmem>>, vector<64x32xbf16>
    %cst = arith.constant dense<0.000000e+00> : vector<16x32xf32>
    %6 = tpu.matmul %3, %5, %cst {dimension_numbers = #tpu.dot_dimension_numbers<[1], [0], [0], [1], [0, 0, 1, 1], [], []>} : vector<16x64xbf16>, vector<64x32xbf16>, vector<16x32xf32> -> vector<16x32xf32>
    %7 = arith.addf %4, %6 : vector<16x32xf32>
    %c0_6 = arith.constant 0 : index
    %c0_7 = arith.constant 0 : index
    %8 = vector.load %arg10[%c0_6, %c0_7] : memref<16x32xf32, #tpu.memory_space<vmem>>, vector<16x32xf32>
    tpu.vector_store %arg10[%c0_6, %c0_7], %7 {strides = array<i32>} : memref<16x32xf32, #tpu.memory_space<vmem>>, vector<16x32xf32>,
    %c0_i32_8 = arith.constant 0 : i32
    %9 = arith.cmpi eq, %arg2, %c0_i32_8 : i32
    %10 = arith.extui %9 : i1 to i32
    %c0_i32_9 = arith.constant 0 : i32
    %11 = arith.cmpi ne, %10, %c0_i32_9 : i32
    scf.if %11 {
      %c0_10 = arith.constant 0 : index
      %c0_11 = arith.constant 0 : index
      %12 = vector.load %arg10[%c0_10, %c0_11] : memref<16x32xf32, #tpu.memory_space<vmem>>, vector<16x32xf32>
      %c0_12 = arith.constant 0 : index
      %c0_13 = arith.constant 0 : index
      %13 = vector.load %arg5[%c0_12, %c0_13] : memref<1x32xf32, #tpu.memory_space<vmem>>, vector<1x32xf32>
      %14 = vector.broadcast %13 : vector<1x32xf32> to vector<16x32xf32>
      %15 = arith.addf %12, %14 : vector<16x32xf32>
      %c0_14 = arith.constant 0 : index
      %c0_15 = arith.constant 0 : index
      %16 = vector.load %arg6[%c0_14, %c0_15] : memref<16x32xbf16, #tpu.memory_space<vmem>>, vector<16x32xbf16>
      %17 = arith.extf %16 : vector<16x32xbf16> to vector<16x32xf32>
      %cst_16 = arith.constant 5.000000e-01 : f32
      %18 = vector.broadcast %cst_16 : f32 to vector<16x32xf32>
      %19 = arith.mulf %18, %15 : vector<16x32xf32>
      %20 = arith.addf %17, %19 : vector<16x32xf32>
      %cst_17 = arith.constant dense<0.000000e+00> : vector<16xf32>
      %21 = vector.multi_reduction <add>, %20, %cst_17 [1] : vector<16x32xf32> to vector<16xf32>
      %22 = vector.shape_cast %21 : vector<16xf32> to vector<16x1xf32>
      %cst_18 = arith.constant 3.200000e+01 : f32
      %23 = vector.broadcast %cst_18 : f32 to vector<16x1xf32>
      %24 = arith.divf %22, %23 : vector<16x1xf32>
      %25 = vector.broadcast %24 : vector<16x1xf32> to vector<16x32xf32>
      %26 = arith.subf %20, %25 : vector<16x32xf32>
      %27 = arith.mulf %26, %26 : vector<16x32xf32>
      %cst_19 = arith.constant dense<0.000000e+00> : vector<16xf32>
      %28 = vector.multi_reduction <add>, %27, %cst_19 [1] : vector<16x32xf32> to vector<16xf32>
      %29 = vector.shape_cast %28 : vector<16xf32> to vector<16x1xf32>
      %cst_20 = arith.constant 3.200000e+01 : f32
      %30 = vector.broadcast %cst_20 : f32 to vector<16x1xf32>
      %31 = arith.divf %29, %30 : vector<16x1xf32>
      %32 = vector.broadcast %24 : vector<16x1xf32> to vector<16x32xf32>
      %33 = arith.subf %20, %32 : vector<16x32xf32>
      %cst_21 = arith.constant 9.99999974E-6 : f32
      %34 = vector.broadcast %cst_21 : f32 to vector<16x1xf32>
      %35 = arith.addf %31, %34 : vector<16x1xf32>
      %36 = math.rsqrt %35 : vector<16x1xf32>
      %37 = vector.broadcast %36 : vector<16x1xf32> to vector<16x32xf32>
      %38 = arith.mulf %33, %37 : vector<16x32xf32>
      %c0_22 = arith.constant 0 : index
      %c0_23 = arith.constant 0 : index
      %39 = vector.load %arg7[%c0_22, %c0_23] : memref<1x32xf32, #tpu.memory_space<vmem>>, vector<1x32xf32>
      %40 = vector.broadcast %39 : vector<1x32xf32> to vector<16x32xf32>
      %41 = arith.mulf %38, %40 : vector<16x32xf32>
      %c0_24 = arith.constant 0 : index
      %c0_25 = arith.constant 0 : index
      %42 = vector.load %arg8[%c0_24, %c0_25] : memref<1x32xf32, #tpu.memory_space<vmem>>, vector<1x32xf32>
      %43 = vector.broadcast %42 : vector<1x32xf32> to vector<16x32xf32>
      %44 = arith.addf %41, %43 : vector<16x32xf32>
      %45 = arith.truncf %44 : vector<16x32xf32> to vector<16x32xbf16>
      %c0_26 = arith.constant 0 : index
      %c0_27 = arith.constant 0 : index
      %46 = vector.load %arg9[%c0_26, %c0_27] : memref<16x32xbf16, #tpu.memory_space<vmem>>, vector<16x32xbf16>
      tpu.vector_store %arg9[%c0_26, %c0_27], %45 {strides = array<i32>} : memref<16x32xbf16, #tpu.memory_space<vmem>>, vector<16x32xbf16>,
    } else {
    }
    return
  }
  func.func @transform_0(%arg0: i32, %arg1: i32, %arg2: i32) -> (i32, i32) {
    %c0_i32 = arith.constant 0 : i32
    return %arg0, %arg2 : i32, i32
  }
  func.func @transform_1(%arg0: i32, %arg1: i32, %arg2: i32) -> (i32, i32) {
    %c0_i32 = arith.constant 0 : i32
    return %arg2, %arg1 : i32, i32
  }
  func.func @transform_2(%arg0: i32, %arg1: i32, %arg2: i32) -> (i32, i32) {
    %c0_i32 = arith.constant 0 : i32
    %c0_i32_0 = arith.constant 0 : i32
    return %c0_i32, %arg1 : i32, i32
  }
  func.func @transform_3(%arg0: i32, %arg1: i32, %arg2: i32) -> (i32, i32) {
    %c0_i32 = arith.constant 0 : i32
    return %arg0, %arg1 : i32, i32
  }
  func.func @transform_4(%arg0: i32, %arg1: i32, %arg2: i32) -> (i32, i32) {
    %c0_i32 = arith.constant 0 : i32
    %c0_i32_0 = arith.constant 0 : i32
    %c0_i32_1 = arith.constant 0 : i32
    return %c0_i32, %c0_i32_0 : i32, i32
  }
  func.func @transform_5(%arg0: i32, %arg1: i32, %arg2: i32) -> (i32, i32) {
    %c0_i32 = arith.constant 0 : i32
    %c0_i32_0 = arith.constant 0 : i32
    %c0_i32_1 = arith.constant 0 : i32
    return %c0_i32, %c0_i32_0 : i32, i32
  }
  func.func @transform_6(%arg0: i32, %arg1: i32, %arg2: i32) -> (i32, i32) {
    %c0_i32 = arith.constant 0 : i32
    return %arg0, %arg1 : i32, i32
  }
}

module attributes {stable_mosaic.version = 11 : i64} {
  func.func @kernel(%arg0: i32, %arg1: i32, %arg2: i32, %arg3: memref<16x32xbf16, #tpu.memory_space<vmem>>, %arg4: memref<32x128xbf16, #tpu.memory_space<vmem>>, %arg5: memref<1x128xf32, #tpu.memory_space<vmem>>, %arg6: memref<16x128xf32, #tpu.memory_space<vmem>>, %arg7: memref<16x128xf32, #tpu.memory_space<vmem>>) attributes {dimension_semantics = [#tpu.dimension_semantics<parallel>, #tpu.dimension_semantics<parallel>, #tpu.dimension_semantics<arbitrary>], iteration_bounds = array<i64: 2, 1, 1>, scalar_prefetch = 0 : i64, scratch_operands = 1 : i64, tpu.core_type = #tpu.core_type<tc>, window_params = [{transform_indices = @transform_0, window_bounds = array<i64: 16, 32>}, {transform_indices = @transform_1, window_bounds = array<i64: 32, 128>}, {transform_indices = @transform_2, window_bounds = array<i64: 1, 128>}, {transform_indices = @transform_3, window_bounds = array<i64: 16, 128>}]} {
    %c0_i32 = arith.constant 0 : i32
    %0 = arith.cmpi eq, %arg2, %c0_i32 : i32
    %1 = arith.extui %0 : i1 to i32
    %c0_i32_0 = arith.constant 0 : i32
    %2 = arith.cmpi ne, %1, %c0_i32_0 : i32
    scf.if %2 {
      %cst_10 = arith.constant 0.000000e+00 : f32
      %12 = vector.broadcast %cst_10 : f32 to vector<16x128xf32>
      %c0_11 = arith.constant 0 : index
      %c0_12 = arith.constant 0 : index
      %13 = vector.load %arg7[%c0_11, %c0_12] : memref<16x128xf32, #tpu.memory_space<vmem>>, vector<16x128xf32>
      tpu.vector_store %arg7[%c0_11, %c0_12], %12 {strides = array<i32>} : memref<16x128xf32, #tpu.memory_space<vmem>>, vector<16x128xf32>,
    } else {
    }
    %c0 = arith.constant 0 : index
    %c0_1 = arith.constant 0 : index
    %3 = vector.load %arg3[%c0, %c0_1] : memref<16x32xbf16, #tpu.memory_space<vmem>>, vector<16x32xbf16>
    %c0_2 = arith.constant 0 : index
    %c0_3 = arith.constant 0 : index
    %4 = vector.load %arg7[%c0_2, %c0_3] : memref<16x128xf32, #tpu.memory_space<vmem>>, vector<16x128xf32>
    %c0_4 = arith.constant 0 : index
    %c0_5 = arith.constant 0 : index
    %5 = vector.load %arg4[%c0_4, %c0_5] : memref<32x128xbf16, #tpu.memory_space<vmem>>, vector<32x128xbf16>
    %cst = arith.constant dense<0.000000e+00> : vector<16x128xf32>
    %6 = tpu.matmul %3, %5, %cst {dimension_numbers = #tpu.dot_dimension_numbers<[1], [0], [0], [1], [0, 0, 1, 1], [], []>} : vector<16x32xbf16>, vector<32x128xbf16>, vector<16x128xf32> -> vector<16x128xf32>
    %7 = arith.addf %4, %6 : vector<16x128xf32>
    %c0_6 = arith.constant 0 : index
    %c0_7 = arith.constant 0 : index
    %8 = vector.load %arg7[%c0_6, %c0_7] : memref<16x128xf32, #tpu.memory_space<vmem>>, vector<16x128xf32>
    tpu.vector_store %arg7[%c0_6, %c0_7], %7 {strides = array<i32>} : memref<16x128xf32, #tpu.memory_space<vmem>>, vector<16x128xf32>,
    %c0_i32_8 = arith.constant 0 : i32
    %9 = arith.cmpi eq, %arg2, %c0_i32_8 : i32
    %10 = arith.extui %9 : i1 to i32
    %c0_i32_9 = arith.constant 0 : i32
    %11 = arith.cmpi ne, %10, %c0_i32_9 : i32
    scf.if %11 {
      %c0_10 = arith.constant 0 : index
      %c0_11 = arith.constant 0 : index
      %12 = vector.load %arg7[%c0_10, %c0_11] : memref<16x128xf32, #tpu.memory_space<vmem>>, vector<16x128xf32>
      %c0_12 = arith.constant 0 : index
      %c0_13 = arith.constant 0 : index
      %13 = vector.load %arg5[%c0_12, %c0_13] : memref<1x128xf32, #tpu.memory_space<vmem>>, vector<1x128xf32>
      %14 = vector.broadcast %13 : vector<1x128xf32> to vector<16x128xf32>
      %15 = arith.addf %12, %14 : vector<16x128xf32>
      %c0_14 = arith.constant 0 : index
      %c0_15 = arith.constant 0 : index
      %16 = vector.load %arg6[%c0_14, %c0_15] : memref<16x128xf32, #tpu.memory_space<vmem>>, vector<16x128xf32>
      tpu.vector_store %arg6[%c0_14, %c0_15], %15 {strides = array<i32>} : memref<16x128xf32, #tpu.memory_space<vmem>>, vector<16x128xf32>,
    } else {
    }
    return
  }
  func.func @transform_0(%arg0: i32, %arg1: i32, %arg2: i32) -> (i32, i32) {
    %c0_i32 = arith.constant 0 : i32
    return %arg0, %arg2 : i32, i32
  }
  func.func @transform_1(%arg0: i32, %arg1: i32, %arg2: i32) -> (i32, i32) {
    %c0_i32 = arith.constant 0 : i32
    return %arg2, %arg1 : i32, i32
  }
  func.func @transform_2(%arg0: i32, %arg1: i32, %arg2: i32) -> (i32, i32) {
    %c0_i32 = arith.constant 0 : i32
    %c0_i32_0 = arith.constant 0 : i32
    return %c0_i32, %arg1 : i32, i32
  }
  func.func @transform_3(%arg0: i32, %arg1: i32, %arg2: i32) -> (i32, i32) {
    %c0_i32 = arith.constant 0 : i32
    return %arg0, %arg1 : i32, i32
  }
}

</mosaic_0001>

<bundles_post_ra>
// kernel: _lambda_.28
= control target key start
LH: loop header
LB: loop body
LE: loop exit
PB: predicated region body
PF: predicated region fallthrough
CT: control target
= control target key end

     0   :  { %s1217_s12 = smov 0   ;;  %s1219_s13 = smov 0   ;;  %s1334_s0 = inlined_call_operand.vmem [shape: bf16[512,9], index: 0, kind: input, shape index: {}]   ;;  %s1335_s1 = inlined_call_operand.vmem [shape: bf16[9,128], index: 1, kind: input, shape index: {}]   ;;  %s1336_s2 = inlined_call_operand.vmem [shape: f32[1,128], index: 2, kind: input, shape index: {}]   ;;  %s1337_s3 = inlined_call_operand.vmem [shape: bf16[512,128], index: 3, kind: output, shape index: {}]  }
   0x1   :  { %s1221_s14 = smov 0  }
   0x2 LB: > { %s32_s15 = sadd.s32 1, %s1190_s13  ;;  %p940_p0 = scmp.ge.s32.totalorder %s1194_s14, 1  ;;  %s1194_s14 = sphi %s1221_s14, %s13_s14   ;;  %s1190_s13 = sphi %s1219_s13, %s1339_s13   ;;  %s1186_s12 = sphi %s1217_s12, %s1338_s12  }
   0x3   : > { %p34_p1 = scmp.ge.s32.totalorder %s32_s15, 2  ;;  %p188_p2 = scmp.lt.s32.totalorder %s1194_s14, 3 }
   0x5   : > { %s1341_s15 = smov (%p34_p1, %s32_s15), 0  ;;  %p189_p3 = pnand %p940_p0, %p188_p2 }
   0x6   : > { %s941_s20 = sshll.u32 (!%p189_p3), %s1186_s12, 5 }
   0x7   : > { %192 = sbr.rel (%p189_p3) target bundleno = 218 (0xda), region = 32  ;;  %p230_p4 = scmp.lt.s32.totalorder (!%p189_p3), %s941_s20, 63 }
   0xc   : > { %v1011_v0 = vld [vmem:[%s1335_s1] sm:$0xf]  ;;  %v1047_v1 = vld [vmem:[%s1335_s1] sm:$0x10]  ;;  %vm496_vm0 = vcmask 1043456   ;;  %vm497_vm1 = vcmask 1044480  }
   0xd   : > { %v1012_v2 = vor.u32 %v1047_v1, %v1011_v0  ;;  %v1196_v3 = vmov 65535   ;;  %s1343_s20 = smov (!%p230_p4, %s941_s20), 63  ;;  %vm447_vm2 = vcmask 72704   ;;  %v1268_v25 = vld [vmem:[%s1336_s2] ss:$0 sm:$0xff] }
   0xe   : > { %v498_v4 = vsel %vm496_vm0, 4294967295, %v1196_v3  ;;  %s942_s21 = sshll.u32 %s1343_s20, 2 }
   0xf   : > { %v499_v5 = vsel %vm497_vm1, %v498_v4, 0  ;;  %s236_s24 = scalar_lea.vmem %s1334_s0, %s942_s21  ;;  %s1279_s29 = scalar_lea.vmem %s1337_s3, %s942_s21 }
  0x10   : > { %v501_v6 = vand.u32 %v1012_v2, %v499_v5  ;;  %v1031_v7 = vld [vmem:[%s236_s24] sm:$0xff]  ;;  %v1032_v11 = vld [vmem:[%s236_s24 + $0x8] sm:$0xff]  ;;  %v1033_v15 = vld [vmem:[%s236_s24 + $0x10] sm:$0xff] }
  0x11   : > { %v1035_v8 = vld [vmem:[%s236_s24 + $0x20] sm:$0xff]  ;;  %v1036_v12 = vld [vmem:[%s236_s24 + $0x28] sm:$0xff]  ;;  %v1037_v16 = vld [vmem:[%s236_s24 + $0x30] sm:$0xff] }
  0x12   : > { %510 = vmatpush.bf16.msra.mxu0 %v501_v6  ;;  %1143 = vmatpush.bf16.msra.mxu1 %v501_v6  ;;  %v1039_v9 = vld [vmem:[%s236_s24 + $0x40] sm:$0xff]  ;;  %v1040_v13 = vld [vmem:[%s236_s24 + $0x48] sm:$0xff]  ;;  %v1041_v17 = vld [vmem:[%s236_s24 + $0x50] sm:$0xff] }
  0x13   : > { %1144 = vmatpush.bf16.msra.mxu2 %v501_v6  ;;  %1145 = vmatpush.bf16.msra.mxu3 %v501_v6  ;;  %v1043_v10 = vld [vmem:[%s236_s24 + $0x60] sm:$0xff]  ;;  %v1044_v14 = vld [vmem:[%s236_s24 + $0x68] sm:$0xff]  ;;  %v1045_v18 = vld [vmem:[%s236_s24 + $0x70] sm:$0xff] }
  0x14   : > { %v1034_v19 = vld [vmem:[%s236_s24 + $0x18] sm:$0xff] }
  0x15   : > { %1013 = vmatmul.msk.bf16.vlgmr.msra.gmra.mxu0 %vm447_vm2, %v1031_v7  ;;  %1017 = vmatmul.msk.bf16.vlgmr.msra.gmra.mxu1 %vm447_vm2, %v1035_v8  ;;  %v1038_v20 = vld [vmem:[%s236_s24 + $0x38] sm:$0xff] }
  0x16   : > { %1021 = vmatmul.msk.bf16.vlgmr.msra.gmra.mxu2 %vm447_vm2, %v1039_v9  ;;  %1025 = vmatmul.msk.bf16.vlgmr.msra.gmra.mxu3 %vm447_vm2, %v1043_v10  ;;  %v1042_v21 = vld [vmem:[%s236_s24 + $0x58] sm:$0xff] }
  0x17   : > { %v1046_v22 = vld [vmem:[%s236_s24 + $0x78] sm:$0xff] }
  0x25   : > { %1014 = vmatmul.msk.bf16.gmra.mxu0 %vm447_vm2, %v1032_v11  ;;  %1018 = vmatmul.msk.bf16.gmra.mxu1 %vm447_vm2, %v1036_v12 }
  0x26   : > { %1022 = vmatmul.msk.bf16.gmra.mxu2 %vm447_vm2, %v1040_v13  ;;  %1026 = vmatmul.msk.bf16.gmra.mxu3 %vm447_vm2, %v1044_v14 }
  0x35   : > { %1015 = vmatmul.msk.bf16.gmra.mxu0 %vm447_vm2, %v1033_v15  ;;  %1019 = vmatmul.msk.bf16.gmra.mxu1 %vm447_vm2, %v1037_v16 }
  0x36   : > { %1023 = vmatmul.msk.bf16.gmra.mxu2 %vm447_vm2, %v1041_v17  ;;  %1027 = vmatmul.msk.bf16.gmra.mxu3 %vm447_vm2, %v1045_v18 }
  0x45   : > { %1016 = vmatmul.msk.bf16.gmra.mxu0 %vm447_vm2, %v1034_v19  ;;  %1020 = vmatmul.msk.bf16.gmra.mxu1 %vm447_vm2, %v1038_v20 }
  0x46   : > { %1024 = vmatmul.msk.bf16.gmra.mxu2 %vm447_vm2, %v1042_v21  ;;  %1028 = vmatmul.msk.bf16.gmra.mxu3 %vm447_vm2, %v1046_v22 }
  0x92   : > { %v512_v23 = vpop.f32.mrf.mxu0  ;;  %v532_v24 = vpop.f32.mrf.mxu1 }
  0x93   : > { %v695_v26 = vadd.f32 %v1268_v25, %v512_v23  ;;  %v703_v27 = vadd.f32 %v1268_v25, %v532_v24 }
  0x95   : > { %v727_v34 = vmax.f32 %v695_v26, 0.0  ;;  %v735_v35 = vmax.f32 %v703_v27, 0.0 }
  0x99   : > { %v552_v28 = vpop.f32.mrf.mxu2  ;;  %v572_v29 = vpop.f32.mrf.mxu3 }
  0x9a   : > { %v514_v30 = vpop.f32.mrf.mxu0  ;;  %v534_v31 = vpop.f32.mrf.mxu1  ;;  %v711_v40 = vadd.f32 %v1268_v25, %v552_v28  ;;  %v719_v41 = vadd.f32 %v1268_v25, %v572_v29 }
  0x9b   : > { %v696_v32 = vadd.f32 %v1268_v25, %v514_v30  ;;  %v704_v33 = vadd.f32 %v1268_v25, %v534_v31 }
  0x9c   : > { %v743_v48 = vmax.f32 %v711_v40, 0.0  ;;  %v751_v49 = vmax.f32 %v719_v41, 0.0 }
  0x9d   : > { %v728_v36 = vmax.f32 %v696_v32, 0.0  ;;  %v736_v37 = vmax.f32 %v704_v33, 0.0 }
  0x9f   : > { %v1051_v38 = vpack.c.bf16 %v728_v36, %v727_v34  ;;  %v1071_v39 = vpack.c.bf16 %v736_v37, %v735_v35 }
  0xa1   : > { %1052 = vst [vmem:[%s1279_s29] sm:$0xff] %v1051_v38   ;;  %v554_v42 = vpop.f32.mrf.mxu2  ;;  %v574_v43 = vpop.f32.mrf.mxu3 }
  0xa2   : > { %1131 = vst [vmem:[%s1279_s29 + $0x20] sm:$0xff] %v1071_v39   ;;  %v712_v44 = vadd.f32 %v1268_v25, %v554_v42  ;;  %v720_v45 = vadd.f32 %v1268_v25, %v574_v43  ;;  %v517_v46 = vpop.f32.mrf.mxu0  ;;  %v537_v47 = vpop.f32.mrf.mxu1 }
  0xa3   : > { %v697_v54 = vadd.f32 %v1268_v25, %v517_v46  ;;  %v705_v55 = vadd.f32 %v1268_v25, %v537_v47 }
  0xa4   : > { %v744_v50 = vmax.f32 %v712_v44, 0.0  ;;  %v752_v51 = vmax.f32 %v720_v45, 0.0 }
  0xa5   : > { %v729_v62 = vmax.f32 %v697_v54, 0.0  ;;  %v737_v63 = vmax.f32 %v705_v55, 0.0 }
  0xa6   : > { %v1091_v52 = vpack.c.bf16 %v744_v50, %v743_v48  ;;  %v1111_v53 = vpack.c.bf16 %v752_v51, %v751_v49 }
  0xa8   : > { %1135 = vst [vmem:[%s1279_s29 + $0x40] sm:$0xff] %v1091_v52  }
  0xa9   : > { %1139 = vst [vmem:[%s1279_s29 + $0x60] sm:$0xff] %v1111_v53   ;;  %v557_v56 = vpop.f32.mrf.mxu2  ;;  %v577_v57 = vpop.f32.mrf.mxu3 }
  0xaa   : > { %v519_v58 = vpop.f32.mrf.mxu0  ;;  %v539_v59 = vpop.f32.mrf.mxu1  ;;  %v713_v4 = vadd.f32 %v1268_v25, %v557_v56  ;;  %v721_v5 = vadd.f32 %v1268_v25, %v577_v57 }
  0xab   : > { %v698_v60 = vadd.f32 %v1268_v25, %v519_v58  ;;  %v706_v61 = vadd.f32 %v1268_v25, %v539_v59 }
  0xac   : > { %v745_v12 = vmax.f32 %v713_v4, 0.0  ;;  %v753_v13 = vmax.f32 %v721_v5, 0.0 }
  0xad   : > { %v730_v0 = vmax.f32 %v698_v60, 0.0  ;;  %v738_v1 = vmax.f32 %v706_v61, 0.0 }
  0xaf   : > { %v1056_v2 = vpack.c.bf16 %v730_v0, %v729_v62  ;;  %v1076_v3 = vpack.c.bf16 %v738_v1, %v737_v63 }
  0xb1   : > { %1128 = vst [vmem:[%s1279_s29 + $0x8] sm:$0xff] %v1056_v2   ;;  %v559_v6 = vpop.f32.mrf.mxu2  ;;  %v579_v7 = vpop.f32.mrf.mxu3 }
  0xb2   : > { %1132 = vst [vmem:[%s1279_s29 + $0x28] sm:$0xff] %v1076_v3   ;;  %v714_v8 = vadd.f32 %v1268_v25, %v559_v6  ;;  %v722_v9 = vadd.f32 %v1268_v25, %v579_v7  ;;  %v522_v10 = vpop.f32.mrf.mxu0  ;;  %v542_v11 = vpop.f32.mrf.mxu1 }
  0xb3   : > { %v699_v18 = vadd.f32 %v1268_v25, %v522_v10  ;;  %v707_v19 = vadd.f32 %v1268_v25, %v542_v11 }
  0xb4   : > { %v746_v14 = vmax.f32 %v714_v8, 0.0  ;;  %v754_v15 = vmax.f32 %v722_v9, 0.0 }
  0xb5   : > { %v731_v27 = vmax.f32 %v699_v18, 0.0  ;;  %v739_v28 = vmax.f32 %v707_v19, 0.0 }
  0xb6   : > { %v1096_v16 = vpack.c.bf16 %v746_v14, %v745_v12  ;;  %v1116_v17 = vpack.c.bf16 %v754_v15, %v753_v13 }
  0xb8   : > { %1136 = vst [vmem:[%s1279_s29 + $0x48] sm:$0xff] %v1096_v16  }
  0xb9   : > { %1140 = vst [vmem:[%s1279_s29 + $0x68] sm:$0xff] %v1116_v17   ;;  %v562_v20 = vpop.f32.mrf.mxu2  ;;  %v582_v21 = vpop.f32.mrf.mxu3 }
  0xba   : > { %v524_v22 = vpop.f32.mrf.mxu0  ;;  %v544_v23 = vpop.f32.mrf.mxu1  ;;  %v715_v33 = vadd.f32 %v1268_v25, %v562_v20  ;;  %v723_v34 = vadd.f32 %v1268_v25, %v582_v21 }
  0xbb   : > { %v700_v24 = vadd.f32 %v1268_v25, %v524_v22  ;;  %v708_v26 = vadd.f32 %v1268_v25, %v544_v23 }
  0xbc   : > { %v747_v41 = vmax.f32 %v715_v33, 0.0  ;;  %v755_v42 = vmax.f32 %v723_v34, 0.0 }
  0xbd   : > { %v732_v29 = vmax.f32 %v700_v24, 0.0  ;;  %v740_v30 = vmax.f32 %v708_v26, 0.0 }
  0xbf   : > { %v1061_v31 = vpack.c.bf16 %v732_v29, %v731_v27  ;;  %v1081_v32 = vpack.c.bf16 %v740_v30, %v739_v28 }
  0xc1   : > { %1129 = vst [vmem:[%s1279_s29 + $0x10] sm:$0xff] %v1061_v31   ;;  %v564_v35 = vpop.f32.mrf.mxu2  ;;  %v584_v36 = vpop.f32.mrf.mxu3 }
  0xc2   : > { %1133 = vst [vmem:[%s1279_s29 + $0x30] sm:$0xff] %v1081_v32   ;;  %v716_v37 = vadd.f32 %v1268_v25, %v564_v35  ;;  %v724_v38 = vadd.f32 %v1268_v25, %v584_v36  ;;  %v527_v39 = vpop.f32.mrf.mxu0  ;;  %v547_v40 = vpop.f32.mrf.mxu1 }
  0xc3   : > { %v701_v47 = vadd.f32 %v1268_v25, %v527_v39  ;;  %v709_v48 = vadd.f32 %v1268_v25, %v547_v40 }
  0xc4   : > { %v748_v43 = vmax.f32 %v716_v37, 0.0  ;;  %v756_v44 = vmax.f32 %v724_v38, 0.0 }
  0xc5   : > { %v733_v55 = vmax.f32 %v701_v47, 0.0  ;;  %v741_v56 = vmax.f32 %v709_v48, 0.0 }
  0xc6   : > { %v1101_v45 = vpack.c.bf16 %v748_v43, %v747_v41  ;;  %v1121_v46 = vpack.c.bf16 %v756_v44, %v755_v42 }
  0xc8   : > { %1137 = vst [vmem:[%s1279_s29 + $0x50] sm:$0xff] %v1101_v45  }
  0xc9   : > { %1141 = vst [vmem:[%s1279_s29 + $0x70] sm:$0xff] %v1121_v46   ;;  %v567_v49 = vpop.f32.mrf.mxu2  ;;  %v587_v50 = vpop.f32.mrf.mxu3 }
  0xca   : > { %v529_v51 = vpop.f32.mrf.mxu0  ;;  %v549_v52 = vpop.f32.mrf.mxu1  ;;  %v717_v61 = vadd.f32 %v1268_v25, %v567_v49  ;;  %v725_v62 = vadd.f32 %v1268_v25, %v587_v50 }
  0xcb   : > { %v702_v53 = vadd.f32 %v1268_v25, %v529_v51  ;;  %v710_v54 = vadd.f32 %v1268_v25, %v549_v52 }
  0xcc   : > { %v749_v3 = vmax.f32 %v717_v61, 0.0  ;;  %v757_v4 = vmax.f32 %v725_v62, 0.0 }
  0xcd   : > { %v734_v57 = vmax.f32 %v702_v53, 0.0  ;;  %v742_v58 = vmax.f32 %v710_v54, 0.0 }
  0xcf   : > { %v1066_v59 = vpack.c.bf16 %v734_v57, %v733_v55  ;;  %v1086_v60 = vpack.c.bf16 %v742_v58, %v741_v56 }
  0xd1   : > { %1130 = vst [vmem:[%s1279_s29 + $0x18] sm:$0xff] %v1066_v59   ;;  %v569_v63 = vpop.f32.mrf.mxu2  ;;  %v589_v0 = vpop.f32.mrf.mxu3 }
  0xd2   : > { %1134 = vst [vmem:[%s1279_s29 + $0x38] sm:$0xff] %v1086_v60   ;;  %v718_v1 = vadd.f32 %v1268_v25, %v569_v63  ;;  %v726_v2 = vadd.f32 %v1268_v25, %v589_v0 }
  0xd4   : > { %v750_v5 = vmax.f32 %v718_v1, 0.0  ;;  %v758_v6 = vmax.f32 %v726_v2, 0.0 }
  0xd6   : > { %v1106_v7 = vpack.c.bf16 %v750_v5, %v749_v3  ;;  %v1126_v8 = vpack.c.bf16 %v758_v6, %v757_v4 }
  0xd8   : > { %1138 = vst [vmem:[%s1279_s29 + $0x58] sm:$0xff] %v1106_v7  }
  0xd9   : > { %1142 = vst [vmem:[%s1279_s29 + $0x78] sm:$0xff] %v1126_v8  }
  0xda PF: > { %s13_s14 = sadd.s32 1, %s1194_s14   ;;  %s1338_s12 = smov %s1190_s13 }
  0xdb   : > { %p10_p5 = scmp.ge.s32.totalorder %s13_s14, 4   ;;  %s1339_s13 = smov %s1341_s15 }
  0xdd   :  { %12 = sbr.rel (!%p10_p5) target bundleno = 2 (0x2), region = 76 }

// kernel: _lambda_.29
= control target key start
LH: loop header
LB: loop body
LE: loop exit
PB: predicated region body
PF: predicated region fallthrough
CT: control target
= control target key end

     0   :  { %s676_s12 = smov 0   ;;  %s678_s13 = smov 0   ;;  %s734_s0 = inlined_call_operand.vmem [shape: bf16[96,72], index: 0, kind: input, shape index: {}]   ;;  %s735_s1 = inlined_call_operand.vmem [shape: bf16[72,128], index: 1, kind: input, shape index: {}]   ;;  %s736_s2 = inlined_call_operand.vmem [shape: f32[1,128], index: 2, kind: input, shape index: {}]   ;;  %s737_s3 = inlined_call_operand.vmem [shape: bf16[96,128], index: 3, kind: output, shape index: {}]  }
   0x1   :  { %s680_s14 = smov 0  }
   0x2 LB: > { %s32_s15 = sadd.s32 1, %s650_s13  ;;  %p537_p0 = scmp.ge.s32.totalorder %s654_s14, 1  ;;  %s654_s14 = sphi %s680_s14, %s13_s14   ;;  %s650_s13 = sphi %s678_s13, %s739_s13   ;;  %s646_s12 = sphi %s676_s12, %s738_s12  }
   0x3   : > { %p34_p1 = scmp.ge.s32.totalorder %s32_s15, 2  ;;  %p188_p2 = scmp.lt.s32.totalorder %s654_s14, 3 }
   0x5   : > { %s741_s15 = smov (%p34_p1, %s32_s15), 0  ;;  %p189_p3 = pnand %p537_p0, %p188_p2 }
   0x6   : > { %s229_s18 = smul.u32 (!%p189_p3), 6, %s646_s12 }
   0x7   : > { %192 = sbr.rel (%p189_p3) target bundleno = 185 (0xb9), region = 32 }
   0x8   : > { %p230_p4 = scmp.lt.s32.totalorder (!%p189_p3), %s229_s18, 11 }
   0xc   : > { %v290_v0 = vld [vmem:[%s735_s1 + $0x20] sm:$0xf]  ;;  %vm343_vm0 = vcmask 1043456   ;;  %v579_v4 = vld [vmem:[%s735_s1 + $0x18] sm:$0xff]  ;;  %v578_v5 = vld [vmem:[%s735_s1 + $0x10] sm:$0xff]  ;;  %s743_s18 = smov (!%p230_p4, %s229_s18), 11 }
   0xd   : > { %v323_v1 = vunpack.c.l.b16 %v290_v0  ;;  %v577_v6 = vld [vmem:[%s735_s1 + $0x8] sm:$0xff]  ;;  %s538_s25 = sshll.u32 %s743_s18, 2  ;;  %v576_v7 = vld [vmem:[%s735_s1] sm:$0xff]  ;;  %vm333_vm1 = vcmask 588800  }
   0xe   : > { %s236_s30 = scalar_lea.vmem %s734_s0, %s538_s25  ;;  %v631_v13 = vld [vmem:[%s736_s2] ss:$0 sm:$0xff]  ;;  %s257_s8 = scalar_lea.vmem %s737_s3, %s538_s25 }
   0xf   : > { %v328_v2 = vpack.c.b16 %v323_v1, %v323_v1  ;;  %v573_v8 = vld [vmem:[%s236_s30] sm:$0xff]  ;;  %v574_v9 = vld [vmem:[%s236_s30 + $0x8] sm:$0xff]  ;;  %v575_v10 = vld [vmem:[%s236_s30 + $0x10] sm:$0xff] }
  0x11   : > { %v345_v3 = vsel %vm343_vm0, %v328_v2, 0 }
  0x12   : > { %350 = vmatpush.bf16.msra.mxu0 %v345_v3  ;;  %597 = vmatpush.bf16.msra.mxu1 %v345_v3 }
  0x13   : > { %598 = vmatpush.bf16.msra.mxu2 %v345_v3 }
  0x16   : > { %351 = vmatpush.bf16.msra.mxu0 %v579_v4  ;;  %599 = vmatpush.bf16.msra.mxu1 %v579_v4 }
  0x17   : > { %600 = vmatpush.bf16.msra.mxu2 %v579_v4 }
  0x1a   : > { %352 = vmatpush.bf16.msra.mxu0 %v578_v5  ;;  %601 = vmatpush.bf16.msra.mxu1 %v578_v5 }
  0x1b   : > { %602 = vmatpush.bf16.msra.mxu2 %v578_v5 }
  0x1e   : > { %353 = vmatpush.bf16.msra.mxu0 %v577_v6  ;;  %603 = vmatpush.bf16.msra.mxu1 %v577_v6 }
  0x1f   : > { %604 = vmatpush.bf16.msra.mxu2 %v577_v6 }
  0x22   : > { %354 = vmatpush.bf16.msra.mxu0 %v576_v7  ;;  %605 = vmatpush.bf16.msra.mxu1 %v576_v7 }
  0x23   : > { %606 = vmatpush.bf16.msra.mxu2 %v576_v7 }
  0x25   : > { %568 = vmatmul.msk.bf16.vlgmr.msra.gmra.mxu0 %vm333_vm1, %v573_v8  ;;  %569 = vmatmul.msk.bf16.vlgmr.msra.gmra.mxu1 %vm333_vm1, %v574_v9 }
  0x26   : > { %570 = vmatmul.msk.bf16.vlgmr.msra.gmra.mxu2 %vm333_vm1, %v575_v10 }
  0xa2   : > { %v356_v11 = vpop.f32.mrf.mxu0  ;;  %v361_v12 = vpop.f32.mrf.mxu1 }
  0xa3   : > { %v396_v14 = vadd.f32 %v631_v13, %v356_v11  ;;  %v398_v15 = vadd.f32 %v631_v13, %v361_v12 }
  0xa5   : > { %v402_v21 = vmax.f32 %v396_v14, 0.0  ;;  %v404_v22 = vmax.f32 %v398_v15, 0.0 }
  0xa9   : > { %v366_v16 = vpop.f32.mrf.mxu2 }
  0xaa   : > { %v358_v17 = vpop.f32.mrf.mxu0  ;;  %v363_v18 = vpop.f32.mrf.mxu1  ;;  %v400_v27 = vadd.f32 %v631_v13, %v366_v16 }
  0xab   : > { %v397_v19 = vadd.f32 %v631_v13, %v358_v17  ;;  %v399_v20 = vadd.f32 %v631_v13, %v363_v18 }
  0xac   : > { %v406_v30 = vmax.f32 %v400_v27, 0.0 }
  0xad   : > { %v403_v23 = vmax.f32 %v397_v19, 0.0  ;;  %v405_v24 = vmax.f32 %v399_v20, 0.0 }
  0xaf   : > { %v583_v25 = vpack.c.bf16 %v403_v23, %v402_v21  ;;  %v588_v26 = vpack.c.bf16 %v405_v24, %v404_v22 }
  0xb1   : > { %584 = vst [vmem:[%s257_s8] sm:$0xff] %v583_v25   ;;  %v368_v28 = vpop.f32.mrf.mxu2 }
  0xb2   : > { %595 = vst [vmem:[%s257_s8 + $0x8] sm:$0xff] %v588_v26   ;;  %v401_v29 = vadd.f32 %v631_v13, %v368_v28 }
  0xb4   : > { %v407_v31 = vmax.f32 %v401_v29, 0.0 }
  0xb6   : > { %v593_v32 = vpack.c.bf16 %v407_v31, %v406_v30 }
  0xb8   : > { %596 = vst [vmem:[%s257_s8 + $0x10] sm:$0xff] %v593_v32  }
  0xb9 PF: > { %s13_s14 = sadd.s32 1, %s654_s14   ;;  %s738_s12 = smov %s650_s13 }
  0xba   : > { %p10_p5 = scmp.ge.s32.totalorder %s13_s14, 4   ;;  %s739_s13 = smov %s741_s15 }
  0xbc   :  { %12 = sbr.rel (!%p10_p5) target bundleno = 2 (0x2), region = 76 }

// kernel: _lambda_.30
= control target key start
LH: loop header
LB: loop body
LE: loop exit
PB: predicated region body
PF: predicated region fallthrough
CT: control target
= control target key end

     0   :  { %s537_s12 = smov 0   ;;  %s539_s13 = smov 0   ;;  %s579_s0 = inlined_call_operand.vmem [shape: bf16[32,24], index: 0, kind: input, shape index: {}]   ;;  %s580_s1 = inlined_call_operand.vmem [shape: bf16[24,128], index: 1, kind: input, shape index: {}]   ;;  %s581_s2 = inlined_call_operand.vmem [shape: f32[1,128], index: 2, kind: input, shape index: {}]   ;;  %s582_s3 = inlined_call_operand.vmem [shape: bf16[32,128], index: 3, kind: output, shape index: {}]  }
   0x1   :  { %s541_s14 = smov 0  }
   0x2 LB: > { %s32_s15 = sadd.s32 1, %s511_s13  ;;  %p445_p0 = scmp.ge.s32.totalorder %s515_s14, 1  ;;  %s515_s14 = sphi %s541_s14, %s13_s14   ;;  %s511_s13 = sphi %s539_s13, %s584_s13   ;;  %s507_s12 = sphi %s537_s12, %s583_s12  }
   0x3   : > { %p34_p1 = scmp.ge.s32.totalorder %s32_s15, 2  ;;  %p188_p2 = scmp.lt.s32.totalorder %s515_s14, 3 }
   0x5   : > { %s586_s15 = smov (%p34_p1, %s32_s15), 0  ;;  %p189_p3 = pnand %p445_p0, %p188_p2 }
   0x6   : > { %s446_s18 = sshll.u32 (!%p189_p3), %s507_s12, 1 }
   0x7   : > { %192 = sbr.rel (%p189_p3) target bundleno = 164 (0xa4), region = 32  ;;  %p230_p4 = scmp.lt.s32.totalorder (!%p189_p3), %s446_s18, 3 }
   0xc   : > { %v272_v0 = vld [vmem:[%s580_s1 + $0x8] sm:$0xf]  ;;  %vm291_vm0 = vcmask 1043456   ;;  %s588_s18 = smov (!%p230_p4, %s446_s18), 3  ;;  %v462_v4 = vld [vmem:[%s580_s1] sm:$0xff]  ;;  %vm287_vm1 = vcmask 195584  }
   0xd   : > { %v283_v1 = vunpack.c.l.b16 %v272_v0  ;;  %s447_s19 = sshll.u32 %s588_s18, 2  ;;  %v492_v7 = vld [vmem:[%s581_s2] ss:$0 sm:$0xff] }
   0xe   : > { %s236_s24 = scalar_lea.vmem %s579_s0, %s447_s19  ;;  %s257_s29 = scalar_lea.vmem %s582_s3, %s447_s19 }
   0xf   : > { %v285_v2 = vpack.c.b16 %v283_v1, %v283_v1  ;;  %v461_v5 = vld [vmem:[%s236_s24] sm:$0xff] }
  0x11   : > { %v293_v3 = vsel %vm291_vm0, %v285_v2, 0 }
  0x12   : > { %301 = vmatpush.bf16.msra.mxu0 %v293_v3 }
  0x16   : > { %302 = vmatpush.bf16.msra.mxu0 %v462_v4 }
  0x19   : > { %458 = vmatmul.msk.bf16.vlgmr.msra.gmra.mxu0 %vm287_vm1, %v461_v5 }
  0x96   : > { %v304_v6 = vpop.f32.mrf.mxu0 }
  0x97   : > { %v322_v9 = vadd.f32 %v492_v7, %v304_v6 }
  0x9e   : > { %v306_v8 = vpop.f32.mrf.mxu0 }
  0x9f   : > { %v323_v10 = vadd.f32 %v492_v7, %v306_v8 }
  0xa1   : > { %v466_v11 = vpack.c.bf16 %v323_v10, %v322_v9 }
  0xa3   : > { %467 = vst [vmem:[%s257_s29] sm:$0xff] %v466_v11  }
  0xa4 PF: > { %s13_s14 = sadd.s32 1, %s515_s14   ;;  %s583_s12 = smov %s511_s13 }
  0xa5   : > { %p10_p5 = scmp.ge.s32.totalorder %s13_s14, 4   ;;  %s584_s13 = smov %s586_s15 }
  0xa7   :  { %12 = sbr.rel (!%p10_p5) target bundleno = 2 (0x2), region = 76 }

// kernel: _lambda_.32
= control target key start
LH: loop header
LB: loop body
LE: loop exit
PB: predicated region body
PF: predicated region fallthrough
CT: control target
= control target key end

     0   :  { %s662_s15 = smov 0   ;;  %s664_s16 = smov 0   ;;  %s713_s0 = inlined_call_operand.vmem [shape: bf16[32,64], index: 0, kind: input, shape index: {}]   ;;  %s714_s1 = inlined_call_operand.vmem [shape: bf16[64,128], index: 1, kind: input, shape index: {}]   ;;  %s715_s2 = inlined_call_operand.vmem [shape: f32[1,128], index: 2, kind: input, shape index: {}]   ;;  %s716_s3 = inlined_call_operand.vmem [shape: bf16[32,128], index: 3, kind: input, shape index: {}]   ;;  %s717_s4 = inlined_call_operand.vmem [shape: bf16[32,128], index: 4, kind: output, shape index: {}]  }
   0x1   :  { %s666_s17 = smov 0  }
   0x2 LB: > { %s33_s18 = sadd.s32 1, %s631_s16  ;;  %p544_p0 = scmp.ge.s32.totalorder %s635_s17, 1  ;;  %s635_s17 = sphi %s666_s17, %s14_s17   ;;  %s631_s16 = sphi %s664_s16, %s719_s16   ;;  %s627_s15 = sphi %s662_s15, %s718_s15  }
   0x3   : > { %p35_p1 = scmp.ge.s32.totalorder %s33_s18, 2  ;;  %p229_p2 = scmp.lt.s32.totalorder %s635_s17, 3 }
   0x5   : > { %s721_s18 = smov (%p35_p1, %s33_s18), 0  ;;  %p230_p3 = pnand %p544_p0, %p229_p2 }
   0x6   : > { %s545_s21 = sshll.u32 (!%p230_p3), %s627_s15, 1 }
   0x7   : > { %233 = sbr.rel (%p230_p3) target bundleno = 171 (0xab), region = 36  ;;  %p281_p4 = scmp.lt.s32.totalorder (!%p230_p3), %s545_s21, 3 }
   0xc   : > { %v578_v0 = vld [vmem:[%s714_s1 + $0x18] sm:$0xff]  ;;  %v577_v1 = vld [vmem:[%s714_s1 + $0x10] sm:$0xff]  ;;  %s723_s21 = smov (!%p281_p4, %s545_s21), 3  ;;  %v576_v2 = vld [vmem:[%s714_s1 + $0x8] sm:$0xff]  ;;  %vm367_vm0 = vcmask 523264  }
   0xd   : > { %375 = vmatpush.bf16.msra.mxu0 %v578_v0  ;;  %s546_s26 = sshll.u32 %s723_s21, 2  ;;  %v575_v3 = vld [vmem:[%s714_s1] sm:$0xff] }
   0xe   : > { %s287_s5 = scalar_lea.vmem %s713_s0, %s546_s26  ;;  %v612_v6 = vld [vmem:[%s715_s2] ss:$0 sm:$0xff]  ;;  %s308_s10 = scalar_lea.vmem %s716_s3, %s546_s26 }
   0xf   : > { %v574_v4 = vld [vmem:[%s287_s5] sm:$0xff]  ;;  %s317_s13 = scalar_lea.vmem %s717_s4, %s546_s26 }
  0x10   : > { %v580_v8 = vld [vmem:[%s308_s10] sm:$0xff]  }
  0x11   : > { %376 = vmatpush.bf16.msra.mxu0 %v577_v1  ;;  %v581_v10 = vunpack.c.l.bf16 %v580_v8  ;;  %v582_v13 = vunpack.c.h.bf16 %v580_v8 }
  0x15   : > { %377 = vmatpush.bf16.msra.mxu0 %v576_v2 }
  0x19   : > { %378 = vmatpush.bf16.msra.mxu0 %v575_v3 }
  0x1c   : > { %571 = vmatmul.msk.bf16.vlgmr.msra.gmra.mxu0 %vm367_vm0, %v574_v4 }
  0x99   : > { %v380_v5 = vpop.f32.mrf.mxu0 }
  0x9a   : > { %v398_v7 = vadd.f32 %v612_v6, %v380_v5 }
  0x9c   : > { %v404_v11 = vmul.f32 0.5, %v398_v7 }
  0x9e   : > { %v406_v15 = vadd.f32 %v581_v10, %v404_v11 }
  0xa1   : > { %v382_v9 = vpop.f32.mrf.mxu0 }
  0xa2   : > { %v399_v12 = vadd.f32 %v612_v6, %v382_v9 }
  0xa4   : > { %v405_v14 = vmul.f32 0.5, %v399_v12 }
  0xa6   : > { %v407_v16 = vadd.f32 %v582_v13, %v405_v14 }
  0xa8   : > { %v586_v17 = vpack.c.bf16 %v407_v16, %v406_v15 }
  0xaa   : > { %587 = vst [vmem:[%s317_s13] sm:$0xff] %v586_v17  }
  0xab PF: > { %s14_s17 = sadd.s32 1, %s635_s17   ;;  %s718_s15 = smov %s631_s16 }
  0xac   : > { %p11_p5 = scmp.ge.s32.totalorder %s14_s17, 4   ;;  %s719_s16 = smov %s721_s18 }
  0xae   :  { %13 = sbr.rel (!%p11_p5) target bundleno = 2 (0x2), region = 83 }

// kernel: _lambda_.31
= control target key start
LH: loop header
LB: loop body
LE: loop exit
PB: predicated region body
PF: predicated region fallthrough
CT: control target
= control target key end

     0   :  { %s748_s18 = smov 0   ;;  %s750_s19 = smov 0   ;;  %s808_s0 = inlined_call_operand.vmem [shape: bf16[32,32], index: 0, kind: input, shape index: {}]   ;;  %s809_s1 = inlined_call_operand.vmem [shape: bf16[32,128], index: 1, kind: input, shape index: {}]   ;;  %s810_s2 = inlined_call_operand.vmem [shape: f32[1,128], index: 2, kind: input, shape index: {}]   ;;  %s811_s3 = inlined_call_operand.vmem [shape: f32[1,32], index: 3, kind: input, shape index: {}]   ;;  %s812_s4 = inlined_call_operand.vmem [shape: f32[1,32], index: 4, kind: input, shape index: {}]   ;;  %s813_s5 = inlined_call_operand.vmem [shape: bf16[32,128], index: 5, kind: output, shape index: {}]  }
   0x1   :  { %s752_s20 = smov 0  }
   0x2 LB: > { %s34_s21 = sadd.s32 1, %s711_s19  ;;  %p617_p0 = scmp.ge.s32.totalorder %s715_s20, 1  ;;  %s715_s20 = sphi %s752_s20, %s15_s20   ;;  %s711_s19 = sphi %s750_s19, %s815_s19   ;;  %s707_s18 = sphi %s748_s18, %s814_s18  }
   0x3   : > { %p36_p1 = scmp.ge.s32.totalorder %s34_s21, 2  ;;  %p238_p2 = scmp.lt.s32.totalorder %s715_s20, 3 }
   0x5   : > { %s817_s21 = smov (%p36_p1, %s34_s21), 0  ;;  %p239_p3 = pnand %p617_p0, %p238_p2 }
   0x6   : > { %s618_s22 = sshll.u32 (!%p239_p3), %s707_s18, 1 }
   0x7   : > { %242 = sbr.rel (%p239_p3) target bundleno = 473 (0x1d9), region = 40  ;;  %p284_p4 = scmp.lt.s32.totalorder (!%p239_p3), %s618_s22, 3 }
   0xc   : > { %s819_s22 = smov (!%p284_p4, %s618_s22), 3  ;;  %vm329_vm0 = vcmask 261120   ;;  %v717_v5 = vmov 32.0   ;;  %v641_v25 = vld [vmem:[%s809_s1 + $0x8] sm:$0xff]  ;;  %v640_v28 = vld [vmem:[%s809_s1] sm:$0xff]  ;;  %vm395_vm6 = vcmask 257024  }
   0xd   : > { %s619_s23 = sshll.u32 %s819_s22, 2  ;;  %679 = vrcp.f32 %v717_v5  ;;  %433 = vmatpush.bf16.msra.mxu0 %v641_v25  ;;  %v676_v38 = vld [vmem:[%s811_s3] ss:$0 sm:$0xff] }
   0xe   : > { %s290_s26 = scalar_lea.vmem %s808_s0, %s619_s23  ;;  %v677_v41 = vld [vmem:[%s812_s4] ss:$0 sm:$0xff]  ;;  %s311_s14 = scalar_lea.vmem %s813_s5, %s619_s23 }
   0xf   : > { %v643_v0 = vld [vmem:[%s290_s26] sm:$0xff]  }
  0x10   : > { %v644_v1 = vunpack.c.l.bf16 %v643_v0  ;;  %v645_v3 = vunpack.c.h.bf16 %v643_v0  ;;  %v678_v55 = vld [vmem:[%s810_s2] ss:$0 sm:$0xff] }
  0x11   : > { %434 = vmatpush.bf16.msra.mxu0 %v640_v28 }
  0x12   : > { %v330_v2 = vsel %vm329_vm0, %v644_v1, 0.0  ;;  %v333_v4 = vsel %vm329_vm0, %v645_v3, 0.0 }
  0x13   : > { %331 = vadd.xlane.f32.xlu0 %v330_v2  ;;  %v680_v6 = vpop.eup %679 }
  0x14   : > { %v337_v7 = vmul.f32 32.0, %v680_v6  ;;  %vm341_vm1 = vweird.f32 %v680_v6 }
  0x16   : > { %v338_v8 = vsub.f32 1.0, %v337_v7 }
  0x18   : > { %v339_v9 = vmul.f32 %v680_v6, %v338_v8 }
  0x1a   : > { %v340_v10 = vadd.f32 %v680_v6, %v339_v9 }
  0x1b   : > { %334 = vadd.xlane.f32.xlu0 %v333_v4 }
  0x1c   : > { %v342_v11 = vsel %vm341_vm1, %v680_v6, %v340_v10 }
  0x86   : > { %v332_v12 = vpop.xlane.xlu0 %331 }
  0x87   : > { %v343_v13 = vmul.f32 %v342_v11, %v332_v12 }
  0x89   : > { %v345_v14 = vsub.f32 %v644_v1, %v343_v13 }
  0x8b   : > { %v347_v15 = vmul.f32 %v345_v14, %v345_v14 }
  0x8d   : > { %v349_v16 = vsel %vm329_vm0, %v347_v15, 0.0 }
  0x8e   : > { %350 = vadd.xlane.f32.xlu1 %v349_v16  ;;  %v335_v17 = vpop.xlane.xlu0 %334 }
  0x8f   : > { %v344_v18 = vmul.f32 %v342_v11, %v335_v17 }
  0x91   : > { %v346_v19 = vsub.f32 %v645_v3, %v344_v18 }
  0x93   : > { %v348_v20 = vmul.f32 %v346_v19, %v346_v19 }
  0x95   : > { %v352_v21 = vsel %vm329_vm0, %v348_v20, 0.0 }
  0x96   : > { %353 = vadd.xlane.f32.xlu1 %v352_v21 }
 0x101   : > { %v351_v22 = vpop.xlane.xlu1 %350 }
 0x102   : > { %v355_v23 = vmul.f32 %v351_v22, %v342_v11 }
 0x104   : > { %v357_v24 = vadd.f32 1e-05, %v355_v23 }
 0x106   : > { %681 = vrsqrt.f32 %v357_v24  ;;  %vm365_vm3 = vweird.f32 %v357_v24 }
 0x109   : > { %v354_v26 = vpop.xlane.xlu1 %353 }
 0x10a   : > { %v356_v27 = vmul.f32 %v354_v26, %v342_v11 }
 0x10c   : > { %v682_v29 = vpop.eup %681  ;;  %v358_v30 = vadd.f32 1e-05, %v356_v27 }
 0x10d   : > { %v360_v31 = vmul.f32 %v682_v29, %v357_v24  ;;  %vm366_vm2 = vweird.f32 %v682_v29 }
 0x10e   : > { %683 = vrsqrt.f32 %v358_v30  ;;  %vm367_vm4 = vmor %vm365_vm3, %vm366_vm2  ;;  %vm375_vm7 = vweird.f32 %v358_v30 }
 0x10f   : > { %v361_v32 = vmul.f32 %v682_v29, %v360_v31 }
 0x111   : > { %v362_v33 = vmul.f32 0.5, %v361_v32 }
 0x113   : > { %v363_v34 = vsub.f32 1.5, %v362_v33 }
 0x114   : > { %v684_v35 = vpop.eup %683 }
 0x115   : > { %v364_v36 = vmul.f32 %v682_v29, %v363_v34  ;;  %v370_v37 = vmul.f32 %v684_v35, %v358_v30  ;;  %vm376_vm5 = vweird.f32 %v684_v35 }
 0x116   : > { %vm377_vm8 = vmor %vm375_vm7, %vm376_vm5 }
 0x117   : > { %v368_v39 = vsel %vm367_vm4, %v682_v29, %v364_v36  ;;  %v371_v40 = vmul.f32 %v684_v35, %v370_v37 }
 0x118   : > { %v379_v42 = vmul.f32 %v368_v39, %v345_v14 }
 0x119   : > { %v372_v43 = vmul.f32 0.5, %v371_v40 }
 0x11a   : > { %v385_v44 = vmul.f32 %v676_v38, %v379_v42 }
 0x11b   : > { %v373_v45 = vsub.f32 1.5, %v372_v43 }
 0x11c   : > { %v391_v46 = vadd.f32 %v677_v41, %v385_v44 }
 0x11d   : > { %v374_v47 = vmul.f32 %v684_v35, %v373_v45 }
 0x11e   : > { %v393_v48 = vpack.c.bf16 %v391_v46, %v391_v46 }
 0x11f   : > { %v378_v49 = vsel %vm377_vm8, %v684_v35, %v374_v47 }
 0x120   : > { %396 = vst.msk [vmem:[#allocation3] sm:$0xf] %vm395_vm6, %v393_v48  ;;  %v380_v50 = vmul.f32 %v378_v49, %v346_v19 }
 0x122   : > { %v386_v51 = vmul.f32 %v676_v38, %v380_v50 }
 0x124   : > { %v392_v52 = vadd.f32 %v677_v41, %v386_v51 }
 0x126   : > { %v394_v53 = vpack.c.bf16 %v392_v52, %v392_v52 }
 0x128   : > { %397 = vst.msk [vmem:[#allocation3 + $0x4] sm:$0xf] %vm395_vm6, %v394_v53 }
 0x12f   : > { %v639_v54 = vld [vmem:[#allocation3] sm:$0xff] }
 0x130   : > { %634 = vmatmul.msk.bf16.vlgmr.msra.gmra.mxu0 %vm329_vm0, %v639_v54 }
 0x1ad   : > { %v436_v56 = vpop.f32.mrf.mxu0 }
 0x1ae   : > { %v454_v57 = vadd.f32 %v678_v55, %v436_v56 }
 0x1b0   : > { %v635_v58 = vmul.f32 -1.442695, %v454_v57 }
 0x1b2   : > { %685 = vpow2.f32 %v635_v58 }
 0x1b5   : > { %v438_v59 = vpop.f32.mrf.mxu0 }
 0x1b6   : > { %v455_v60 = vadd.f32 %v678_v55, %v438_v59 }
 0x1b8   : > { %v686_v61 = vpop.eup %685  ;;  %v636_v62 = vmul.f32 -1.442695, %v455_v60 }
 0x1b9   : > { %v462_v63 = vadd.f32 1.0, %v686_v61 }
 0x1ba   : > { %687 = vpow2.f32 %v636_v62 }
 0x1bb   : > { %689 = vrcp.f32 %v462_v63  ;;  %v475_v9 = vand.u32 2147483648, %v462_v63  ;;  %vm469_vm10 = vweird.f32 %v462_v63  ;;  %v473_v10 = vand.u32 2147483647, %v462_v63 }
 0x1bd   : > { %v476_v16 = vor.u32 1.1754944e-38, %v475_v9  ;;  %vm474_vm13 = vcmp.eq.f32.partialorder %v473_v10, 8.507059e+37 }
 0x1c0   : > { %v688_v0 = vpop.eup %687 }
 0x1c1   : > { %v690_v1 = vpop.eup %689  ;;  %v463_v2 = vadd.f32 1.0, %v688_v0 }
 0x1c2   : > { %v465_v3 = vmul.f32 %v690_v1, %v462_v63  ;;  %vm470_vm9 = vweird.f32 %v690_v1 }
 0x1c3   : > { %691 = vrcp.f32 %v463_v2  ;;  %vm471_vm11 = vmor %vm469_vm10, %vm470_vm9  ;;  %v490_v12 = vand.u32 2147483648, %v463_v2  ;;  %v488_v15 = vand.u32 2147483647, %v463_v2  ;;  %vm484_vm14 = vweird.f32 %v463_v2 }
 0x1c4   : > { %v466_v4 = vsub.f32 1.0, %v465_v3 }
 0x1c5   : > { %v491_v19 = vor.u32 1.1754944e-38, %v490_v12  ;;  %vm489_vm0 = vcmp.eq.f32.partialorder %v488_v15, 8.507059e+37 }
 0x1c6   : > { %v467_v5 = vmul.f32 %v690_v1, %v466_v4 }
 0x1c8   : > { %v468_v7 = vadd.f32 %v690_v1, %v467_v5 }
 0x1c9   : > { %v692_v6 = vpop.eup %691 }
 0x1ca   : > { %v480_v8 = vmul.f32 %v692_v6, %v463_v2  ;;  %v472_v13 = vsel %vm471_vm11, %v690_v1, %v468_v7  ;;  %vm485_vm12 = vweird.f32 %v692_v6 }
 0x1cb   : > { %v477_v18 = vsel %vm474_vm13, %v476_v16, %v472_v13  ;;  %vm486_vm15 = vmor %vm484_vm14, %vm485_vm12 }
 0x1cc   : > { %v481_v11 = vsub.f32 1.0, %v480_v8  ;;  %v494_v22 = vmul.f32 %v477_v18, %v454_v57 }
 0x1ce   : > { %v482_v14 = vmul.f32 %v692_v6, %v481_v11 }
 0x1d0   : > { %v483_v17 = vadd.f32 %v692_v6, %v482_v14 }
 0x1d2   : > { %v487_v20 = vsel %vm486_vm15, %v692_v6, %v483_v17 }
 0x1d3   : > { %v492_v21 = vsel %vm489_vm0, %v491_v19, %v487_v20 }
 0x1d4   : > { %v495_v23 = vmul.f32 %v492_v21, %v455_v60 }
 0x1d6   : > { %v649_v24 = vpack.c.bf16 %v495_v23, %v494_v22 }
 0x1d8   : > { %650 = vst [vmem:[%s311_s14] sm:$0xff] %v649_v24  }
 0x1d9 PF: > { %s15_s20 = sadd.s32 1, %s715_s20   ;;  %s814_s18 = smov %s711_s19 }
 0x1da   : > { %p12_p5 = scmp.ge.s32.totalorder %s15_s20, 4   ;;  %s815_s19 = smov %s817_s21 }
 0x1dc   :  { %14 = sbr.rel (!%p12_p5) target bundleno = 2 (0x2), region = 88 }

// kernel: _lambda_.33
= control target key start
LH: loop header
LB: loop body
LE: loop exit
PB: predicated region body
PF: predicated region fallthrough
CT: control target
= control target key end

     0   :  { %s698_s18 = smov 0   ;;  %s700_s19 = smov 0   ;;  %s758_s0 = inlined_call_operand.vmem [shape: bf16[32,32], index: 0, kind: input, shape index: {}]   ;;  %s759_s1 = inlined_call_operand.vmem [shape: bf16[32,128], index: 1, kind: input, shape index: {}]   ;;  %s760_s2 = inlined_call_operand.vmem [shape: f32[1,128], index: 2, kind: input, shape index: {}]   ;;  %s761_s3 = inlined_call_operand.vmem [shape: f32[1,32], index: 3, kind: input, shape index: {}]   ;;  %s762_s4 = inlined_call_operand.vmem [shape: f32[1,32], index: 4, kind: input, shape index: {}]   ;;  %s763_s5 = inlined_call_operand.vmem [shape: bf16[32,128], index: 5, kind: output, shape index: {}]  }
   0x1   :  { %s702_s20 = smov 0  }
   0x2 LB: > { %s34_s21 = sadd.s32 1, %s661_s19  ;;  %p577_p0 = scmp.ge.s32.totalorder %s665_s20, 1  ;;  %s665_s20 = sphi %s702_s20, %s15_s20   ;;  %s661_s19 = sphi %s700_s19, %s765_s19   ;;  %s657_s18 = sphi %s698_s18, %s764_s18  }
   0x3   : > { %p36_p1 = scmp.ge.s32.totalorder %s34_s21, 2  ;;  %p238_p2 = scmp.lt.s32.totalorder %s665_s20, 3 }
   0x5   : > { %s767_s21 = smov (%p36_p1, %s34_s21), 0  ;;  %p239_p3 = pnand %p577_p0, %p238_p2 }
   0x6   : > { %s578_s22 = sshll.u32 (!%p239_p3), %s657_s18, 1 }
   0x7   : > { %242 = sbr.rel (%p239_p3) target bundleno = 443 (0x1bb), region = 40  ;;  %p284_p4 = scmp.lt.s32.totalorder (!%p239_p3), %s578_s22, 3 }
   0xc   : > { %s769_s22 = smov (!%p284_p4, %s578_s22), 3  ;;  %vm329_vm0 = vcmask 261120   ;;  %v667_v5 = vmov 32.0   ;;  %v599_v25 = vld [vmem:[%s759_s1 + $0x8] sm:$0xff]  ;;  %v598_v28 = vld [vmem:[%s759_s1] sm:$0xff]  ;;  %vm395_vm6 = vcmask 257024  }
   0xd   : > { %s579_s23 = sshll.u32 %s769_s22, 2  ;;  %637 = vrcp.f32 %v667_v5  ;;  %433 = vmatpush.bf16.msra.mxu0 %v599_v25  ;;  %v634_v38 = vld [vmem:[%s761_s3] ss:$0 sm:$0xff] }
   0xe   : > { %s290_s26 = scalar_lea.vmem %s758_s0, %s579_s23  ;;  %v635_v41 = vld [vmem:[%s762_s4] ss:$0 sm:$0xff]  ;;  %s311_s14 = scalar_lea.vmem %s763_s5, %s579_s23 }
   0xf   : > { %v601_v0 = vld [vmem:[%s290_s26] sm:$0xff]  }
  0x10   : > { %v602_v1 = vunpack.c.l.bf16 %v601_v0  ;;  %v603_v3 = vunpack.c.h.bf16 %v601_v0  ;;  %v636_v56 = vld [vmem:[%s760_s2] ss:$0 sm:$0xff] }
  0x11   : > { %434 = vmatpush.bf16.msra.mxu0 %v598_v28 }
  0x12   : > { %v330_v2 = vsel %vm329_vm0, %v602_v1, 0.0  ;;  %v333_v4 = vsel %vm329_vm0, %v603_v3, 0.0 }
  0x13   : > { %331 = vadd.xlane.f32.xlu0 %v330_v2  ;;  %v638_v6 = vpop.eup %637 }
  0x14   : > { %v337_v7 = vmul.f32 32.0, %v638_v6  ;;  %vm341_vm1 = vweird.f32 %v638_v6 }
  0x16   : > { %v338_v8 = vsub.f32 1.0, %v337_v7 }
  0x18   : > { %v339_v9 = vmul.f32 %v638_v6, %v338_v8 }
  0x1a   : > { %v340_v10 = vadd.f32 %v638_v6, %v339_v9 }
  0x1b   : > { %334 = vadd.xlane.f32.xlu0 %v333_v4 }
  0x1c   : > { %v342_v11 = vsel %vm341_vm1, %v638_v6, %v340_v10 }
  0x86   : > { %v332_v12 = vpop.xlane.xlu0 %331 }
  0x87   : > { %v343_v13 = vmul.f32 %v342_v11, %v332_v12 }
  0x89   : > { %v345_v14 = vsub.f32 %v602_v1, %v343_v13 }
  0x8b   : > { %v347_v15 = vmul.f32 %v345_v14, %v345_v14 }
  0x8d   : > { %v349_v16 = vsel %vm329_vm0, %v347_v15, 0.0 }
  0x8e   : > { %350 = vadd.xlane.f32.xlu1 %v349_v16  ;;  %v335_v17 = vpop.xlane.xlu0 %334 }
  0x8f   : > { %v344_v18 = vmul.f32 %v342_v11, %v335_v17 }
  0x91   : > { %v346_v19 = vsub.f32 %v603_v3, %v344_v18 }
  0x93   : > { %v348_v20 = vmul.f32 %v346_v19, %v346_v19 }
  0x95   : > { %v352_v21 = vsel %vm329_vm0, %v348_v20, 0.0 }
  0x96   : > { %353 = vadd.xlane.f32.xlu1 %v352_v21 }
 0x101   : > { %v351_v22 = vpop.xlane.xlu1 %350 }
 0x102   : > { %v355_v23 = vmul.f32 %v351_v22, %v342_v11 }
 0x104   : > { %v357_v24 = vadd.f32 1e-05, %v355_v23 }
 0x106   : > { %639 = vrsqrt.f32 %v357_v24  ;;  %vm365_vm3 = vweird.f32 %v357_v24 }
 0x109   : > { %v354_v26 = vpop.xlane.xlu1 %353 }
 0x10a   : > { %v356_v27 = vmul.f32 %v354_v26, %v342_v11 }
 0x10c   : > { %v640_v29 = vpop.eup %639  ;;  %v358_v30 = vadd.f32 1e-05, %v356_v27 }
 0x10d   : > { %v360_v31 = vmul.f32 %v640_v29, %v357_v24  ;;  %vm366_vm2 = vweird.f32 %v640_v29 }
 0x10e   : > { %641 = vrsqrt.f32 %v358_v30  ;;  %vm367_vm4 = vmor %vm365_vm3, %vm366_vm2  ;;  %vm375_vm7 = vweird.f32 %v358_v30 }
 0x10f   : > { %v361_v32 = vmul.f32 %v640_v29, %v360_v31 }
 0x111   : > { %v362_v33 = vmul.f32 0.5, %v361_v32 }
 0x113   : > { %v363_v34 = vsub.f32 1.5, %v362_v33 }
 0x114   : > { %v642_v35 = vpop.eup %641 }
 0x115   : > { %v364_v36 = vmul.f32 %v640_v29, %v363_v34  ;;  %v370_v37 = vmul.f32 %v642_v35, %v358_v30  ;;  %vm376_vm5 = vweird.f32 %v642_v35 }
 0x116   : > { %vm377_vm8 = vmor %vm375_vm7, %vm376_vm5 }
 0x117   : > { %v368_v39 = vsel %vm367_vm4, %v640_v29, %v364_v36  ;;  %v371_v40 = vmul.f32 %v642_v35, %v370_v37 }
 0x118   : > { %v379_v42 = vmul.f32 %v368_v39, %v345_v14 }
 0x119   : > { %v372_v43 = vmul.f32 0.5, %v371_v40 }
 0x11a   : > { %v385_v44 = vmul.f32 %v634_v38, %v379_v42 }
 0x11b   : > { %v373_v45 = vsub.f32 1.5, %v372_v43 }
 0x11c   : > { %v391_v46 = vadd.f32 %v635_v41, %v385_v44 }
 0x11d   : > { %v374_v47 = vmul.f32 %v642_v35, %v373_v45 }
 0x11e   : > { %v393_v48 = vpack.c.bf16 %v391_v46, %v391_v46 }
 0x11f   : > { %v378_v49 = vsel %vm377_vm8, %v642_v35, %v374_v47 }
 0x120   : > { %396 = vst.msk [vmem:[#allocation3] sm:$0xf] %vm395_vm6, %v393_v48  ;;  %v380_v50 = vmul.f32 %v378_v49, %v346_v19 }
 0x122   : > { %v386_v51 = vmul.f32 %v634_v38, %v380_v50 }
 0x124   : > { %v392_v52 = vadd.f32 %v635_v41, %v386_v51 }
 0x126   : > { %v394_v53 = vpack.c.bf16 %v392_v52, %v392_v52 }
 0x128   : > { %397 = vst.msk [vmem:[#allocation3 + $0x4] sm:$0xf] %vm395_vm6, %v394_v53 }
 0x12f   : > { %v597_v54 = vld [vmem:[#allocation3] sm:$0xff] }
 0x130   : > { %594 = vmatmul.msk.bf16.vlgmr.msra.gmra.mxu0 %vm329_vm0, %v597_v54 }
 0x1ad   : > { %v436_v55 = vpop.f32.mrf.mxu0 }
 0x1ae   : > { %v454_v58 = vadd.f32 %v636_v56, %v436_v55 }
 0x1b5   : > { %v438_v57 = vpop.f32.mrf.mxu0 }
 0x1b6   : > { %v455_v59 = vadd.f32 %v636_v56, %v438_v57 }
 0x1b8   : > { %v607_v60 = vpack.c.bf16 %v455_v59, %v454_v58 }
 0x1ba   : > { %608 = vst [vmem:[%s311_s14] sm:$0xff] %v607_v60  }
 0x1bb PF: > { %s15_s20 = sadd.s32 1, %s665_s20   ;;  %s764_s18 = smov %s661_s19 }
 0x1bc   : > { %p12_p5 = scmp.ge.s32.totalorder %s15_s20, 4   ;;  %s765_s19 = smov %s767_s21 }
 0x1be   :  { %14 = sbr.rel (!%p12_p5) target bundleno = 2 (0x2), region = 88 }

// kernel: _lambda_.34
= control target key start
LH: loop header
LB: loop body
LE: loop exit
PB: predicated region body
PF: predicated region fallthrough
CT: control target
= control target key end

     0   :  { %s505_s12 = smov 0   ;;  %s507_s13 = smov 0   ;;  %s544_s0 = inlined_call_operand.vmem [shape: f32[16,32], index: 0, kind: input, shape index: {}]   ;;  %s545_s1 = inlined_call_operand.vmem [shape: bf16[32,128], index: 1, kind: input, shape index: {}]   ;;  %s546_s2 = inlined_call_operand.vmem [shape: f32[1,128], index: 2, kind: input, shape index: {}]   ;;  %s547_s3 = inlined_call_operand.vmem [shape: bf16[16,128], index: 3, kind: output, shape index: {}]  }
   0x1   :  { %s509_s14 = smov 0  }
   0x2 LB: > { %s32_s15 = sadd.s32 1, %s479_s13  ;;  %p420_p0 = scmp.ge.s32.totalorder %s483_s14, 1  ;;  %s483_s14 = sphi %s509_s14, %s13_s14   ;;  %s479_s13 = sphi %s507_s13, %s549_s13   ;;  %s475_s12 = sphi %s505_s12, %s548_s12  }
   0x3   : > { %p34_p1 = scmp.ge.s32.totalorder %s32_s15, 2  ;;  %p186_p2 = scmp.lt.s32.totalorder %s483_s14, 3 }
   0x5   : > { %s551_s15 = smov (%p34_p1, %s32_s15), 0  ;;  %p187_p3 = pnand %p420_p0, %p186_p2 }
   0x6   : > { %p225_p4 = scmp.lt.s32.totalorder (!%p187_p3), %s475_s12, 1 }
   0x7   : > { %190 = sbr.rel (%p187_p3) target bundleno = 154 (0x9a), region = 32 }
   0xc   : > { %v435_v0 = vld [vmem:[%s545_s1 + $0x8] sm:$0xff]  ;;  %v434_v1 = vld [vmem:[%s545_s1] sm:$0xff]  ;;  %s553_s12 = smov (!%p225_p4, %s475_s12), 1  ;;  %vm276_vm0 = vcmask 261120  }
   0xd   : > { %286 = vmatpush.bf16.msra.mxu0 %v435_v0  ;;  %s421_s20 = sshll.u32 %s553_s12, 3  ;;  %v460_v4 = vld [vmem:[%s546_s2] ss:$0 sm:$0xff]  ;;  %s422_s26 = sshll.u32 %s553_s12, 2 }
   0xe   : > { %s231_s23 = scalar_lea.vmem %s544_s0, %s421_s20  ;;  %s250_s29 = scalar_lea.vmem %s547_s3, %s422_s26 }
   0xf   : > { %v257_v2 = vld [vmem:[%s231_s23] sm:$0xff] }
  0x10   : > { %v258_v3 = vpack.c.bf16 %v257_v2, %v257_v2 }
  0x11   : > { %287 = vmatpush.bf16.msra.mxu0 %v434_v1 }
  0x14   : > { %431 = vmatmul.msk.bf16.vlgmr.msra.gmra.mxu0 %vm276_vm0, %v258_v3 }
  0x91   : > { %v289_v5 = vpop.f32.mrf.mxu0 }
  0x92   : > { %v303_v6 = vadd.f32 %v460_v4, %v289_v5 }
  0x94   : > { %v304_v7 = vpack.c.bf16 %v303_v6, %v303_v6 }
  0x96   : > { %305 = vst [vmem:[%s250_s29] sm:$0xf] %v304_v7 }
  0x99   : > { %v291_v8 = vpop.f32.mrf.mxu0 }
  0x9a PF: > { %s13_s14 = sadd.s32 1, %s483_s14   ;;  %s548_s12 = smov %s479_s13 }
  0x9b   : > { %p10_p5 = scmp.ge.s32.totalorder %s13_s14, 4   ;;  %s549_s13 = smov %s551_s15 }
  0x9d   :  { %12 = sbr.rel (!%p10_p5) target bundleno = 2 (0x2), region = 76 }

// kernel: _lambda_.35
= control target key start
LH: loop header
LB: loop body
LE: loop exit
PB: predicated region body
PF: predicated region fallthrough
CT: control target
= control target key end

     0   :  { %s534_s12 = smov 0   ;;  %s536_s13 = smov 0   ;;  %s593_s0 = inlined_call_operand.vmem [shape: bf16[3,2,4,15,8], index: 0, kind: input, shape index: {}]   ;;  %s594_s1 = inlined_call_operand.vmem [shape: f32[4,1,8], index: 1, kind: input, shape index: {}]   ;;  %s595_s2 = inlined_call_operand.vmem [shape: bf16[4,16,8], index: 2, kind: input, shape index: {}]   ;;  %s596_s3 = inlined_call_operand.vmem [shape: bf16[2,4,15,16], index: 3, kind: output, shape index: {}]  }
   0x1   :  { %s538_s14 = smov 0   ;;  %s540_s15 = smov 0  }
   0x2   :  { %s542_s16 = smov 0  }
   0x3 LB: > { %s22_s17 = sadd.s32 1, %s504_s14  ;;  %s25_s18 = sadd.s32 1, %s508_s15  ;;  %s512_s16 = sphi %s542_s16, %s13_s16   ;;  %s508_s15 = sphi %s540_s15, %s600_s15   ;;  %s504_s14 = sphi %s538_s14, %s599_s14   ;;  %s500_s13 = sphi %s536_s13, %s598_s13   ;;  %s496_s12 = sphi %s534_s12, %s597_s12  }
   0x4   : > { %p23_p0 = scmp.ge.s32.totalorder %s22_s17, 4  ;;  %p411_p1 = scmp.ge.s32.totalorder %s512_s16, 1 }
   0x5   : > { %p175_p2 = scmp.lt.s32.totalorder %s512_s16, 9 }
   0x6   : > { %s602_s17 = smov (%p23_p0, %s22_s17), 0  ;;  %s604_s18 = smov (!%p23_p0, %s25_s18), %s508_s15 }
   0x7   : > { %p176_p3 = pnand %p411_p1, %p175_p2  ;;  %p27_p4 = scmp.ge.s32.totalorder %s604_s18, 2 }
   0x8   : > { %p217_p5 = scmp.lt.s32.totalorder (!%p176_p3), %s496_s12, 3  ;;  %p215_p6 = scmp.lt.s32.totalorder (!%p176_p3), %s500_s13, 1 }
   0x9   : > { %s606_s18 = smov (%p27_p4, %s604_s18), 0  ;;  %179 = sbr.rel (%p176_p3) target bundleno = 165 (0xa5), region = 32 }
   0xe   : > { %s608_s12 = smov (!%p217_p5, %s496_s12), 3  ;;  %s610_s13 = smov (!%p215_p6, %s500_s13), 1  ;;  %vm260_vm0 = vcmask 64512   ;;  %vm283_vm1 = vcmask 125952   ;;  %vm286_vm2 = vsmask.f32 3328 }
   0xf   : > { %s427_s19 = sshll.u32 %s608_s12, 3  ;;  %s412_s20 = sshll.u32 %s608_s12, 1  ;;  %vm287_vm3 = vmand %vm283_vm1, %vm286_vm2 }
  0x10   : > { %s231_s23 = scalar_lea.vmem %s595_s2, %s427_s19  ;;  %s413_s24 = sshll.u32 %s610_s13, 3 }
  0x11   : > { %v428_v0 = vld [vmem:[%s231_s23] sm:$0xff]  ;;  %s221_s25 = sadd.s32 %s413_s24, %s412_s20  ;;  %s226_s28 = scalar_lea.vmem %s594_s1, %s608_s12 }
  0x12   : > { %s414_s29 = sshll.u32 %s221_s25, 2  ;;  %v265_v1 = vsel %vm260_vm0, %v428_v0, 0  ;;  %v473_v2 = vld [vmem:[%s226_s28] ss:$0 sm:$0xff] }
  0x13   : > { %s223_s5 = scalar_lea.vmem %s593_s0, %s414_s29  ;;  %274 = vmatpush.bf16.xpose.msra.mxu0 %v265_v1  ;;  %s240_s8 = scalar_lea.vmem %s596_s3, %s414_s29 }
  0x14   : > { %v430_v3 = vld [vmem:[%s223_s5] sm:$0xff]  }
  0x15   : > { %v431_v4 = vunpack.c.l.bf16 %v430_v3  ;;  %v432_v5 = vunpack.c.h.bf16 %v430_v3  ;;  %v288_v12 = vld [vmem:[%s240_s8 + $0x4] sm:$0xf] }
  0x17   : > { %v250_v6 = vadd.f32 %v473_v2, %v431_v4  ;;  %v251_v7 = vadd.f32 %v473_v2, %v432_v5 }
  0x19   : > { %v252_v8 = vpack.c.bf16 %v251_v7, %v250_v6 }
  0x1b   : > { %424 = vmatmul.msk.bf16.vlgmr.msra.gmra.mxu0 %vm260_vm0, %v252_v8 }
  0x98   : > { %v276_v9 = vpop.f32.mrf.mxu0 }
  0x99   : > { %v281_v10 = vpack.c.bf16 %v276_v9, %v276_v9 }
  0x9b   : > { %284 = vst.msk [vmem:[%s240_s8] sm:$0xf] %vm283_vm1, %v281_v10 }
  0xa0   : > { %v278_v11 = vpop.f32.mrf.mxu0 }
  0xa1   : > { %v282_v13 = vpack.c.bf16 %v278_v11, %v278_v11 }
  0xa3   : > { %v289_v14 = vsel %vm287_vm3, %v282_v13, %v288_v12 }
  0xa4   : > { %290 = vst [vmem:[%s240_s8 + $0x4] sm:$0xf] %v289_v14 }
  0xa5 PF: > { %s13_s16 = sadd.s32 1, %s512_s16   ;;  %s597_s12 = smov %s504_s14 }
  0xa6   : > { %p10_p7 = scmp.ge.s32.totalorder %s13_s16, 10   ;;  %s598_s13 = smov %s508_s15 }
  0xa7   : > { %s599_s14 = smov %s602_s17  ;;  %s600_s15 = smov %s606_s18 }
  0xa8   :  { %12 = sbr.rel (!%p10_p7) target bundleno = 3 (0x3), region = 68 }

// kernel: _lambda_.36
= control target key start
LH: loop header
LB: loop body
LE: loop exit
PB: predicated region body
PF: predicated region fallthrough
CT: control target
= control target key end

     0   :  { %s733_s12 = smov 0   ;;  %s735_s13 = smov 0   ;;  %s847_s0 = inlined_call_operand.vmem [shape: bf16[3,2,4,15,8], index: 0, kind: input, shape index: {}]   ;;  %s848_s1 = inlined_call_operand.vmem [shape: f32[4,1,8], index: 1, kind: input, shape index: {}]   ;;  %s849_s2 = inlined_call_operand.vmem [shape: bf16[2,4,15,15], index: 2, kind: input, shape index: {}]   ;;  %s850_s3 = inlined_call_operand.vmem [shape: bf16[2,4,15,8], index: 3, kind: output, shape index: {}]  }
   0x1   :  { %s737_s14 = smov 0   ;;  %s739_s15 = smov 0  }
   0x2   :  { %s741_s16 = smov 0   ;;  %s743_s17 = smov 0  }
   0x3   :  { %s745_s18 = smov 0  }
   0x4 LB: > { %s22_s19 = sadd.s32 1, %s702_s16  ;;  %s25_s20 = sadd.s32 1, %s706_s17  ;;  %s710_s18 = sphi %s745_s18, %s13_s18   ;;  %s706_s17 = sphi %s743_s17, %s856_s17   ;;  %s702_s16 = sphi %s741_s16, %s855_s16   ;;  %s698_s15 = sphi %s739_s15, %s854_s15   ;;  %s694_s14 = sphi %s737_s14, %s853_s14   ;;  %s690_s13 = sphi %s735_s13, %s852_s13   ;;  %s686_s12 = sphi %s733_s12, %s851_s12  }
   0x5   : > { %p23_p0 = scmp.ge.s32.totalorder %s22_s19, 4  ;;  %p41_p1 = scmp.ne.s32.totalorder %s690_s13, %s686_s12 }
   0x6   : > { %p42_p2 = scmp.eq.s32.totalorder %s710_s18, 0  ;;  %s34_s24 = sadd.s32 1, %s690_s13 }
   0x7   : > { %s858_s19 = smov (%p23_p0, %s22_s19), 0  ;;  %s860_s20 = smov (!%p23_p0, %s25_s20), %s706_s17 }
   0x8   : > { %p43_p3 = por %p42_p2, %p41_p1  ;;  %p27_p4 = scmp.ge.s32.totalorder %s860_s20, 2 }
   0x9   : > { %s30_s21 = ssub.s32 %s702_s16, %s858_s19  ;;  %p551_p6 = scmp.ge.s32.totalorder %s710_s18, 8 }
   0xa   : > { %s862_s20 = smov (%p27_p4, %s860_s20), 0 }
   0xb   : > { %s29_s22 = ssub.s32 %s706_s17, %s862_s20  ;;  %149 = sbr.rel (%p551_p6) target bundleno = 26 (0x1a), region = 16 }
   0xc   : > { %s31_s23 = sor.u32 %s30_s21, %s29_s22 }
   0xd   : > { %p32_p5 = scmp.eq.s32.totalorder %s31_s23, 0 }
   0xf   : > { %s784_s25 = scalar_select %p32_p5, %s690_s13, %s34_s24  }
  0x10   : > { %152 = sbr.rel (!%p43_p3) target bundleno = 26 (0x1a), region = 20  ;;  %s154_s26 = sand.u32 (%p43_p3), 1, %s690_s13  }
  0x11   : > { %s552_s27 = sshll.u32 (%p43_p3), %s702_s16, 1  ;;  %s588_s28 = smul.u32 (%p43_p3), 24, %s154_s26 }
  0x12   : > { %s553_s29 = sshll.u32 (%p43_p3), %s706_s17, 3 }
  0x13   : > { %s159_s30 = sadd.s32 (%p43_p3), %s553_s29, %s552_s27  ;;  %s156_s8 = scalar_lea.vmem (%p43_p3), [#allocation2], %s588_s28 }
  0x14   : > { %s554_s4 = sshll.u32 (%p43_p3), %s159_s30, 2 }
  0x15   : > { %s161_s7 = scalar_lea.vmem %s847_s0, %s554_s4 }
  0x16   : > { %v178_v0 = vld [vmem:[%s161_s7] sm:$0xff]  }
  0x17   : > { %v182_v1 = vld [vmem:[%s161_s7 + $0x40] sm:$0xff]   ;;  %179 = vst [vmem:[%s156_s8] sm:$0xff] %v178_v0  }
  0x18   : > { %v186_v2 = vld [vmem:[%s161_s7 + $0x80] sm:$0xff]   ;;  %183 = vst [vmem:[%s156_s8 + $0x8] sm:$0xff] %v182_v1  }
  0x19   : > { %187 = vst [vmem:[%s156_s8 + $0x10] sm:$0xff] %v186_v2  }
  0x1a PF: > { %p555_p7 = scmp.ge.s32.totalorder %s710_s18, 1  ;;  %p242_p8 = scmp.lt.s32.totalorder %s710_s18, 9 }
  0x1c   : > { %p243_p9 = pnand %p555_p7, %p242_p8 }
  0x1d   : > { %s249_s9 = sand.u32 (!%p243_p9), 1, %s686_s12   ;;  %p288_p10 = scmp.lt.s32.totalorder (!%p243_p9), %s694_s14, 3 }
  0x1e   : > { %246 = sbr.rel (%p243_p9) target bundleno = 576 (0x240), region = 69  ;;  %p291_p11 = scmp.lt.s32.totalorder (!%p243_p9), %s698_s15, 1 }
  0x1f   : > { %s589_s10 = smul.u32 (!%p243_p9), 24, %s249_s9 }
  0x21   : > { %s798_s11 = scalar_lea.vmem (!%p243_p9), [#allocation2], %s589_s10 }
  0x23   : > { %s864_s14 = smov (!%p288_p10, %s694_s14), 3  ;;  %vm336_vm0 = vcmask 64512   ;;  %v578_v3 = vld [vmem:[%s798_s11 + $0x8] sm:$0xff]  ;;  %v581_v4 = vld [vmem:[%s798_s11] sm:$0xff]   ;;  %s866_s15 = smov (!%p291_p11, %s698_s15), 1  ;;  %vm359_vm1 = vcmask 121856  }
  0x24   : > { %s290_s23 = scalar_lea.vmem %s848_s1, %s864_s14  ;;  %v582_v5 = vunpack.c.l.bf16 %v581_v4  ;;  %v583_v6 = vunpack.c.h.bf16 %v581_v4  ;;  %v341_v8 = vsel %vm336_vm0, %v578_v3, 0  ;;  %s556_s12 = sshll.u32 %s864_s14, 1  ;;  %vm363_vm2 = vcmask 120832   ;;  %v579_v33 = vld [vmem:[%s798_s11 + $0x10] sm:$0xff] }
  0x25   : > { %v647_v7 = vld [vmem:[%s290_s23] ss:$0 sm:$0xff]  ;;  %350 = vmatpush.bf16.xpose.msra.mxu0 %v341_v8  ;;  %s557_s24 = sshll.u32 %s866_s15, 3  ;;  %vm392_vm3 = vcmask 1046528   ;;  %vm393_vm4 = vcmask 1047552   ;;  %v712_v34 = vmov 65535  }
  0x26   : > { %v318_v9 = vadd.f32 %v647_v7, %v582_v5  ;;  %v319_v10 = vadd.f32 %v647_v7, %v583_v6  ;;  %s807_s26 = sadd.s32 %s557_s24, %s556_s12  ;;  %v394_v35 = vsel %vm392_vm3, 4294967295, %v712_v34  ;;  %vm415_vm5 = vcmask 60416  }
  0x27   : > { %s558_s27 = sshll.u32 %s807_s26, 2  ;;  %v395_v36 = vsel %vm393_vm4, %v394_v35, 0  ;;  %vm418_vm6 = vsmask.f32 3328 }
  0x28   : > { %v326_v11 = vpack.c.bf16 %v319_v10, %v318_v9  ;;  %s299_s30 = scalar_lea.vmem %s849_s2, %s558_s27  ;;  %v397_v37 = vand.u32 %v579_v33, %v395_v36  ;;  %s308_s4 = scalar_lea.vmem %s850_s3, %s558_s27  ;;  %vm419_vm7 = vmand %vm415_vm5, %vm418_vm6 }
  0x29   : > { %v585_v12 = vld [vmem:[%s299_s30] sm:$0xff]  }
  0x2a   : > { %v586_v13 = vunpack.c.l.bf16 %v585_v12  ;;  %v587_v18 = vunpack.c.h.bf16 %v585_v12  ;;  %406 = vmatpush.bf16.msra.mxu1 %v397_v37  ;;  %v420_v48 = vld [vmem:[%s308_s4 + $0x4] sm:$0xf] }
  0x2c   : > { %570 = vmatmul.msk.bf16.vlgmr.msra.gmra.mxu0 %vm336_vm0, %v326_v11 }
  0xa9   : > { %v352_v14 = vpop.f32.mrf.mxu0 }
  0xaa   : > { %v353_v15 = vadd.f32 %v586_v13, %v352_v14 }
  0xac   : > { %v357_v16 = vmul.f32 0.17677669, %v353_v15 }
  0xae   : > { %v360_v17 = vsel %vm359_vm1, %v357_v16, -inf }
  0xaf   : > { %361 = vmax.xlane.f32.xlu0 %v360_v17 }
  0xb1   : > { %v354_v19 = vpop.f32.mrf.mxu0 }
  0xb2   : > { %v355_v20 = vadd.f32 %v587_v18, %v354_v19 }
  0xb4   : > { %v358_v21 = vmul.f32 0.17677669, %v355_v20 }
  0xb6   : > { %v364_v22 = vsel %vm363_vm2, %v358_v21, -inf }
  0xb7   : > { %365 = vmax.xlane.f32.xlu0 %v364_v22 }
 0x122   : > { %v362_v23 = vpop.xlane.xlu0 %361 }
 0x123   : > { %v367_v24 = vsub.f32 %v357_v16, %v362_v23 }
 0x125   : > { %v369_v25 = vmul.f32 1.442695, %v367_v24 }
 0x127   : > { %648 = vpow2.f32 %v369_v25 }
 0x12a   : > { %v366_v26 = vpop.xlane.xlu0 %365 }
 0x12b   : > { %v368_v27 = vsub.f32 %v358_v21, %v366_v26 }
 0x12d   : > { %v649_v28 = vpop.eup %648  ;;  %v371_v29 = vmul.f32 1.442695, %v368_v27 }
 0x12e   : > { %v373_v30 = vsel %vm359_vm1, %v649_v28, 0.0 }
 0x12f   : > { %650 = vpow2.f32 %v371_v29  ;;  %374 = vadd.xlane.f32.xlu1 %v373_v30 }
 0x135   : > { %v651_v31 = vpop.eup %650 }
 0x136   : > { %v376_v32 = vsel %vm363_vm2, %v651_v31, 0.0 }
 0x137   : > { %377 = vadd.xlane.f32.xlu1 %v376_v32 }
 0x1a2   : > { %v375_v38 = vpop.xlane.xlu1 %374 }
 0x1a3   : > { %652 = vrcp.f32 %v375_v38 }
 0x1a9   : > { %v653_v40 = vpop.eup %652 }
 0x1aa   : > { %v378_v39 = vpop.xlane.xlu1 %377  ;;  %v381_v42 = vmul.f32 %v653_v40, %v649_v28 }
 0x1ab   : > { %654 = vrcp.f32 %v378_v39 }
 0x1b1   : > { %v655_v41 = vpop.eup %654 }
 0x1b2   : > { %v382_v43 = vmul.f32 %v655_v41, %v651_v31 }
 0x1b4   : > { %v383_v44 = vpack.c.bf16 %v382_v43, %v381_v42 }
 0x1b6   : > { %575 = vmatmul.msk.bf16.vlgmr.msra.gmra.mxu1 %vm359_vm1, %v383_v44 }
 0x233   : > { %v408_v45 = vpop.f32.mrf.mxu1 }
 0x234   : > { %v413_v46 = vpack.c.bf16 %v408_v45, %v408_v45 }
 0x236   : > { %416 = vst.msk [vmem:[%s308_s4] sm:$0xf] %vm415_vm5, %v413_v46 }
 0x23b   : > { %v410_v47 = vpop.f32.mrf.mxu1 }
 0x23c   : > { %v414_v49 = vpack.c.bf16 %v410_v47, %v410_v47 }
 0x23e   : > { %v421_v50 = vsel %vm419_vm7, %v414_v49, %v420_v48 }
 0x23f   : > { %422 = vst [vmem:[%s308_s4 + $0x4] sm:$0xf] %v421_v50 }
 0x240 PF: > { %s13_s18 = sadd.s32 1, %s710_s18   ;;  %s851_s12 = smov %s690_s13 }
 0x241   : > { %p10_p12 = scmp.ge.s32.totalorder %s13_s18, 10   ;;  %s852_s13 = smov %s784_s25 }
 0x242   : > { %s853_s14 = smov %s702_s16  ;;  %s854_s15 = smov %s706_s17 }
 0x243   : > { %s855_s16 = smov %s858_s19  ;;  %s856_s17 = smov %s862_s20 }
 0x244   :  { %12 = sbr.rel (!%p10_p12) target bundleno = 4 (0x4), region = 116 }

// kernel: _lambda_.37
= control target key start
LH: loop header
LB: loop body
LE: loop exit
PB: predicated region body
PF: predicated region fallthrough
CT: control target
= control target key end

     0   :  { %s634_s15 = smov 0   ;;  %s636_s16 = smov 0   ;;  %s679_s0 = inlined_call_operand.vmem [shape: bf16[32,32], index: 0, kind: input, shape index: {}]   ;;  %s680_s1 = inlined_call_operand.vmem [shape: bf16[32,128], index: 1, kind: input, shape index: {}]   ;;  %s681_s2 = inlined_call_operand.vmem [shape: f32[1,128], index: 2, kind: input, shape index: {}]   ;;  %s682_s3 = inlined_call_operand.vmem [shape: bf16[32,128], index: 3, kind: input, shape index: {}]   ;;  %s683_s4 = inlined_call_operand.vmem [shape: bf16[32,128], index: 4, kind: output, shape index: {}]  }
   0x1   :  { %s638_s17 = smov 0  }
   0x2 LB: > { %s33_s18 = sadd.s32 1, %s603_s16  ;;  %p526_p0 = scmp.ge.s32.totalorder %s607_s17, 1  ;;  %s607_s17 = sphi %s638_s17, %s14_s17   ;;  %s603_s16 = sphi %s636_s16, %s685_s16   ;;  %s599_s15 = sphi %s634_s15, %s684_s15  }
   0x3   : > { %p35_p1 = scmp.ge.s32.totalorder %s33_s18, 2  ;;  %p229_p2 = scmp.lt.s32.totalorder %s607_s17, 3 }
   0x5   : > { %s687_s18 = smov (%p35_p1, %s33_s18), 0  ;;  %p230_p3 = pnand %p526_p0, %p229_p2 }
   0x6   : > { %s527_s21 = sshll.u32 (!%p230_p3), %s599_s15, 1 }
   0x7   : > { %233 = sbr.rel (%p230_p3) target bundleno = 161 (0xa1), region = 36  ;;  %p281_p4 = scmp.lt.s32.totalorder (!%p230_p3), %s527_s21, 3 }
   0xc   : > { %v550_v0 = vld [vmem:[%s680_s1 + $0x8] sm:$0xff]  ;;  %v549_v1 = vld [vmem:[%s680_s1] sm:$0xff]  ;;  %s689_s21 = smov (!%p281_p4, %s527_s21), 3  ;;  %vm351_vm0 = vcmask 261120  }
   0xd   : > { %361 = vmatpush.bf16.msra.mxu0 %v550_v0  ;;  %s528_s24 = sshll.u32 %s689_s21, 2  ;;  %v584_v4 = vld [vmem:[%s681_s2] ss:$0 sm:$0xff] }
   0xe   : > { %s287_s27 = scalar_lea.vmem %s679_s0, %s528_s24  ;;  %s308_s30 = scalar_lea.vmem %s682_s3, %s528_s24 }
   0xf   : > { %v548_v2 = vld [vmem:[%s287_s27] sm:$0xff]  ;;  %s317_s9 = scalar_lea.vmem %s683_s4, %s528_s24 }
  0x10   : > { %v552_v5 = vld [vmem:[%s308_s30] sm:$0xff]  }
  0x11   : > { %362 = vmatpush.bf16.msra.mxu0 %v549_v1  ;;  %v553_v7 = vunpack.c.l.bf16 %v552_v5  ;;  %v554_v8 = vunpack.c.h.bf16 %v552_v5 }
  0x14   : > { %545 = vmatmul.msk.bf16.vlgmr.msra.gmra.mxu0 %vm351_vm0, %v548_v2 }
  0x91   : > { %v364_v3 = vpop.f32.mrf.mxu0 }
  0x92   : > { %v382_v6 = vadd.f32 %v584_v4, %v364_v3 }
  0x94   : > { %v388_v11 = vadd.f32 %v553_v7, %v382_v6 }
  0x99   : > { %v366_v9 = vpop.f32.mrf.mxu0 }
  0x9a   : > { %v383_v10 = vadd.f32 %v584_v4, %v366_v9 }
  0x9c   : > { %v389_v12 = vadd.f32 %v554_v8, %v383_v10 }
  0x9e   : > { %v558_v13 = vpack.c.bf16 %v389_v12, %v388_v11 }
  0xa0   : > { %559 = vst [vmem:[%s317_s9] sm:$0xff] %v558_v13  }
  0xa1 PF: > { %s14_s17 = sadd.s32 1, %s607_s17   ;;  %s684_s15 = smov %s603_s16 }
  0xa2   : > { %p11_p5 = scmp.ge.s32.totalorder %s14_s17, 4   ;;  %s685_s16 = smov %s687_s18 }
  0xa4   :  { %13 = sbr.rel (!%p11_p5) target bundleno = 2 (0x2), region = 83 }

// kernel: _lambda_.38
= control target key start
LH: loop header
LB: loop body
LE: loop exit
PB: predicated region body
PF: predicated region fallthrough
CT: control target
= control target key end

     0   :  { %s758_s18 = smov 0   ;;  %s760_s19 = smov 0   ;;  %s826_s0 = inlined_call_operand.vmem [shape: bf16[32,32], index: 0, kind: input, shape index: {}]   ;;  %s827_s1 = inlined_call_operand.vmem [shape: bf16[32,64], index: 1, kind: input, shape index: {}]   ;;  %s828_s2 = inlined_call_operand.vmem [shape: f32[1,64], index: 2, kind: input, shape index: {}]   ;;  %s829_s3 = inlined_call_operand.vmem [shape: f32[1,32], index: 3, kind: input, shape index: {}]   ;;  %s830_s4 = inlined_call_operand.vmem [shape: f32[1,32], index: 4, kind: input, shape index: {}]   ;;  %s831_s5 = inlined_call_operand.vmem [shape: bf16[32,32], index: 5, kind: output, shape index: {}]  }
   0x1   :  { %s762_s20 = smov 0  }
   0x2 LB: > { %s34_s21 = sadd.s32 1, %s719_s19  ;;  %p628_p0 = scmp.ge.s32.totalorder %s723_s20, 1  ;;  %s723_s20 = sphi %s762_s20, %s15_s20   ;;  %s719_s19 = sphi %s760_s19, %s833_s19   ;;  %s715_s18 = sphi %s758_s18, %s832_s18  }
   0x3   : > { %p36_p1 = scmp.ge.s32.totalorder %s34_s21, 2  ;;  %p238_p2 = scmp.lt.s32.totalorder %s723_s20, 3 }
   0x5   : > { %s835_s21 = smov (%p36_p1, %s34_s21), 0  ;;  %p239_p3 = pnand %p628_p0, %p238_p2 }
   0x6   : > { %s629_s22 = sshll.u32 (!%p239_p3), %s715_s18, 1  ;;  %s727_s12 = smov (!%p239_p3), 96  }
   0x7   : > { %242 = sbr.rel (%p239_p3) target bundleno = 574 (0x23e), region = 40  ;;  %p284_p4 = scmp.lt.s32.totalorder (!%p239_p3), %s629_s22, 3 }
   0xc   : > { %s837_s22 = smov (!%p284_p4, %s629_s22), 3  ;;  %vm330_vm0 = vcmask 261120   ;;  %v725_v5 = vmov 32.0   ;;  %v652_v25 = vld [vmem:[%s827_s1 + $0x8] sm:$0xff]  ;;  %v651_v28 = vld [vmem:[%s827_s1] sm:$0xff]  ;;  %vm318_vm2 = vcmask 523264  }
   0xd   : > { %s630_s23 = sshll.u32 %s837_s22, 2  ;;  %687 = vrcp.f32 %v725_v5  ;;  %434 = vmatpush.bf16.msra.mxu0 %v652_v25  ;;  %v726_v34 = vmov 0.0   ;;  %v684_v39 = vld [vmem:[%s829_s3] ss:$0 sm:$0xff]  ;;  %vm396_vm7 = vcmask 257024  }
   0xe   : > { %s290_s26 = scalar_lea.vmem %s826_s0, %s630_s23  ;;  %319 = vst.msk [vmem:[#allocation2] sm:$0xff] %vm318_vm2, %v726_v34  ;;  %v685_v42 = vld [vmem:[%s830_s4] ss:$0 sm:$0xff]  ;;  %s311_s15 = scalar_lea.vmem %s831_s5, %s630_s23 }
   0xf   : > { %v654_v0 = vld [vmem:[%s290_s26] sm:$0xff]   ;;  %320 = vst.msk [vmem:[#allocation2 + $0x8] sm:$0xff] %vm318_vm2, %v726_v34 }
  0x10   : > { %v655_v1 = vunpack.c.l.bf16 %v654_v0  ;;  %v656_v3 = vunpack.c.h.bf16 %v654_v0  ;;  %v686_v60 = vld [vmem:[%s828_s2] ss:$0 sm:$0xff] }
  0x11   : > { %435 = vmatpush.bf16.msra.mxu0 %v651_v28 }
  0x12   : > { %v331_v2 = vsel %vm330_vm0, %v655_v1, 0.0  ;;  %v334_v4 = vsel %vm330_vm0, %v656_v3, 0.0 }
  0x13   : > { %332 = vadd.xlane.f32.xlu0 %v331_v2  ;;  %v688_v6 = vpop.eup %687 }
  0x14   : > { %v338_v7 = vmul.f32 32.0, %v688_v6  ;;  %vm342_vm1 = vweird.f32 %v688_v6 }
  0x15   : > { %v401_v56 = vld [vmem:[#allocation2] sm:$0xff] }
  0x16   : > { %v339_v8 = vsub.f32 1.0, %v338_v7  ;;  %v402_v59 = vld [vmem:[#allocation2 + $0x8] sm:$0xff] }
  0x18   : > { %v340_v9 = vmul.f32 %v688_v6, %v339_v8 }
  0x1a   : > { %v341_v10 = vadd.f32 %v688_v6, %v340_v9 }
  0x1b   : > { %335 = vadd.xlane.f32.xlu0 %v334_v4 }
  0x1c   : > { %v343_v11 = vsel %vm342_vm1, %v688_v6, %v341_v10 }
  0x86   : > { %v333_v12 = vpop.xlane.xlu0 %332 }
  0x87   : > { %v344_v13 = vmul.f32 %v343_v11, %v333_v12 }
  0x89   : > { %v346_v14 = vsub.f32 %v655_v1, %v344_v13 }
  0x8b   : > { %v348_v15 = vmul.f32 %v346_v14, %v346_v14 }
  0x8d   : > { %v350_v16 = vsel %vm330_vm0, %v348_v15, 0.0 }
  0x8e   : > { %351 = vadd.xlane.f32.xlu1 %v350_v16  ;;  %v336_v17 = vpop.xlane.xlu0 %335 }
  0x8f   : > { %v345_v18 = vmul.f32 %v343_v11, %v336_v17 }
  0x91   : > { %v347_v19 = vsub.f32 %v656_v3, %v345_v18 }
  0x93   : > { %v349_v20 = vmul.f32 %v347_v19, %v347_v19 }
  0x95   : > { %v353_v21 = vsel %vm330_vm0, %v349_v20, 0.0 }
  0x96   : > { %354 = vadd.xlane.f32.xlu1 %v353_v21 }
 0x101   : > { %v352_v22 = vpop.xlane.xlu1 %351 }
 0x102   : > { %v356_v23 = vmul.f32 %v352_v22, %v343_v11 }
 0x104   : > { %v358_v24 = vadd.f32 1e-05, %v356_v23 }
 0x106   : > { %689 = vrsqrt.f32 %v358_v24  ;;  %vm366_vm4 = vweird.f32 %v358_v24 }
 0x109   : > { %v355_v26 = vpop.xlane.xlu1 %354 }
 0x10a   : > { %v357_v27 = vmul.f32 %v355_v26, %v343_v11 }
 0x10c   : > { %v690_v29 = vpop.eup %689  ;;  %v359_v30 = vadd.f32 1e-05, %v357_v27 }
 0x10d   : > { %v361_v31 = vmul.f32 %v690_v29, %v358_v24  ;;  %vm367_vm3 = vweird.f32 %v690_v29 }
 0x10e   : > { %691 = vrsqrt.f32 %v359_v30  ;;  %vm368_vm5 = vmor %vm366_vm4, %vm367_vm3  ;;  %vm376_vm8 = vweird.f32 %v359_v30 }
 0x10f   : > { %v362_v32 = vmul.f32 %v690_v29, %v361_v31 }
 0x111   : > { %v363_v33 = vmul.f32 0.5, %v362_v32 }
 0x113   : > { %v364_v35 = vsub.f32 1.5, %v363_v33 }
 0x114   : > { %v692_v36 = vpop.eup %691 }
 0x115   : > { %v365_v37 = vmul.f32 %v690_v29, %v364_v35  ;;  %v371_v38 = vmul.f32 %v692_v36, %v359_v30  ;;  %vm377_vm6 = vweird.f32 %v692_v36 }
 0x116   : > { %vm378_vm9 = vmor %vm376_vm8, %vm377_vm6 }
 0x117   : > { %v369_v40 = vsel %vm368_vm5, %v690_v29, %v365_v37  ;;  %v372_v41 = vmul.f32 %v692_v36, %v371_v38 }
 0x118   : > { %v380_v43 = vmul.f32 %v369_v40, %v346_v14 }
 0x119   : > { %v373_v44 = vmul.f32 0.5, %v372_v41 }
 0x11a   : > { %v386_v45 = vmul.f32 %v684_v39, %v380_v43 }
 0x11b   : > { %v374_v46 = vsub.f32 1.5, %v373_v44 }
 0x11c   : > { %v392_v47 = vadd.f32 %v685_v42, %v386_v45 }
 0x11d   : > { %v375_v48 = vmul.f32 %v692_v36, %v374_v46 }
 0x11e   : > { %v394_v49 = vpack.c.bf16 %v392_v47, %v392_v47 }
 0x11f   : > { %v379_v50 = vsel %vm378_vm9, %v692_v36, %v375_v48 }
 0x120   : > { %397 = vst.msk [vmem:[#allocation3] sm:$0xf] %vm396_vm7, %v394_v49  ;;  %v381_v51 = vmul.f32 %v379_v50, %v347_v19 }
 0x122   : > { %v387_v52 = vmul.f32 %v684_v39, %v381_v51 }
 0x124   : > { %v393_v53 = vadd.f32 %v685_v42, %v387_v52 }
 0x126   : > { %v395_v54 = vpack.c.bf16 %v393_v53, %v393_v53 }
 0x128   : > { %398 = vst.msk [vmem:[#allocation3 + $0x4] sm:$0xf] %vm396_vm7, %v395_v54 }
 0x12f   : > { %v650_v55 = vld [vmem:[#allocation3] sm:$0xff] }
 0x130   : > { %645 = vmatmul.msk.bf16.vlgmr.msra.gmra.mxu0 %vm330_vm0, %v650_v55 }
 0x1ad   : > { %v437_v57 = vpop.f32.mrf.mxu0 }
 0x1ae   : > { %v442_v58 = vadd.f32 %v437_v57, %v401_v56 }
 0x1b0   : > { %445 = vst.msk [vmem:[#allocation2] sm:$0xff] %vm318_vm2, %v442_v58 }
 0x1b5   : > { %v439_v61 = vpop.f32.mrf.mxu0 }
 0x1b6   : > { %v443_v62 = vadd.f32 %v439_v61, %v402_v59 }
 0x1b7   : > { %v450_v63 = vld [vmem:[#allocation2] sm:$0xff] }
 0x1b8   : > { %446 = vst.msk [vmem:[#allocation2 + $0x8] sm:$0xff] %vm318_vm2, %v443_v62  ;;  %v456_v0 = vadd.f32 %v686_v60, %v450_v63 }
 0x1ba   : > { %v646_v1 = vmul.f32 -1.442695, %v456_v0 }
 0x1bc   : > { %693 = vpow2.f32 %v646_v1 }
 0x1bf   : > { %v451_v2 = vld [vmem:[#allocation2 + $0x8] sm:$0xff] }
 0x1c0   : > { %v457_v3 = vadd.f32 %v686_v60, %v451_v2 }
 0x1c2   : > { %v694_v4 = vpop.eup %693  ;;  %v647_v5 = vmul.f32 -1.442695, %v457_v3 }
 0x1c3   : > { %v464_v6 = vadd.f32 1.0, %v694_v4 }
 0x1c4   : > { %695 = vpow2.f32 %v647_v5 }
 0x1c5   : > { %697 = vrcp.f32 %v464_v6  ;;  %v477_v12 = vand.u32 2147483648, %v464_v6  ;;  %v475_v14 = vand.u32 2147483647, %v464_v6  ;;  %vm471_vm11 = vweird.f32 %v464_v6 }
 0x1c7   : > { %v478_v17 = vor.u32 1.1754944e-38, %v477_v12  ;;  %vm476_vm13 = vcmp.eq.f32.partialorder %v475_v14, 8.507059e+37 }
 0x1ca   : > { %v696_v7 = vpop.eup %695 }
 0x1cb   : > { %v698_v8 = vpop.eup %697  ;;  %v465_v9 = vadd.f32 1.0, %v696_v7 }
 0x1cc   : > { %v467_v10 = vmul.f32 %v698_v8, %v464_v6  ;;  %vm472_vm10 = vweird.f32 %v698_v8 }
 0x1cd   : > { %699 = vrcp.f32 %v465_v9  ;;  %vm473_vm12 = vmor %vm471_vm11, %vm472_vm10  ;;  %v492_v22 = vand.u32 2147483648, %v465_v9  ;;  %v490_v24 = vand.u32 2147483647, %v465_v9  ;;  %vm486_vm15 = vweird.f32 %v465_v9 }
 0x1ce   : > { %v468_v11 = vsub.f32 1.0, %v467_v10 }
 0x1cf   : > { %v493_v26 = vor.u32 1.1754944e-38, %v492_v22  ;;  %vm491_vm1 = vcmp.eq.f32.partialorder %v490_v24, 8.507059e+37 }
 0x1d0   : > { %v469_v13 = vmul.f32 %v698_v8, %v468_v11 }
 0x1d2   : > { %v470_v15 = vadd.f32 %v698_v8, %v469_v13 }
 0x1d3   : > { %v700_v16 = vpop.eup %699 }
 0x1d4   : > { %v474_v18 = vsel %vm473_vm12, %v698_v8, %v470_v15  ;;  %v482_v19 = vmul.f32 %v700_v16, %v465_v9  ;;  %vm487_vm14 = vweird.f32 %v700_v16 }
 0x1d5   : > { %v479_v20 = vsel %vm476_vm13, %v478_v17, %v474_v18  ;;  %vm488_vm0 = vmor %vm486_vm15, %vm487_vm14 }
 0x1d6   : > { %498 = vrot.lane.b32.xlu2 %v479_v20, %s727_s12  ;;  %v483_v21 = vsub.f32 1.0, %v482_v19 }
 0x1d8   : > { %v484_v23 = vmul.f32 %v700_v16, %v483_v21 }
 0x1da   : > { %v485_v25 = vadd.f32 %v700_v16, %v484_v23 }
 0x1dc   : > { %v489_v27 = vsel %vm488_vm0, %v700_v16, %v485_v25 }
 0x1dd   : > { %v494_v28 = vsel %vm491_vm1, %v493_v26, %v489_v27 }
 0x1de   : > { %500 = vrot.lane.b32.xlu2 %v494_v28, %s727_s12 }
 0x230   : > { %v499_v29 = vpop.permute.xlu2 %498 }
 0x231   : > { %v504_v30 = vmul.f32 %v499_v29, %v456_v0 }
 0x233   : > { %v506_v31 = vpack.c.bf16 %v504_v30, %v504_v30 }
 0x235   : > { %509 = vst.msk [vmem:[%s311_s15] sm:$0xf] %vm396_vm7, %v506_v31 }
 0x238   : > { %v501_v32 = vpop.permute.xlu2 %500 }
 0x239   : > { %v505_v33 = vmul.f32 %v501_v32, %v457_v3 }
 0x23b   : > { %v507_v34 = vpack.c.bf16 %v505_v33, %v505_v33 }
 0x23d   : > { %510 = vst.msk [vmem:[%s311_s15 + $0x4] sm:$0xf] %vm396_vm7, %v507_v34 }
 0x23e PF: > { %s15_s20 = sadd.s32 1, %s723_s20   ;;  %s832_s18 = smov %s719_s19 }
 0x23f   : > { %p12_p5 = scmp.ge.s32.totalorder %s15_s20, 4   ;;  %s833_s19 = smov %s835_s21 }
 0x241   :  { %14 = sbr.rel (!%p12_p5) target bundleno = 2 (0x2), region = 88 }

// kernel: _lambda_.39
= control target key start
LH: loop header
LB: loop body
LE: loop exit
PB: predicated region body
PF: predicated region fallthrough
CT: control target
= control target key end

     0   :  { %s543_s15 = smov 0   ;;  %s636_s0 = inlined_call_operand.vmem [shape: bf16[2,23,32], index: 0, kind: input, shape index: {}]   ;;  %s637_s1 = inlined_call_operand.vmem [shape: f32[9,32], index: 1, kind: input, shape index: {}]   ;;  %s638_s2 = inlined_call_operand.vmem [shape: f32[1,32], index: 2, kind: input, shape index: {}]   ;;  %s639_s3 = inlined_call_operand.vmem [shape: f32[1,32], index: 3, kind: input, shape index: {}]   ;;  %s640_s4 = inlined_call_operand.vmem [shape: bf16[2,15,32], index: 4, kind: output, shape index: {}]  }
   0x1 LB: > { %s465_s16 = sadd.s32 4294967295, %s516_s15   ;;  %p469_p0 = scmp.ge.s32.totalorder %s516_s15, 1  ;;  %s516_s15 = sphi %s543_s15, %s14_s15  }
   0x2   : > { %p162_p1 = scmp.lt.s32.totalorder %s516_s15, 3 }
   0x4   : > { %p163_p2 = pnand %p469_p0, %p162_p1 }
   0x5   : > { %p188_p3 = scmp.lt.s32.totalorder (!%p163_p2), %s465_s16, 1 }
   0x6   : > { %166 = sbr.rel (%p163_p2) target bundleno = 80 (0x50), region = 36 }
   0xb   : > { %s642_s16 = smov (!%p188_p3, %s465_s16), 1  ;;  %v491_v0 = vld [vmem:[%s637_s1] ss:$0 sm:$0xff]  ;;  %v492_v1 = vld [vmem:[%s637_s1 + $0x1] ss:$0 sm:$0xff]  ;;  %vm212_vm0 = vcmask 1046528  }
   0xc   : > { %s482_s17 = smul.u32 12, %s642_s16  ;;  %v493_v2 = vld [vmem:[%s637_s1 + $0x2] ss:$0 sm:$0xff]  ;;  %vm232_vm1 = vcmask 1045504   ;;  %v494_v3 = vld [vmem:[%s637_s1 + $0x3] ss:$0 sm:$0xff] }
   0xd   : > { %vm250_vm2 = vcmask 1044480   ;;  %vm272_vm3 = vcmask 1043456   ;;  %v495_v25 = vld [vmem:[%s637_s1 + $0x4] ss:$0 sm:$0xff]  ;;  %vm290_vm4 = vcmask 1042432   ;;  %vm312_vm5 = vcmask 1041408  }
   0xe   : > { %s566_s26 = scalar_lea.vmem %s636_s0, %s482_s17  ;;  %v496_v34 = vld [vmem:[%s637_s1 + $0x5] ss:$0 sm:$0xff]  ;;  %v497_v48 = vld [vmem:[%s637_s1 + $0x6] ss:$0 sm:$0xff]  ;;  %v498_v61 = vld [vmem:[%s637_s1 + $0x7] ss:$0 sm:$0xff] }
   0xf   : > { %v479_v4 = vld [vmem:[%s566_s26] sm:$0xff]   ;;  %v221_v6 = vld [vmem:[%s566_s26 + $0x8] sm:$0x1]  ;;  %vm330_vm6 = vcmask 1040384   ;;  %s477_s19 = sshll.u32 %s642_s16, 3  ;;  %vm402_vm15 = vcmask 257024  }
  0x10   : > { %v220_v5 = vld [vmem:[%s566_s26] sm:$0xe]  ;;  %v480_v7 = vunpack.c.l.bf16 %v479_v4  ;;  %v574_v8 = vunpack.c.h.bf16 %v479_v4  ;;  %v223_v10 = vunpack.c.l.bf16 %v221_v6  ;;  %v261_v12 = vld [vmem:[%s566_s26 + $0x8] sm:$0x3]  ;;  %s197_s22 = scalar_lea.vmem %s640_s4, %s477_s19 }
  0x11   : > { %v222_v9 = vunpack.c.l.bf16 %v220_v5  ;;  %v260_v11 = vld [vmem:[%s566_s26] sm:$0xc]  ;;  %v263_v15 = vunpack.c.l.bf16 %v261_v12  ;;  %v301_v47 = vld [vmem:[%s566_s26 + $0x8] sm:$0x7] }
  0x12   : > { %v579_v13 = vld [vmem:[%s566_s26] sm:$0x8]  ;;  %v262_v14 = vunpack.c.l.bf16 %v260_v11  ;;  %v204_v17 = vmul.f32 %v491_v0, %v480_v7  ;;  %v205_v18 = vmul.f32 %v491_v0, %v574_v8  ;;  %v208_v19 = vmul.f32 %v492_v1, %v480_v7  ;;  %v340_v6 = vld [vmem:[%s566_s26 + $0x8] sm:$0xf] }
  0x13   : > { %v302_v16 = vunpack.c.l.bf16 %v579_v13  ;;  %v209_v20 = vmul.f32 %v492_v1, %v574_v8  ;;  %v226_v21 = vmul.f32 %v493_v2, %v222_v9  ;;  %v227_v22 = vmul.f32 %v493_v2, %v574_v8 }
  0x14   : > { %v228_v23 = vmul.f32 %v493_v2, %v223_v10  ;;  %v244_v24 = vmul.f32 %v494_v3, %v222_v9  ;;  %v213_v26 = vrot.slane %v208_v19, 1  ;;  %v245_v28 = vmul.f32 %v494_v3, %v574_v8 }
  0x15   : > { %v214_v27 = vrot.slane %v209_v20, 1  ;;  %v246_v29 = vmul.f32 %v494_v3, %v223_v10  ;;  %v233_v30 = vrot.slane %v226_v21, 2  ;;  %v234_v31 = vrot.slane %v227_v22, 2 }
  0x16   : > { %v236_v32 = vrot.slane %v228_v23, 2  ;;  %v251_v33 = vrot.slane %v244_v24, 3  ;;  %v252_v37 = vrot.slane %v245_v28, 3  ;;  %v266_v42 = vmul.f32 %v495_v25, %v262_v14 }
  0x17   : > { %v215_v35 = vsel %vm212_vm0, %v213_v26, %v214_v27  ;;  %v219_v36 = vadd.f32 %v214_v27, %v205_v18  ;;  %v254_v38 = vrot.slane %v246_v29, 3  ;;  %v235_v40 = vsel %vm232_vm1, %v233_v30, %v234_v31  ;;  %v499_v18 = vld [vmem:[%s637_s1 + $0x8] ss:$0 sm:$0xff] }
  0x18   : > { %v218_v39 = vadd.f32 %v215_v35, %v204_v17  ;;  %v237_v41 = vsel %vm232_vm1, %v234_v31, %v236_v32  ;;  %v253_v44 = vsel %vm250_vm2, %v251_v33, %v252_v37  ;;  %v267_v46 = vmul.f32 %v495_v25, %v574_v8 }
  0x19   : > { %v241_v43 = vadd.f32 %v237_v41, %v219_v36  ;;  %v255_v45 = vsel %vm250_vm2, %v252_v37, %v254_v38  ;;  %v268_v50 = vmul.f32 %v495_v25, %v263_v15  ;;  %v273_v51 = vrot.slane %v266_v42, 4  ;;  %v501_v37 = vld [vmem:[%s639_s3] ss:$0 sm:$0xff] }
  0x1a   : > { %v240_v49 = vadd.f32 %v235_v40, %v218_v39  ;;  %v284_v52 = vmul.f32 %v496_v34, %v262_v14  ;;  %v274_v54 = vrot.slane %v267_v46, 4  ;;  %v285_v55 = vmul.f32 %v496_v34, %v574_v8 }
  0x1b   : > { %v259_v53 = vadd.f32 %v255_v45, %v241_v43  ;;  %v286_v56 = vmul.f32 %v496_v34, %v263_v15  ;;  %v276_v58 = vrot.slane %v268_v50, 4  ;;  %v303_v60 = vunpack.c.l.bf16 %v301_v47  ;;  %v500_v34 = vld [vmem:[%s638_s2] ss:$0 sm:$0xff] }
  0x1c   : > { %v258_v57 = vadd.f32 %v253_v44, %v240_v49  ;;  %v291_v59 = vrot.slane %v284_v52, 5  ;;  %v275_v62 = vsel %vm272_vm3, %v273_v51, %v274_v54  ;;  %v292_v63 = vrot.slane %v285_v55, 5 }
  0x1d   : > { %v294_v0 = vrot.slane %v286_v56, 5  ;;  %v306_v1 = vmul.f32 %v497_v48, %v302_v16  ;;  %v277_v2 = vsel %vm272_vm3, %v274_v54, %v276_v58  ;;  %v307_v4 = vmul.f32 %v497_v48, %v574_v8 }
  0x1e   : > { %v280_v3 = vadd.f32 %v275_v62, %v258_v57  ;;  %v308_v5 = vmul.f32 %v497_v48, %v303_v60  ;;  %v281_v7 = vadd.f32 %v277_v2, %v259_v53  ;;  %v293_v9 = vsel %vm290_vm4, %v291_v59, %v292_v63 }
  0x1f   : > { %v295_v10 = vsel %vm290_vm4, %v292_v63, %v294_v0  ;;  %v313_v11 = vrot.slane %v306_v1, 6  ;;  %v314_v14 = vrot.slane %v307_v4, 6  ;;  %v324_v17 = vmul.f32 %v498_v61, %v302_v16 }
  0x20   : > { %v298_v12 = vadd.f32 %v293_v9, %v280_v3  ;;  %v316_v15 = vrot.slane %v308_v5, 6  ;;  %v299_v19 = vadd.f32 %v295_v10, %v281_v7  ;;  %v325_v20 = vmul.f32 %v498_v61, %v574_v8 }
  0x21   : > { %v326_v21 = vmul.f32 %v498_v61, %v303_v60  ;;  %v341_v22 = vunpack.c.l.bf16 %v340_v6  ;;  %v315_v23 = vsel %vm312_vm5, %v313_v11, %v314_v14  ;;  %v331_v25 = vrot.slane %v324_v17, 7  ;;  %v407_v6 = vld [vmem:[%s197_s22 + $0x4] sm:$0xf] }
  0x22   : > { %v317_v24 = vsel %vm312_vm5, %v314_v14, %v316_v15  ;;  %v320_v26 = vadd.f32 %v315_v23, %v298_v12  ;;  %v332_v28 = vrot.slane %v325_v20, 7  ;;  %v344_v16 = vmul.f32 %v499_v18, %v574_v8 }
  0x23   : > { %v321_v27 = vadd.f32 %v317_v24, %v299_v19  ;;  %v334_v13 = vrot.slane %v326_v21, 7  ;;  %v345_v29 = vmul.f32 %v499_v18, %v341_v22  ;;  %vm405_vm0 = vsmask.f32 3328 }
  0x24   : > { %v333_v30 = vsel %vm330_vm6, %v331_v25, %v332_v28  ;;  %vm406_vm1 = vmand %vm402_vm15, %vm405_vm0 }
  0x25   : > { %v335_v31 = vsel %vm330_vm6, %v332_v28, %v334_v13  ;;  %v338_v32 = vadd.f32 %v333_v30, %v320_v26 }
  0x26   : > { %v339_v33 = vadd.f32 %v335_v31, %v321_v27 }
  0x27   : > { %v346_v35 = vadd.f32 %v344_v16, %v338_v32 }
  0x28   : > { %v347_v36 = vadd.f32 %v345_v29, %v339_v33 }
  0x29   : > { %v352_v38 = vmul.f32 %v500_v34, %v346_v35 }
  0x2a   : > { %v353_v39 = vmul.f32 %v500_v34, %v347_v36 }
  0x2b   : > { %v358_v40 = vadd.f32 %v501_v37, %v352_v38 }
  0x2c   : > { %v359_v41 = vadd.f32 %v501_v37, %v353_v39 }
  0x2d   : > { %v473_v8 = vmul.f32 -1.442695, %v358_v40 }
  0x2e   : > { %v474_v42 = vmul.f32 -1.442695, %v359_v41 }
  0x2f   : > { %502 = vpow2.f32 %v473_v8 }
  0x30   : > { %504 = vpow2.f32 %v474_v42 }
  0x35   : > { %v503_v43 = vpop.eup %502 }
  0x36   : > { %v505_v44 = vpop.eup %504  ;;  %v366_v45 = vadd.f32 1.0, %v503_v43 }
  0x37   : > { %v367_v46 = vadd.f32 1.0, %v505_v44 }
  0x38   : > { %506 = vrcp.f32 %v366_v45  ;;  %vm373_vm7 = vweird.f32 %v366_v45  ;;  %v379_v50 = vand.u32 2147483648, %v366_v45  ;;  %v377_v53 = vand.u32 2147483647, %v366_v45 }
  0x39   : > { %508 = vrcp.f32 %v367_v46  ;;  %v394_v54 = vand.u32 2147483648, %v367_v46  ;;  %vm388_vm9 = vweird.f32 %v367_v46  ;;  %v392_v56 = vand.u32 2147483647, %v367_v46 }
  0x3a   : > { %v380_v58 = vor.u32 1.1754944e-38, %v379_v50  ;;  %vm378_vm12 = vcmp.eq.f32.partialorder %v377_v53, 8.507059e+37 }
  0x3b   : > { %v395_v61 = vor.u32 1.1754944e-38, %v394_v54  ;;  %vm393_vm14 = vcmp.eq.f32.partialorder %v392_v56, 8.507059e+37 }
  0x3e   : > { %v507_v47 = vpop.eup %506 }
  0x3f   : > { %v509_v48 = vpop.eup %508  ;;  %v369_v49 = vmul.f32 %v507_v47, %v366_v45  ;;  %vm374_vm8 = vweird.f32 %v507_v47 }
  0x40   : > { %v384_v51 = vmul.f32 %v509_v48, %v367_v46  ;;  %vm389_vm10 = vweird.f32 %v509_v48  ;;  %vm375_vm11 = vmor %vm373_vm7, %vm374_vm8 }
  0x41   : > { %v370_v52 = vsub.f32 1.0, %v369_v49  ;;  %vm390_vm13 = vmor %vm388_vm9, %vm389_vm10 }
  0x42   : > { %v385_v55 = vsub.f32 1.0, %v384_v51 }
  0x43   : > { %v371_v57 = vmul.f32 %v507_v47, %v370_v52 }
  0x44   : > { %v386_v59 = vmul.f32 %v509_v48, %v385_v55 }
  0x45   : > { %v372_v60 = vadd.f32 %v507_v47, %v371_v57 }
  0x46   : > { %v387_v62 = vadd.f32 %v509_v48, %v386_v59 }
  0x47   : > { %v376_v63 = vsel %vm375_vm11, %v507_v47, %v372_v60 }
  0x48   : > { %v381_v0 = vsel %vm378_vm12, %v380_v58, %v376_v63  ;;  %v391_v1 = vsel %vm390_vm13, %v509_v48, %v387_v62 }
  0x49   : > { %v396_v2 = vsel %vm393_vm14, %v395_v61, %v391_v1  ;;  %v398_v3 = vmul.f32 %v381_v0, %v358_v40 }
  0x4a   : > { %v399_v4 = vmul.f32 %v396_v2, %v359_v41 }
  0x4b   : > { %v400_v5 = vpack.c.bf16 %v398_v3, %v398_v3 }
  0x4c   : > { %v401_v7 = vpack.c.bf16 %v399_v4, %v399_v4 }
  0x4d   : > { %403 = vst.msk [vmem:[%s197_s22] sm:$0xf] %vm402_vm15, %v400_v5 }
  0x4e   : > { %v408_v9 = vsel %vm406_vm1, %v401_v7, %v407_v6 }
  0x4f   : > { %409 = vst [vmem:[%s197_s22 + $0x4] sm:$0xf] %v408_v9 }
  0x50 PF: > { %s14_s15 = sadd.s32 1, %s516_s15  }
  0x51   : > { %p11_p4 = scmp.ge.s32.totalorder %s14_s15, 4  }
  0x53   :  { %13 = sbr.rel (!%p11_p4) target bundleno = 1 (0x1), region = 66 }

// kernel: _lambda_.42
= control target key start
LH: loop header
LB: loop body
LE: loop exit
PB: predicated region body
PF: predicated region fallthrough
CT: control target
= control target key end

     0   :  { %s799_s21 = smov 0   ;;  %s801_s22 = smov 0   ;;  %s869_s0 = inlined_call_operand.vmem [shape: bf16[32,64], index: 0, kind: input, shape index: {}]   ;;  %s870_s1 = inlined_call_operand.vmem [shape: bf16[64,32], index: 1, kind: input, shape index: {}]   ;;  %s871_s2 = inlined_call_operand.vmem [shape: f32[1,32], index: 2, kind: input, shape index: {}]   ;;  %s872_s3 = inlined_call_operand.vmem [shape: bf16[32,32], index: 3, kind: input, shape index: {}]   ;;  %s873_s4 = inlined_call_operand.vmem [shape: f32[1,32], index: 4, kind: input, shape index: {}]   ;;  %s874_s5 = inlined_call_operand.vmem [shape: f32[1,32], index: 5, kind: input, shape index: {}]   ;;  %s875_s6 = inlined_call_operand.vmem [shape: bf16[32,32], index: 6, kind: output, shape index: {}]  }
   0x1   :  { %s803_s23 = smov 0  }
   0x2 LB: > { %s35_s24 = sadd.s32 1, %s756_s22  ;;  %p664_p0 = scmp.ge.s32.totalorder %s760_s23, 1  ;;  %s760_s23 = sphi %s803_s23, %s16_s23   ;;  %s756_s22 = sphi %s801_s22, %s877_s22   ;;  %s752_s21 = sphi %s799_s21, %s876_s21  }
   0x3   : > { %p37_p1 = scmp.ge.s32.totalorder %s35_s24, 2  ;;  %p279_p2 = scmp.lt.s32.totalorder %s760_s23, 3 }
   0x5   : > { %s879_s24 = smov (%p37_p1, %s35_s24), 0  ;;  %p280_p3 = pnand %p664_p0, %p279_p2 }
   0x6   : > { %s665_s27 = sshll.u32 (!%p280_p3), %s752_s21, 1 }
   0x7   : > { %283 = sbr.rel (%p280_p3) target bundleno = 449 (0x1c1), region = 44  ;;  %p335_p4 = scmp.lt.s32.totalorder (!%p280_p3), %s665_s27, 3 }
   0xc   : > { %v698_v0 = vld [vmem:[%s870_s1 + $0x18] sm:$0xff]  ;;  %vm378_vm0 = vcmask 261120   ;;  %v697_v1 = vld [vmem:[%s870_s1 + $0x10] sm:$0xff]  ;;  %v762_v2 = vmov 0.0   ;;  %s881_s27 = smov (!%p335_p4, %s665_s27), 3  ;;  %v696_v3 = vld [vmem:[%s870_s1 + $0x8] sm:$0xff] }
   0xd   : > { %430 = vmatpush.bf16.msra.mxu0 %v698_v0  ;;  %379 = vst.msk [vmem:[#allocation2] sm:$0xff] %vm378_vm0, %v762_v2  ;;  %s828_s8 = sshll.u32 %s881_s27, 2  ;;  %v695_v4 = vld [vmem:[%s870_s1] sm:$0xff]  ;;  %vm422_vm1 = vcmask 523264   ;;  %v763_v26 = vmov 32.0   ;;  %vm529_vm7 = vcmask 257024  }
   0xe   : > { %380 = vst.msk [vmem:[#allocation2 + $0x8] sm:$0xff] %vm378_vm0, %v762_v2  ;;  %s341_s13 = scalar_lea.vmem %s869_s0, %s828_s8  ;;  %s362_s16 = scalar_lea.vmem %s872_s3, %s828_s8  ;;  %v729_v10 = vld [vmem:[%s871_s2] ss:$0 sm:$0xff]  ;;  %732 = vrcp.f32 %v763_v26 }
   0xf   : > { %v694_v5 = vld [vmem:[%s341_s13] sm:$0xff]  ;;  %s371_s28 = scalar_lea.vmem %s875_s6, %s828_s8 }
  0x10   : > { %v700_v12 = vld [vmem:[%s362_s16] sm:$0xff]  }
  0x11   : > { %431 = vmatpush.bf16.msra.mxu0 %v697_v1  ;;  %v701_v16 = vunpack.c.l.bf16 %v700_v12  ;;  %v702_v22 = vunpack.c.h.bf16 %v700_v12  ;;  %v730_v57 = vld [vmem:[%s873_s4] ss:$0 sm:$0xff] }
  0x12   : > { %v731_v60 = vld [vmem:[%s874_s5] ss:$0 sm:$0xff] }
  0x14   : > { %v383_v6 = vld [vmem:[#allocation2] sm:$0xff]  ;;  %v733_v27 = vpop.eup %732 }
  0x15   : > { %432 = vmatpush.bf16.msra.mxu0 %v696_v3  ;;  %v384_v9 = vld [vmem:[#allocation2 + $0x8] sm:$0xff]  ;;  %v471_v28 = vmul.f32 32.0, %v733_v27  ;;  %vm475_vm2 = vweird.f32 %v733_v27 }
  0x17   : > { %v472_v29 = vsub.f32 1.0, %v471_v28 }
  0x19   : > { %433 = vmatpush.bf16.msra.mxu0 %v695_v4  ;;  %v473_v30 = vmul.f32 %v733_v27, %v472_v29 }
  0x1b   : > { %v474_v31 = vadd.f32 %v733_v27, %v473_v30 }
  0x1c   : > { %691 = vmatmul.msk.bf16.vlgmr.msra.gmra.mxu0 %vm422_vm1, %v694_v5 }
  0x1d   : > { %v476_v32 = vsel %vm475_vm2, %v733_v27, %v474_v31 }
  0x99   : > { %v435_v7 = vpop.f32.mrf.mxu0 }
  0x9a   : > { %v440_v8 = vadd.f32 %v435_v7, %v383_v6 }
  0x9c   : > { %443 = vst.msk [vmem:[#allocation2] sm:$0xff] %vm378_vm0, %v440_v8 }
  0xa1   : > { %v437_v11 = vpop.f32.mrf.mxu0 }
  0xa2   : > { %v441_v13 = vadd.f32 %v437_v11, %v384_v9 }
  0xa3   : > { %v448_v14 = vld [vmem:[#allocation2] sm:$0xff] }
  0xa4   : > { %444 = vst.msk [vmem:[#allocation2 + $0x8] sm:$0xff] %vm378_vm0, %v441_v13  ;;  %v454_v15 = vadd.f32 %v729_v10, %v448_v14 }
  0xa6   : > { %v460_v17 = vmul.f32 0.5, %v454_v15 }
  0xa8   : > { %v462_v18 = vadd.f32 %v701_v16, %v460_v17 }
  0xaa   : > { %v464_v19 = vsel %vm378_vm0, %v462_v18, 0.0 }
  0xab   : > { %465 = vadd.xlane.f32.xlu0 %v464_v19  ;;  %v449_v20 = vld [vmem:[#allocation2 + $0x8] sm:$0xff] }
  0xac   : > { %v455_v21 = vadd.f32 %v729_v10, %v449_v20 }
  0xae   : > { %v461_v23 = vmul.f32 0.5, %v455_v21 }
  0xb0   : > { %v463_v24 = vadd.f32 %v702_v22, %v461_v23 }
  0xb2   : > { %v467_v25 = vsel %vm378_vm0, %v463_v24, 0.0 }
  0xb3   : > { %468 = vadd.xlane.f32.xlu0 %v467_v25 }
 0x11e   : > { %v466_v33 = vpop.xlane.xlu0 %465 }
 0x11f   : > { %v477_v34 = vmul.f32 %v476_v32, %v466_v33 }
 0x121   : > { %v479_v35 = vsub.f32 %v462_v18, %v477_v34 }
 0x123   : > { %v481_v36 = vmul.f32 %v479_v35, %v479_v35 }
 0x125   : > { %v483_v37 = vsel %vm378_vm0, %v481_v36, 0.0 }
 0x126   : > { %484 = vadd.xlane.f32.xlu1 %v483_v37  ;;  %v469_v38 = vpop.xlane.xlu0 %468 }
 0x127   : > { %v478_v39 = vmul.f32 %v476_v32, %v469_v38 }
 0x129   : > { %v480_v40 = vsub.f32 %v463_v24, %v478_v39 }
 0x12b   : > { %v482_v41 = vmul.f32 %v480_v40, %v480_v40 }
 0x12d   : > { %v486_v42 = vsel %vm378_vm0, %v482_v41, 0.0 }
 0x12e   : > { %487 = vadd.xlane.f32.xlu1 %v486_v42 }
 0x199   : > { %v485_v43 = vpop.xlane.xlu1 %484 }
 0x19a   : > { %v489_v44 = vmul.f32 %v485_v43, %v476_v32 }
 0x19c   : > { %v491_v45 = vadd.f32 1e-05, %v489_v44 }
 0x19e   : > { %734 = vrsqrt.f32 %v491_v45  ;;  %vm499_vm4 = vweird.f32 %v491_v45 }
 0x1a1   : > { %v488_v46 = vpop.xlane.xlu1 %487 }
 0x1a2   : > { %v490_v47 = vmul.f32 %v488_v46, %v476_v32 }
 0x1a4   : > { %v735_v48 = vpop.eup %734  ;;  %v492_v49 = vadd.f32 1e-05, %v490_v47 }
 0x1a5   : > { %v494_v50 = vmul.f32 %v735_v48, %v491_v45  ;;  %vm500_vm3 = vweird.f32 %v735_v48 }
 0x1a6   : > { %736 = vrsqrt.f32 %v492_v49  ;;  %vm501_vm5 = vmor %vm499_vm4, %vm500_vm3  ;;  %vm509_vm8 = vweird.f32 %v492_v49 }
 0x1a7   : > { %v495_v51 = vmul.f32 %v735_v48, %v494_v50 }
 0x1a9   : > { %v496_v52 = vmul.f32 0.5, %v495_v51 }
 0x1ab   : > { %v497_v53 = vsub.f32 1.5, %v496_v52 }
 0x1ac   : > { %v737_v54 = vpop.eup %736 }
 0x1ad   : > { %v498_v55 = vmul.f32 %v735_v48, %v497_v53  ;;  %v504_v56 = vmul.f32 %v737_v54, %v492_v49  ;;  %vm510_vm6 = vweird.f32 %v737_v54 }
 0x1ae   : > { %vm511_vm9 = vmor %vm509_vm8, %vm510_vm6 }
 0x1af   : > { %v502_v58 = vsel %vm501_vm5, %v735_v48, %v498_v55  ;;  %v505_v59 = vmul.f32 %v737_v54, %v504_v56 }
 0x1b0   : > { %v513_v61 = vmul.f32 %v502_v58, %v479_v35 }
 0x1b1   : > { %v506_v62 = vmul.f32 0.5, %v505_v59 }
 0x1b2   : > { %v519_v63 = vmul.f32 %v730_v57, %v513_v61 }
 0x1b3   : > { %v507_v0 = vsub.f32 1.5, %v506_v62 }
 0x1b4   : > { %v525_v1 = vadd.f32 %v731_v60, %v519_v63 }
 0x1b5   : > { %v508_v2 = vmul.f32 %v737_v54, %v507_v0 }
 0x1b6   : > { %v527_v3 = vpack.c.bf16 %v525_v1, %v525_v1 }
 0x1b7   : > { %v512_v4 = vsel %vm511_vm9, %v737_v54, %v508_v2 }
 0x1b8   : > { %530 = vst.msk [vmem:[%s371_s28] sm:$0xf] %vm529_vm7, %v527_v3  ;;  %v514_v5 = vmul.f32 %v512_v4, %v480_v40 }
 0x1ba   : > { %v520_v6 = vmul.f32 %v730_v57, %v514_v5 }
 0x1bc   : > { %v526_v7 = vadd.f32 %v731_v60, %v520_v6 }
 0x1be   : > { %v528_v8 = vpack.c.bf16 %v526_v7, %v526_v7 }
 0x1c0   : > { %531 = vst.msk [vmem:[%s371_s28 + $0x4] sm:$0xf] %vm529_vm7, %v528_v8 }
 0x1c1 PF: > { %s16_s23 = sadd.s32 1, %s760_s23   ;;  %s876_s21 = smov %s756_s22 }
 0x1c2   : > { %p13_p5 = scmp.ge.s32.totalorder %s16_s23, 4   ;;  %s877_s22 = smov %s879_s24 }
 0x1c4   :  { %15 = sbr.rel (!%p13_p5) target bundleno = 2 (0x2), region = 91 }

// kernel: _lambda_.55
= control target key start
LH: loop header
LB: loop body
LE: loop exit
PB: predicated region body
PF: predicated region fallthrough
CT: control target
= control target key end

     0   :  { %s535_s12 = smov 0   ;;  %s537_s13 = smov 0   ;;  %s574_s0 = inlined_call_operand.vmem [shape: bf16[32,32], index: 0, kind: input, shape index: {}]   ;;  %s575_s1 = inlined_call_operand.vmem [shape: bf16[32,128], index: 1, kind: input, shape index: {}]   ;;  %s576_s2 = inlined_call_operand.vmem [shape: f32[1,128], index: 2, kind: input, shape index: {}]   ;;  %s577_s3 = inlined_call_operand.vmem [shape: f32[32,128], index: 3, kind: output, shape index: {}]  }
   0x1   :  { %s539_s14 = smov 0  }
   0x2 LB: > { %s32_s15 = sadd.s32 1, %s509_s13  ;;  %p443_p0 = scmp.ge.s32.totalorder %s513_s14, 1  ;;  %s513_s14 = sphi %s539_s14, %s13_s14   ;;  %s509_s13 = sphi %s537_s13, %s579_s13   ;;  %s505_s12 = sphi %s535_s12, %s578_s12  }
   0x3   : > { %p34_p1 = scmp.ge.s32.totalorder %s32_s15, 2  ;;  %p188_p2 = scmp.lt.s32.totalorder %s513_s14, 3 }
   0x5   : > { %s581_s15 = smov (%p34_p1, %s32_s15), 0  ;;  %p189_p3 = pnand %p443_p0, %p188_p2 }
   0x6   : > { %s444_s18 = sshll.u32 (!%p189_p3), %s505_s12, 1 }
   0x7   : > { %192 = sbr.rel (%p189_p3) target bundleno = 157 (0x9d), region = 32  ;;  %p230_p4 = scmp.lt.s32.totalorder (!%p189_p3), %s444_s18, 3 }
   0xc   : > { %v465_v0 = vld [vmem:[%s575_s1 + $0x8] sm:$0xff]  ;;  %v464_v1 = vld [vmem:[%s575_s1] sm:$0xff]  ;;  %s583_s18 = smov (!%p230_p4, %s444_s18), 3  ;;  %vm291_vm0 = vcmask 261120  }
   0xd   : > { %301 = vmatpush.bf16.msra.mxu0 %v465_v0  ;;  %s445_s21 = sshll.u32 %s583_s18, 2  ;;  %s447_s25 = sshll.u32 %s583_s18, 3  ;;  %v490_v3 = vld [vmem:[%s576_s2] ss:$0 sm:$0xff] }
   0xe   : > { %s236_s24 = scalar_lea.vmem %s574_s0, %s445_s21  ;;  %s257_s30 = scalar_lea.vmem %s577_s3, %s447_s25 }
   0xf   : > { %v463_v2 = vld [vmem:[%s236_s24] sm:$0xff] }
  0x11   : > { %302 = vmatpush.bf16.msra.mxu0 %v464_v1 }
  0x14   : > { %460 = vmatmul.msk.bf16.vlgmr.msra.gmra.mxu0 %vm291_vm0, %v463_v2 }
  0x91   : > { %v304_v4 = vpop.f32.mrf.mxu0 }
  0x92   : > { %v322_v5 = vadd.f32 %v490_v3, %v304_v4 }
  0x94   : > { %324 = vst [vmem:[%s257_s30] sm:$0xff] %v322_v5 }
  0x99   : > { %v306_v6 = vpop.f32.mrf.mxu0 }
  0x9a   : > { %v323_v7 = vadd.f32 %v490_v3, %v306_v6 }
  0x9c   : > { %325 = vst [vmem:[%s257_s30 + $0x8] sm:$0xff] %v323_v7 }
  0x9d PF: > { %s13_s14 = sadd.s32 1, %s513_s14   ;;  %s578_s12 = smov %s509_s13 }
  0x9e   : > { %p10_p5 = scmp.ge.s32.totalorder %s13_s14, 4   ;;  %s579_s13 = smov %s581_s15 }
  0xa0   :  { %12 = sbr.rel (!%p10_p5) target bundleno = 2 (0x2), region = 76 }

</bundles_post_ra>
